<compile_context>
chip_gen: v7x
topology: tpu7x:2x2x1
jax: 0.10.0
libtpu: 0.0.40
codegen_flags: <defaults>
</compile_context>

<pallas_src>
import functools
import math

import jax
import jax.numpy as jnp
from jax.experimental import pallas as pl
from jax.experimental.pallas import tpu as pltpu

PARAM_ORDER = (
    'sa_wqkv', 'sa_bqkv', 'sa_wo', 'sa_bo',
    'ca_wq', 'ca_bq', 'ca_wkv', 'ca_bkv', 'ca_wo', 'ca_bo',
    'ff_w1', 'ff_b1', 'ff_w2', 'ff_b2',
    'ln1_g', 'ln1_b', 'ln2_g', 'ln2_b', 'ln3_g', 'ln3_b',
)


# ------------------------------ fused kernel --------------------------------

def _odeg_kernel(
    tgt_ref, mem_ref,
    sa_wqkv_ref, sa_bqkv_ref, sa_wo_ref, sa_bo_ref,
    ca_wq_ref, ca_bq_ref, ca_wkv_ref, ca_bkv_ref, ca_wo_ref, ca_bo_ref,
    ff_w1_ref, ff_b1_ref, ff_w2_ref, ff_b2_ref,
    ln1_g_ref, ln1_b_ref, ln2_g_ref, ln2_b_ref, ln3_g_ref, ln3_b_ref,
    out_ref,
    x_ref,                                   # VMEM scratch: activation carry (T*B, D) f32
    *, nhead, batch, eps, ode_time,
):
    layer = pl.program_id(0)
    nlayer = pl.num_programs(0)

    # ---- first grid step: load ODE initial state into the VMEM carry ----
    @pl.when(layer == 0)
    def _():
        x_ref[...] = tgt_ref[...].astype(jnp.float32)

    x = x_ref[...]                                   # (T*B, D) f32
    mem_bf = mem_ref[...]                            # (S*B, D) bf16 (MXU operand)

    TB, D = x.shape
    SB = mem_bf.shape[0]
    hd = D // nhead
    scale = 1.0 / math.sqrt(hd)

    def layernorm(v, g_ref, b_ref):
        mu = jnp.mean(v, axis=-1, keepdims=True)
        var = jnp.mean(jnp.square(v - mu), axis=-1, keepdims=True)
        return (v - mu) * jax.lax.rsqrt(var + eps) * g_ref[0] + b_ref[0]

    def batch_mask(n_rows, n_cols):
        # rows/cols are flattened (seq, batch) with batch minor -> batch id = idx % batch
        rb = jax.lax.broadcasted_iota(jnp.int32, (n_rows, n_cols), 0) % batch
        cb = jax.lax.broadcasted_iota(jnp.int32, (n_rows, n_cols), 1) % batch
        return rb == cb

    # Masks are layer-invariant; compute once per grid step (VPU-cheap, no HBM traffic).
    sa_mask = batch_mask(TB, TB)
    ca_mask = batch_mask(TB, SB)

    def mha(q, k, v, wo_ref, mask):
        # q: (M, D) f32 (already scaled by 1/sqrt(hd)); k, v: (N, D) f32
        # wo_ref block: (1, H, hd, D) bf16 -> output projection accumulated per head.
        m_rows = q.shape[0]
        out = jnp.zeros((m_rows, D), jnp.float32)
        for h in range(nhead):                       # unrolled at trace time (H small)
            sl = slice(h * hd, (h + 1) * hd)
            qh = q[:, sl].astype(jnp.bfloat16)
            kh = k[:, sl].astype(jnp.bfloat16)
            vh = v[:, sl].astype(jnp.bfloat16)
            s = jax.lax.dot_general(qh, kh, (((1,), (1,)), ((), ())),
                                    preferred_element_type=jnp.float32)
            s = jnp.where(mask, s, -1e30)            # keep same-batch keys only
            s_max = jnp.max(s, axis=-1, keepdims=True)
            p = jnp.exp(s - s_max)
            inv = pl.reciprocal(jnp.sum(p, axis=-1, keepdims=True), approx=True)
            p = (p * inv).astype(jnp.bfloat16)
            oh = jnp.dot(p, vh, preferred_element_type=jnp.float32)      # (M, hd)
            out = out + jnp.dot(oh.astype(jnp.bfloat16), wo_ref[0, h],
                                preferred_element_type=jnp.float32)      # (M, D)
        return out

    # ---------------------- self attention + LN1 ----------------------
    xb = x.astype(jnp.bfloat16)
    qkv = jnp.dot(xb, sa_wqkv_ref[0], preferred_element_type=jnp.float32) + sa_bqkv_ref[0]
    q = qkv[:, :D] * scale
    k = qkv[:, D:2 * D]
    v = qkv[:, 2 * D:]
    sa = mha(q, k, v, sa_wo_ref, sa_mask) + sa_bo_ref[0]
    x = layernorm(x + sa, ln1_g_ref, ln1_b_ref)

    # ---------------------- cross attention + LN2 ----------------------
    xb = x.astype(jnp.bfloat16)
    q = (jnp.dot(xb, ca_wq_ref[0], preferred_element_type=jnp.float32) + ca_bq_ref[0]) * scale
    kv = jnp.dot(mem_bf, ca_wkv_ref[0], preferred_element_type=jnp.float32) + ca_bkv_ref[0]
    k = kv[:, :D]
    v = kv[:, D:]
    ca = mha(q, k, v, ca_wo_ref, ca_mask) + ca_bo_ref[0]
    x = layernorm(x + ca, ln2_g_ref, ln2_b_ref)

    # ------------------------ feed-forward + LN3 ------------------------
    xb = x.astype(jnp.bfloat16)
    h1 = jnp.dot(xb, ff_w1_ref[0], preferred_element_type=jnp.float32) + ff_b1_ref[0]
    h1 = jnp.maximum(h1, 0.0)
    ff = jnp.dot(h1.astype(jnp.bfloat16), ff_w2_ref[0],
                 preferred_element_type=jnp.float32) + ff_b2_ref[0]
    x = layernorm(x + ff, ln3_g_ref, ln3_b_ref)

    x_ref[...] = x

    # ---- last grid step: fused Euler step + ReLU (ODEG.forward) ----
    # TODO(synk): only the 2-point fixed-grid Euler path of torchdiffeq.odeint is implemented.
    @pl.when(layer == nlayer - 1)
    def _():
        z = tgt_ref[...].astype(jnp.float32) + ode_time * x
        out_ref[...] = jnp.maximum(z, 0.0).astype(out_ref.dtype)


# ------------------------------ wrapper --------------------------------------

def odeg_forward(tgt, memory, params, nhead, ode_time):
    T, B, D = tgt.shape
    S = memory.shape[0]
    L = params['sa_wqkv'].shape[0]
    TB, SB = T * B, S * B

    tgt2 = tgt.reshape(TB, D)                       # free reshape: (T, B, D) -> (T*B, D)
    mem2 = memory.reshape(SB, D).astype(jnp.bfloat16)   # only ever an MXU operand

    def resident_spec(shape):          # constant block index -> stays resident in VMEM
        n = len(shape)
        return pl.BlockSpec(shape, lambda l, n=n: (0,) * n)

    def per_layer_spec(arr):           # layer axis selected by grid index -> pipelined DMA
        bs = (1,) + tuple(arr.shape[1:])
        n = len(bs) - 1
        return pl.BlockSpec(bs, lambda l, n=n: (l,) + (0,) * n)

    weight_arrays = [params[name] for name in PARAM_ORDER]

    grid_spec = pltpu.PrefetchScalarGridSpec(
        num_scalar_prefetch=0,
        grid=(L,),
        in_specs=[resident_spec((TB, D)), resident_spec((SB, D))]
                 + [per_layer_spec(a) for a in weight_arrays],
        out_specs=pl.BlockSpec((TB, D), lambda l: (0, 0)),
        scratch_shapes=[pltpu.VMEM((TB, D), jnp.float32)],
    )

    kernel = functools.partial(
        _odeg_kernel, nhead=nhead, batch=B, eps=1e-5, ode_time=float(ode_time))

    z2 = pl.pallas_call(
        kernel,
        grid_spec=grid_spec,
        out_shape=jax.ShapeDtypeStruct((TB, D), jnp.float32),
        compiler_params=pltpu.CompilerParams(
            dimension_semantics=("arbitrary",)),   # layer axis carries the activation
    )(tgt2, mem2, *weight_arrays)

    z = z2.reshape(T, B, D)
    # need_weights=False in the reference forward -> per-layer attention weights are None.
    weights = {'self_attn_weights': [None] * L, 'cross_attn_weights': [None] * L}
    return z, weights


# ---------------------------- deterministic init -----------------------------

def _uniform(key, shape, fan_in):
    lim = 1.0 / math.sqrt(fan_in)
    return jax.random.uniform(key, shape, jnp.float32, -lim, lim)


def init_params(key, d_model, d_ff, nlayer, nhead):
    D, F, H = d_model, d_ff, nhead
    hd = D // H
    layers = []
    for _ in range(nlayer):
        key, *ks = jax.random.split(key, 15)
        layers.append({
            'sa_wqkv': _uniform(ks[0], (D, 3 * D), D),
            'sa_bqkv': _uniform(ks[1], (1, 3 * D), D),
            'sa_wo':   _uniform(ks[2], (D, D), D).reshape(H, hd, D),
            'sa_bo':   _uniform(ks[3], (1, D), D),
            'ca_wq':   _uniform(ks[4], (D, D), D),
            'ca_bq':   _uniform(ks[5], (1, D), D),
            'ca_wkv':  _uniform(ks[6], (D, 2 * D), D),
            'ca_bkv':  _uniform(ks[7], (1, 2 * D), D),
            'ca_wo':   _uniform(ks[8], (D, D), D).reshape(H, hd, D),
            'ca_bo':   _uniform(ks[9], (1, D), D),
            'ff_w1':   _uniform(ks[10], (D, F), D),
            'ff_b1':   _uniform(ks[11], (1, F), D),
            'ff_w2':   _uniform(ks[12], (F, D), F),
            'ff_b2':   _uniform(ks[13], (1, D), F),
            'ln1_g': jnp.ones((1, D), jnp.float32), 'ln1_b': jnp.zeros((1, D), jnp.float32),
            'ln2_g': jnp.ones((1, D), jnp.float32), 'ln2_b': jnp.zeros((1, D), jnp.float32),
            'ln3_g': jnp.ones((1, D), jnp.float32), 'ln3_b': jnp.zeros((1, D), jnp.float32),
        })

    bf16_names = {'sa_wqkv', 'sa_wo', 'ca_wq', 'ca_wkv', 'ca_wo', 'ff_w1', 'ff_w2'}
    stacked = {}
    for name in PARAM_ORDER:
        arr = jnp.stack([lp[name] for lp in layers], axis=0)
        if name in bf16_names:
            arr = arr.astype(jnp.bfloat16)   # bf16 MXU operands, halves weight DMA bytes
        stacked[name] = arr
    return stacked


# ----------------------------------- main ------------------------------------

if __name__ == "__main__":
    T, S, B = 8, 8, 2              # tgt seq len, memory seq len, batch
    D_MODEL, NHEAD, D_FF = 32, 4, 64
    NLAYER = 2
    TIME = 1.0

    root = jax.random.PRNGKey(0)
    k_tgt, k_mem, k_par = jax.random.split(root, 3)
    tgt = jax.random.normal(k_tgt, (T, B, D_MODEL), jnp.float32)
    memory = jax.random.normal(k_mem, (S, B, D_MODEL), jnp.float32)
    params = init_params(k_par, D_MODEL, D_FF, NLAYER, NHEAD)

    fwd = jax.jit(odeg_forward, static_argnums=(3, 4))
    z, weights = fwd(tgt, memory, params, NHEAD, TIME)
    z = jax.block_until_ready(z)

    assert z.shape == (T, B, D_MODEL)
    assert z.dtype == jnp.float32
    assert bool(jnp.all(z >= 0.0))               # ReLU applied
    assert len(weights['self_attn_weights']) == NLAYER
    print("KERNEL_OK")
</pallas_src>

<mosaic_0001>
module attributes {stable_mosaic.version = 11 : i64} {
  func.func @_odeg_kernel(%arg0: i32, %arg1: memref<16x32xf32, #tpu.memory_space<vmem>>, %arg2: memref<16x32xbf16, #tpu.memory_space<vmem>>, %arg3: memref<1x32x96xbf16, #tpu.memory_space<vmem>>, %arg4: memref<1x1x96xf32, #tpu.memory_space<vmem>>, %arg5: memref<1x4x8x32xbf16, #tpu.memory_space<vmem>>, %arg6: memref<1x1x32xf32, #tpu.memory_space<vmem>>, %arg7: memref<1x32x32xbf16, #tpu.memory_space<vmem>>, %arg8: memref<1x1x32xf32, #tpu.memory_space<vmem>>, %arg9: memref<1x32x64xbf16, #tpu.memory_space<vmem>>, %arg10: memref<1x1x64xf32, #tpu.memory_space<vmem>>, %arg11: memref<1x4x8x32xbf16, #tpu.memory_space<vmem>>, %arg12: memref<1x1x32xf32, #tpu.memory_space<vmem>>, %arg13: memref<1x32x64xbf16, #tpu.memory_space<vmem>>, %arg14: memref<1x1x64xf32, #tpu.memory_space<vmem>>, %arg15: memref<1x64x32xbf16, #tpu.memory_space<vmem>>, %arg16: memref<1x1x32xf32, #tpu.memory_space<vmem>>, %arg17: memref<1x1x32xf32, #tpu.memory_space<vmem>>, %arg18: memref<1x1x32xf32, #tpu.memory_space<vmem>>, %arg19: memref<1x1x32xf32, #tpu.memory_space<vmem>>, %arg20: memref<1x1x32xf32, #tpu.memory_space<vmem>>, %arg21: memref<1x1x32xf32, #tpu.memory_space<vmem>>, %arg22: memref<1x1x32xf32, #tpu.memory_space<vmem>>, %arg23: memref<16x32xf32, #tpu.memory_space<vmem>>, %arg24: memref<16x32xf32, #tpu.memory_space<vmem>>) attributes {dimension_semantics = [#tpu.dimension_semantics<arbitrary>], iteration_bounds = array<i64: 2>, scalar_prefetch = 0 : i64, scratch_operands = 1 : i64, tpu.core_type = #tpu.core_type<tc>, window_params = [{pipeline_mode = #tpu.pipeline_mode<synchronous>, transform_indices = @transform_0, window_bounds = array<i64: 16, 32>}, {pipeline_mode = #tpu.pipeline_mode<synchronous>, transform_indices = @transform_1, window_bounds = array<i64: 16, 32>}, {transform_indices = @transform_2, window_bounds = array<i64: 1, 32, 96>}, {transform_indices = @transform_3, window_bounds = array<i64: 1, 1, 96>}, {transform_indices = @transform_4, window_bounds = array<i64: 1, 4, 8, 32>}, {transform_indices = @transform_5, window_bounds = array<i64: 1, 1, 32>}, {transform_indices = @transform_6, window_bounds = array<i64: 1, 32, 32>}, {transform_indices = @transform_7, window_bounds = array<i64: 1, 1, 32>}, {transform_indices = @transform_8, window_bounds = array<i64: 1, 32, 64>}, {transform_indices = @transform_9, window_bounds = array<i64: 1, 1, 64>}, {transform_indices = @transform_10, window_bounds = array<i64: 1, 4, 8, 32>}, {transform_indices = @transform_11, window_bounds = array<i64: 1, 1, 32>}, {transform_indices = @transform_12, window_bounds = array<i64: 1, 32, 64>}, {transform_indices = @transform_13, window_bounds = array<i64: 1, 1, 64>}, {transform_indices = @transform_14, window_bounds = array<i64: 1, 64, 32>}, {transform_indices = @transform_15, window_bounds = array<i64: 1, 1, 32>}, {transform_indices = @transform_16, window_bounds = array<i64: 1, 1, 32>}, {transform_indices = @transform_17, window_bounds = array<i64: 1, 1, 32>}, {transform_indices = @transform_18, window_bounds = array<i64: 1, 1, 32>}, {transform_indices = @transform_19, window_bounds = array<i64: 1, 1, 32>}, {transform_indices = @transform_20, window_bounds = array<i64: 1, 1, 32>}, {transform_indices = @transform_21, window_bounds = array<i64: 1, 1, 32>}, {pipeline_mode = #tpu.pipeline_mode<synchronous>, transform_indices = @transform_22, window_bounds = array<i64: 16, 32>}]} {
    %c0_i32 = arith.constant 0 : i32
    %0 = arith.cmpi eq, %arg0, %c0_i32 : i32
    %1 = arith.extui %0 : i1 to i32
    %c0_i32_0 = arith.constant 0 : i32
    %2 = arith.cmpi ne, %1, %c0_i32_0 : i32
    scf.if %2 {
      %c0_185 = arith.constant 0 : index
      %c0_186 = arith.constant 0 : index
      %428 = vector.load %arg1[%c0_185, %c0_186] : memref<16x32xf32, #tpu.memory_space<vmem>>, vector<16x32xf32>
      %c0_187 = arith.constant 0 : index
      %c0_188 = arith.constant 0 : index
      %429 = vector.load %arg24[%c0_187, %c0_188] : memref<16x32xf32, #tpu.memory_space<vmem>>, vector<16x32xf32>
      tpu.vector_store %arg24[%c0_187, %c0_188], %428 {strides = array<i32>} : memref<16x32xf32, #tpu.memory_space<vmem>>, vector<16x32xf32>,
    } else {
    }
    %c0 = arith.constant 0 : index
    %c0_1 = arith.constant 0 : index
    %3 = vector.load %arg24[%c0, %c0_1] : memref<16x32xf32, #tpu.memory_space<vmem>>, vector<16x32xf32>
    %c0_2 = arith.constant 0 : index
    %c0_3 = arith.constant 0 : index
    %4 = vector.load %arg2[%c0_2, %c0_3] : memref<16x32xbf16, #tpu.memory_space<vmem>>, vector<16x32xbf16>
    %5 = tpu.iota {dimensions = array<i32: 0>} : vector<16x16xi32>
    %c2_i32 = arith.constant 2 : i32
    %c0_i32_4 = arith.constant 0 : i32
    %6 = arith.cmpi eq, %c2_i32, %c0_i32_4 : i32
    %c1_i32 = arith.constant 1 : i32
    %7 = arith.select %6, %c1_i32, %c2_i32 : i32
    %8 = vector.broadcast %7 : i32 to vector<16x16xi32>
    %9 = arith.remsi %5, %8 : vector<16x16xi32>
    %c0_i32_5 = arith.constant 0 : i32
    %10 = vector.broadcast %c0_i32_5 : i32 to vector<16x16xi32>
    %11 = arith.cmpi ne, %9, %10 : vector<16x16xi32>
    %c0_i32_6 = arith.constant 0 : i32
    %12 = vector.broadcast %c0_i32_6 : i32 to vector<16x16xi32>
    %13 = arith.cmpi slt, %9, %12 : vector<16x16xi32>
    %c0_i32_7 = arith.constant 0 : i32
    %14 = arith.cmpi slt, %7, %c0_i32_7 : i32
    %15 = vector.broadcast %14 : i1 to vector<16x16xi1>
    %16 = vector.broadcast %15 : vector<16x16xi1> to vector<16x16xi1>
    %17 = arith.xori %13, %16 : vector<16x16xi1>
    %18 = arith.andi %17, %11 : vector<16x16xi1>
    %19 = vector.broadcast %7 : i32 to vector<16x16xi32>
    %20 = arith.addi %9, %19 : vector<16x16xi32>
    %21 = arith.select %18, %20, %9 : vector<16x16xi1>, vector<16x16xi32>
    %22 = tpu.iota {dimensions = array<i32: 1>} : vector<16x16xi32>
    %c2_i32_8 = arith.constant 2 : i32
    %c0_i32_9 = arith.constant 0 : i32
    %23 = arith.cmpi eq, %c2_i32_8, %c0_i32_9 : i32
    %c1_i32_10 = arith.constant 1 : i32
    %24 = arith.select %23, %c1_i32_10, %c2_i32_8 : i32
    %25 = vector.broadcast %24 : i32 to vector<16x16xi32>
    %26 = arith.remsi %22, %25 : vector<16x16xi32>
    %c0_i32_11 = arith.constant 0 : i32
    %27 = vector.broadcast %c0_i32_11 : i32 to vector<16x16xi32>
    %28 = arith.cmpi ne, %26, %27 : vector<16x16xi32>
    %c0_i32_12 = arith.constant 0 : i32
    %29 = vector.broadcast %c0_i32_12 : i32 to vector<16x16xi32>
    %30 = arith.cmpi slt, %26, %29 : vector<16x16xi32>
    %c0_i32_13 = arith.constant 0 : i32
    %31 = arith.cmpi slt, %24, %c0_i32_13 : i32
    %32 = vector.broadcast %31 : i1 to vector<16x16xi1>
    %33 = vector.broadcast %32 : vector<16x16xi1> to vector<16x16xi1>
    %34 = arith.xori %30, %33 : vector<16x16xi1>
    %35 = arith.andi %34, %28 : vector<16x16xi1>
    %36 = vector.broadcast %24 : i32 to vector<16x16xi32>
    %37 = arith.addi %26, %36 : vector<16x16xi32>
    %38 = arith.select %35, %37, %26 : vector<16x16xi1>, vector<16x16xi32>
    %39 = arith.cmpi eq, %21, %38 : vector<16x16xi32>
    %40 = tpu.iota {dimensions = array<i32: 0>} : vector<16x16xi32>
    %c2_i32_14 = arith.constant 2 : i32
    %c0_i32_15 = arith.constant 0 : i32
    %41 = arith.cmpi eq, %c2_i32_14, %c0_i32_15 : i32
    %c1_i32_16 = arith.constant 1 : i32
    %42 = arith.select %41, %c1_i32_16, %c2_i32_14 : i32
    %43 = vector.broadcast %42 : i32 to vector<16x16xi32>
    %44 = arith.remsi %40, %43 : vector<16x16xi32>
    %c0_i32_17 = arith.constant 0 : i32
    %45 = vector.broadcast %c0_i32_17 : i32 to vector<16x16xi32>
    %46 = arith.cmpi ne, %44, %45 : vector<16x16xi32>
    %c0_i32_18 = arith.constant 0 : i32
    %47 = vector.broadcast %c0_i32_18 : i32 to vector<16x16xi32>
    %48 = arith.cmpi slt, %44, %47 : vector<16x16xi32>
    %c0_i32_19 = arith.constant 0 : i32
    %49 = arith.cmpi slt, %42, %c0_i32_19 : i32
    %50 = vector.broadcast %49 : i1 to vector<16x16xi1>
    %51 = vector.broadcast %50 : vector<16x16xi1> to vector<16x16xi1>
    %52 = arith.xori %48, %51 : vector<16x16xi1>
    %53 = arith.andi %52, %46 : vector<16x16xi1>
    %54 = vector.broadcast %42 : i32 to vector<16x16xi32>
    %55 = arith.addi %44, %54 : vector<16x16xi32>
    %56 = arith.select %53, %55, %44 : vector<16x16xi1>, vector<16x16xi32>
    %57 = tpu.iota {dimensions = array<i32: 1>} : vector<16x16xi32>
    %c2_i32_20 = arith.constant 2 : i32
    %c0_i32_21 = arith.constant 0 : i32
    %58 = arith.cmpi eq, %c2_i32_20, %c0_i32_21 : i32
    %c1_i32_22 = arith.constant 1 : i32
    %59 = arith.select %58, %c1_i32_22, %c2_i32_20 : i32
    %60 = vector.broadcast %59 : i32 to vector<16x16xi32>
    %61 = arith.remsi %57, %60 : vector<16x16xi32>
    %c0_i32_23 = arith.constant 0 : i32
    %62 = vector.broadcast %c0_i32_23 : i32 to vector<16x16xi32>
    %63 = arith.cmpi ne, %61, %62 : vector<16x16xi32>
    %c0_i32_24 = arith.constant 0 : i32
    %64 = vector.broadcast %c0_i32_24 : i32 to vector<16x16xi32>
    %65 = arith.cmpi slt, %61, %64 : vector<16x16xi32>
    %c0_i32_25 = arith.constant 0 : i32
    %66 = arith.cmpi slt, %59, %c0_i32_25 : i32
    %67 = vector.broadcast %66 : i1 to vector<16x16xi1>
    %68 = vector.broadcast %67 : vector<16x16xi1> to vector<16x16xi1>
    %69 = arith.xori %65, %68 : vector<16x16xi1>
    %70 = arith.andi %69, %63 : vector<16x16xi1>
    %71 = vector.broadcast %59 : i32 to vector<16x16xi32>
    %72 = arith.addi %61, %71 : vector<16x16xi32>
    %73 = arith.select %70, %72, %61 : vector<16x16xi1>, vector<16x16xi32>
    %74 = arith.cmpi eq, %56, %73 : vector<16x16xi32>
    %75 = arith.truncf %3 : vector<16x32xf32> to vector<16x32xbf16>
    %c0_26 = arith.constant 0 : index
    %c0_27 = arith.constant 0 : index
    %c0_28 = arith.constant 0 : index
    %76 = vector.load %arg3[%c0_26, %c0_27, %c0_28] : memref<1x32x96xbf16, #tpu.memory_space<vmem>>, vector<1x32x96xbf16>
    %77 = vector.shape_cast %76 : vector<1x32x96xbf16> to vector<32x96xbf16>
    %cst = arith.constant dense<0.000000e+00> : vector<16x96xf32>
    %78 = tpu.matmul %75, %77, %cst {dimension_numbers = #tpu.dot_dimension_numbers<[1], [0], [0], [1], [0, 0, 1, 1], [], []>} : vector<16x32xbf16>, vector<32x96xbf16>, vector<16x96xf32> -> vector<16x96xf32>
    %c0_29 = arith.constant 0 : index
    %c0_30 = arith.constant 0 : index
    %c0_31 = arith.constant 0 : index
    %79 = vector.load %arg4[%c0_29, %c0_30, %c0_31] : memref<1x1x96xf32, #tpu.memory_space<vmem>>, vector<1x1x96xf32>
    %80 = vector.shape_cast %79 : vector<1x1x96xf32> to vector<1x96xf32>
    %81 = vector.broadcast %80 : vector<1x96xf32> to vector<16x96xf32>
    %82 = arith.addf %78, %81 : vector<16x96xf32>
    %83 = vector.extract_strided_slice %82 {offsets = [0, 0], sizes = [16, 32], strides = [1, 1]} : vector<16x96xf32> to vector<16x32xf32>
    %cst_32 = arith.constant 0.353553385 : f32
    %84 = vector.broadcast %cst_32 : f32 to vector<16x32xf32>
    %85 = arith.mulf %83, %84 : vector<16x32xf32>
    %86 = vector.extract_strided_slice %82 {offsets = [0, 32], sizes = [16, 32], strides = [1, 1]} : vector<16x96xf32> to vector<16x32xf32>
    %87 = vector.extract_strided_slice %82 {offsets = [0, 64], sizes = [16, 32], strides = [1, 1]} : vector<16x96xf32> to vector<16x32xf32>
    %cst_33 = arith.constant 0.000000e+00 : f32
    %88 = vector.broadcast %cst_33 : f32 to vector<16x32xf32>
    %89 = vector.extract_strided_slice %85 {offsets = [0, 0], sizes = [16, 8], strides = [1, 1]} : vector<16x32xf32> to vector<16x8xf32>
    %90 = arith.truncf %89 : vector<16x8xf32> to vector<16x8xbf16>
    %91 = vector.extract_strided_slice %86 {offsets = [0, 0], sizes = [16, 8], strides = [1, 1]} : vector<16x32xf32> to vector<16x8xf32>
    %92 = arith.truncf %91 : vector<16x8xf32> to vector<16x8xbf16>
    %93 = vector.extract_strided_slice %87 {offsets = [0, 0], sizes = [16, 8], strides = [1, 1]} : vector<16x32xf32> to vector<16x8xf32>
    %94 = arith.truncf %93 : vector<16x8xf32> to vector<16x8xbf16>
    %cst_34 = arith.constant dense<0.000000e+00> : vector<16x16xf32>
    %95 = tpu.matmul %90, %92, %cst_34 {dimension_numbers = #tpu.dot_dimension_numbers<[1], [1], [0], [0], [0, 0, 1, 0], [], []>} : vector<16x8xbf16>, vector<16x8xbf16>, vector<16x16xf32> -> vector<16x16xf32>
    %cst_35 = arith.constant -1.000000e+30 : f32
    %96 = vector.broadcast %cst_35 : f32 to vector<16x16xf32>
    %97 = arith.select %39, %95, %96 : vector<16x16xi1>, vector<16x16xf32>
    %cst_36 = arith.constant dense<0xFF800000> : vector<16xf32>
    %98 = vector.multi_reduction <maximumf>, %97, %cst_36 [1] : vector<16x16xf32> to vector<16xf32>
    %99 = vector.shape_cast %98 : vector<16xf32> to vector<16x1xf32>
    %100 = vector.broadcast %99 : vector<16x1xf32> to vector<16x16xf32>
    %101 = arith.subf %97, %100 : vector<16x16xf32>
    %102 = math.exp %101 : vector<16x16xf32>
    %cst_37 = arith.constant dense<0.000000e+00> : vector<16xf32>
    %103 = vector.multi_reduction <add>, %102, %cst_37 [1] : vector<16x16xf32> to vector<16xf32>
    %104 = vector.shape_cast %103 : vector<16xf32> to vector<16x1xf32>
    %105 = tpu.reciprocal %104 {approx = true} : vector<16x1xf32> -> vector<16x1xf32>
    %106 = vector.broadcast %105 : vector<16x1xf32> to vector<16x16xf32>
    %107 = arith.mulf %102, %106 : vector<16x16xf32>
    %108 = arith.truncf %107 : vector<16x16xf32> to vector<16x16xbf16>
    %cst_38 = arith.constant dense<0.000000e+00> : vector<16x8xf32>
    %109 = tpu.matmul %108, %94, %cst_38 {dimension_numbers = #tpu.dot_dimension_numbers<[1], [0], [0], [1], [0, 0, 1, 1], [], []>} : vector<16x16xbf16>, vector<16x8xbf16>, vector<16x8xf32> -> vector<16x8xf32>
    %110 = arith.truncf %109 : vector<16x8xf32> to vector<16x8xbf16>
    %c0_39 = arith.constant 0 : index
    %c0_40 = arith.constant 0 : index
    %c0_41 = arith.constant 0 : index
    %c0_42 = arith.constant 0 : index
    %111 = vector.load %arg5[%c0_39, %c0_40, %c0_41, %c0_42] : memref<1x4x8x32xbf16, #tpu.memory_space<vmem>>, vector<1x1x8x32xbf16>
    %112 = vector.shape_cast %111 : vector<1x1x8x32xbf16> to vector<8x32xbf16>
    %cst_43 = arith.constant dense<0.000000e+00> : vector<16x32xf32>
    %113 = tpu.matmul %110, %112, %cst_43 {dimension_numbers = #tpu.dot_dimension_numbers<[1], [0], [0], [1], [0, 0, 1, 1], [], []>} : vector<16x8xbf16>, vector<8x32xbf16>, vector<16x32xf32> -> vector<16x32xf32>
    %114 = arith.addf %88, %113 : vector<16x32xf32>
    %115 = vector.extract_strided_slice %85 {offsets = [0, 8], sizes = [16, 8], strides = [1, 1]} : vector<16x32xf32> to vector<16x8xf32>
    %116 = arith.truncf %115 : vector<16x8xf32> to vector<16x8xbf16>
    %117 = vector.extract_strided_slice %86 {offsets = [0, 8], sizes = [16, 8], strides = [1, 1]} : vector<16x32xf32> to vector<16x8xf32>
    %118 = arith.truncf %117 : vector<16x8xf32> to vector<16x8xbf16>
    %119 = vector.extract_strided_slice %87 {offsets = [0, 8], sizes = [16, 8], strides = [1, 1]} : vector<16x32xf32> to vector<16x8xf32>
    %120 = arith.truncf %119 : vector<16x8xf32> to vector<16x8xbf16>
    %cst_44 = arith.constant dense<0.000000e+00> : vector<16x16xf32>
    %121 = tpu.matmul %116, %118, %cst_44 {dimension_numbers = #tpu.dot_dimension_numbers<[1], [1], [0], [0], [0, 0, 1, 0], [], []>} : vector<16x8xbf16>, vector<16x8xbf16>, vector<16x16xf32> -> vector<16x16xf32>
    %cst_45 = arith.constant -1.000000e+30 : f32
    %122 = vector.broadcast %cst_45 : f32 to vector<16x16xf32>
    %123 = arith.select %39, %121, %122 : vector<16x16xi1>, vector<16x16xf32>
    %cst_46 = arith.constant dense<0xFF800000> : vector<16xf32>
    %124 = vector.multi_reduction <maximumf>, %123, %cst_46 [1] : vector<16x16xf32> to vector<16xf32>
    %125 = vector.shape_cast %124 : vector<16xf32> to vector<16x1xf32>
    %126 = vector.broadcast %125 : vector<16x1xf32> to vector<16x16xf32>
    %127 = arith.subf %123, %126 : vector<16x16xf32>
    %128 = math.exp %127 : vector<16x16xf32>
    %cst_47 = arith.constant dense<0.000000e+00> : vector<16xf32>
    %129 = vector.multi_reduction <add>, %128, %cst_47 [1] : vector<16x16xf32> to vector<16xf32>
    %130 = vector.shape_cast %129 : vector<16xf32> to vector<16x1xf32>
    %131 = tpu.reciprocal %130 {approx = true} : vector<16x1xf32> -> vector<16x1xf32>
    %132 = vector.broadcast %131 : vector<16x1xf32> to vector<16x16xf32>
    %133 = arith.mulf %128, %132 : vector<16x16xf32>
    %134 = arith.truncf %133 : vector<16x16xf32> to vector<16x16xbf16>
    %cst_48 = arith.constant dense<0.000000e+00> : vector<16x8xf32>
    %135 = tpu.matmul %134, %120, %cst_48 {dimension_numbers = #tpu.dot_dimension_numbers<[1], [0], [0], [1], [0, 0, 1, 1], [], []>} : vector<16x16xbf16>, vector<16x8xbf16>, vector<16x8xf32> -> vector<16x8xf32>
    %136 = arith.truncf %135 : vector<16x8xf32> to vector<16x8xbf16>
    %c0_49 = arith.constant 0 : index
    %c1 = arith.constant 1 : index
    %c0_50 = arith.constant 0 : index
    %c0_51 = arith.constant 0 : index
    %137 = vector.load %arg5[%c0_49, %c1, %c0_50, %c0_51] : memref<1x4x8x32xbf16, #tpu.memory_space<vmem>>, vector<1x1x8x32xbf16>
    %138 = vector.shape_cast %137 : vector<1x1x8x32xbf16> to vector<8x32xbf16>
    %cst_52 = arith.constant dense<0.000000e+00> : vector<16x32xf32>
    %139 = tpu.matmul %136, %138, %cst_52 {dimension_numbers = #tpu.dot_dimension_numbers<[1], [0], [0], [1], [0, 0, 1, 1], [], []>} : vector<16x8xbf16>, vector<8x32xbf16>, vector<16x32xf32> -> vector<16x32xf32>
    %140 = arith.addf %114, %139 : vector<16x32xf32>
    %141 = vector.extract_strided_slice %85 {offsets = [0, 16], sizes = [16, 8], strides = [1, 1]} : vector<16x32xf32> to vector<16x8xf32>
    %142 = arith.truncf %141 : vector<16x8xf32> to vector<16x8xbf16>
    %143 = vector.extract_strided_slice %86 {offsets = [0, 16], sizes = [16, 8], strides = [1, 1]} : vector<16x32xf32> to vector<16x8xf32>
    %144 = arith.truncf %143 : vector<16x8xf32> to vector<16x8xbf16>
    %145 = vector.extract_strided_slice %87 {offsets = [0, 16], sizes = [16, 8], strides = [1, 1]} : vector<16x32xf32> to vector<16x8xf32>
    %146 = arith.truncf %145 : vector<16x8xf32> to vector<16x8xbf16>
    %cst_53 = arith.constant dense<0.000000e+00> : vector<16x16xf32>
    %147 = tpu.matmul %142, %144, %cst_53 {dimension_numbers = #tpu.dot_dimension_numbers<[1], [1], [0], [0], [0, 0, 1, 0], [], []>} : vector<16x8xbf16>, vector<16x8xbf16>, vector<16x16xf32> -> vector<16x16xf32>
    %cst_54 = arith.constant -1.000000e+30 : f32
    %148 = vector.broadcast %cst_54 : f32 to vector<16x16xf32>
    %149 = arith.select %39, %147, %148 : vector<16x16xi1>, vector<16x16xf32>
    %cst_55 = arith.constant dense<0xFF800000> : vector<16xf32>
    %150 = vector.multi_reduction <maximumf>, %149, %cst_55 [1] : vector<16x16xf32> to vector<16xf32>
    %151 = vector.shape_cast %150 : vector<16xf32> to vector<16x1xf32>
    %152 = vector.broadcast %151 : vector<16x1xf32> to vector<16x16xf32>
    %153 = arith.subf %149, %152 : vector<16x16xf32>
    %154 = math.exp %153 : vector<16x16xf32>
    %cst_56 = arith.constant dense<0.000000e+00> : vector<16xf32>
    %155 = vector.multi_reduction <add>, %154, %cst_56 [1] : vector<16x16xf32> to vector<16xf32>
    %156 = vector.shape_cast %155 : vector<16xf32> to vector<16x1xf32>
    %157 = tpu.reciprocal %156 {approx = true} : vector<16x1xf32> -> vector<16x1xf32>
    %158 = vector.broadcast %157 : vector<16x1xf32> to vector<16x16xf32>
    %159 = arith.mulf %154, %158 : vector<16x16xf32>
    %160 = arith.truncf %159 : vector<16x16xf32> to vector<16x16xbf16>
    %cst_57 = arith.constant dense<0.000000e+00> : vector<16x8xf32>
    %161 = tpu.matmul %160, %146, %cst_57 {dimension_numbers = #tpu.dot_dimension_numbers<[1], [0], [0], [1], [0, 0, 1, 1], [], []>} : vector<16x16xbf16>, vector<16x8xbf16>, vector<16x8xf32> -> vector<16x8xf32>
    %162 = arith.truncf %161 : vector<16x8xf32> to vector<16x8xbf16>
    %c0_58 = arith.constant 0 : index
    %c2 = arith.constant 2 : index
    %c0_59 = arith.constant 0 : index
    %c0_60 = arith.constant 0 : index
    %163 = vector.load %arg5[%c0_58, %c2, %c0_59, %c0_60] : memref<1x4x8x32xbf16, #tpu.memory_space<vmem>>, vector<1x1x8x32xbf16>
    %164 = vector.shape_cast %163 : vector<1x1x8x32xbf16> to vector<8x32xbf16>
    %cst_61 = arith.constant dense<0.000000e+00> : vector<16x32xf32>
    %165 = tpu.matmul %162, %164, %cst_61 {dimension_numbers = #tpu.dot_dimension_numbers<[1], [0], [0], [1], [0, 0, 1, 1], [], []>} : vector<16x8xbf16>, vector<8x32xbf16>, vector<16x32xf32> -> vector<16x32xf32>
    %166 = arith.addf %140, %165 : vector<16x32xf32>
    %167 = vector.extract_strided_slice %85 {offsets = [0, 24], sizes = [16, 8], strides = [1, 1]} : vector<16x32xf32> to vector<16x8xf32>
    %168 = arith.truncf %167 : vector<16x8xf32> to vector<16x8xbf16>
    %169 = vector.extract_strided_slice %86 {offsets = [0, 24], sizes = [16, 8], strides = [1, 1]} : vector<16x32xf32> to vector<16x8xf32>
    %170 = arith.truncf %169 : vector<16x8xf32> to vector<16x8xbf16>
    %171 = vector.extract_strided_slice %87 {offsets = [0, 24], sizes = [16, 8], strides = [1, 1]} : vector<16x32xf32> to vector<16x8xf32>
    %172 = arith.truncf %171 : vector<16x8xf32> to vector<16x8xbf16>
    %cst_62 = arith.constant dense<0.000000e+00> : vector<16x16xf32>
    %173 = tpu.matmul %168, %170, %cst_62 {dimension_numbers = #tpu.dot_dimension_numbers<[1], [1], [0], [0], [0, 0, 1, 0], [], []>} : vector<16x8xbf16>, vector<16x8xbf16>, vector<16x16xf32> -> vector<16x16xf32>
    %cst_63 = arith.constant -1.000000e+30 : f32
    %174 = vector.broadcast %cst_63 : f32 to vector<16x16xf32>
    %175 = arith.select %39, %173, %174 : vector<16x16xi1>, vector<16x16xf32>
    %cst_64 = arith.constant dense<0xFF800000> : vector<16xf32>
    %176 = vector.multi_reduction <maximumf>, %175, %cst_64 [1] : vector<16x16xf32> to vector<16xf32>
    %177 = vector.shape_cast %176 : vector<16xf32> to vector<16x1xf32>
    %178 = vector.broadcast %177 : vector<16x1xf32> to vector<16x16xf32>
    %179 = arith.subf %175, %178 : vector<16x16xf32>
    %180 = math.exp %179 : vector<16x16xf32>
    %cst_65 = arith.constant dense<0.000000e+00> : vector<16xf32>
    %181 = vector.multi_reduction <add>, %180, %cst_65 [1] : vector<16x16xf32> to vector<16xf32>
    %182 = vector.shape_cast %181 : vector<16xf32> to vector<16x1xf32>
    %183 = tpu.reciprocal %182 {approx = true} : vector<16x1xf32> -> vector<16x1xf32>
    %184 = vector.broadcast %183 : vector<16x1xf32> to vector<16x16xf32>
    %185 = arith.mulf %180, %184 : vector<16x16xf32>
    %186 = arith.truncf %185 : vector<16x16xf32> to vector<16x16xbf16>
    %cst_66 = arith.constant dense<0.000000e+00> : vector<16x8xf32>
    %187 = tpu.matmul %186, %172, %cst_66 {dimension_numbers = #tpu.dot_dimension_numbers<[1], [0], [0], [1], [0, 0, 1, 1], [], []>} : vector<16x16xbf16>, vector<16x8xbf16>, vector<16x8xf32> -> vector<16x8xf32>
    %188 = arith.truncf %187 : vector<16x8xf32> to vector<16x8xbf16>
    %c0_67 = arith.constant 0 : index
    %c3 = arith.constant 3 : index
    %c0_68 = arith.constant 0 : index
    %c0_69 = arith.constant 0 : index
    %189 = vector.load %arg5[%c0_67, %c3, %c0_68, %c0_69] : memref<1x4x8x32xbf16, #tpu.memory_space<vmem>>, vector<1x1x8x32xbf16>
    %190 = vector.shape_cast %189 : vector<1x1x8x32xbf16> to vector<8x32xbf16>
    %cst_70 = arith.constant dense<0.000000e+00> : vector<16x32xf32>
    %191 = tpu.matmul %188, %190, %cst_70 {dimension_numbers = #tpu.dot_dimension_numbers<[1], [0], [0], [1], [0, 0, 1, 1], [], []>} : vector<16x8xbf16>, vector<8x32xbf16>, vector<16x32xf32> -> vector<16x32xf32>
    %192 = arith.addf %166, %191 : vector<16x32xf32>
    %c0_71 = arith.constant 0 : index
    %c0_72 = arith.constant 0 : index
    %c0_73 = arith.constant 0 : index
    %193 = vector.load %arg6[%c0_71, %c0_72, %c0_73] : memref<1x1x32xf32, #tpu.memory_space<vmem>>, vector<1x1x32xf32>
    %194 = vector.shape_cast %193 : vector<1x1x32xf32> to vector<1x32xf32>
    %195 = vector.broadcast %194 : vector<1x32xf32> to vector<16x32xf32>
    %196 = arith.addf %192, %195 : vector<16x32xf32>
    %197 = arith.addf %3, %196 : vector<16x32xf32>
    %cst_74 = arith.constant dense<0.000000e+00> : vector<16xf32>
    %198 = vector.multi_reduction <add>, %197, %cst_74 [1] : vector<16x32xf32> to vector<16xf32>
    %199 = vector.shape_cast %198 : vector<16xf32> to vector<16x1xf32>
    %cst_75 = arith.constant 3.200000e+01 : f32
    %200 = vector.broadcast %cst_75 : f32 to vector<16x1xf32>
    %201 = arith.divf %199, %200 : vector<16x1xf32>
    %202 = vector.broadcast %201 : vector<16x1xf32> to vector<16x32xf32>
    %203 = arith.subf %197, %202 : vector<16x32xf32>
    %204 = arith.mulf %203, %203 : vector<16x32xf32>
    %cst_76 = arith.constant dense<0.000000e+00> : vector<16xf32>
    %205 = vector.multi_reduction <add>, %204, %cst_76 [1] : vector<16x32xf32> to vector<16xf32>
    %206 = vector.shape_cast %205 : vector<16xf32> to vector<16x1xf32>
    %cst_77 = arith.constant 3.200000e+01 : f32
    %207 = vector.broadcast %cst_77 : f32 to vector<16x1xf32>
    %208 = arith.divf %206, %207 : vector<16x1xf32>
    %209 = vector.broadcast %201 : vector<16x1xf32> to vector<16x32xf32>
    %210 = arith.subf %197, %209 : vector<16x32xf32>
    %cst_78 = arith.constant 9.99999974E-6 : f32
    %211 = vector.broadcast %cst_78 : f32 to vector<16x1xf32>
    %212 = arith.addf %208, %211 : vector<16x1xf32>
    %213 = math.rsqrt %212 : vector<16x1xf32>
    %214 = vector.broadcast %213 : vector<16x1xf32> to vector<16x32xf32>
    %215 = arith.mulf %210, %214 : vector<16x32xf32>
    %c0_79 = arith.constant 0 : index
    %c0_80 = arith.constant 0 : index
    %c0_81 = arith.constant 0 : index
    %216 = vector.load %arg17[%c0_79, %c0_80, %c0_81] : memref<1x1x32xf32, #tpu.memory_space<vmem>>, vector<1x1x32xf32>
    %217 = vector.shape_cast %216 : vector<1x1x32xf32> to vector<1x32xf32>
    %218 = vector.broadcast %217 : vector<1x32xf32> to vector<16x32xf32>
    %219 = arith.mulf %215, %218 : vector<16x32xf32>
    %c0_82 = arith.constant 0 : index
    %c0_83 = arith.constant 0 : index
    %c0_84 = arith.constant 0 : index
    %220 = vector.load %arg18[%c0_82, %c0_83, %c0_84] : memref<1x1x32xf32, #tpu.memory_space<vmem>>, vector<1x1x32xf32>
    %221 = vector.shape_cast %220 : vector<1x1x32xf32> to vector<1x32xf32>
    %222 = vector.broadcast %221 : vector<1x32xf32> to vector<16x32xf32>
    %223 = arith.addf %219, %222 : vector<16x32xf32>
    %224 = arith.truncf %223 : vector<16x32xf32> to vector<16x32xbf16>
    %c0_85 = arith.constant 0 : index
    %c0_86 = arith.constant 0 : index
    %c0_87 = arith.constant 0 : index
    %225 = vector.load %arg7[%c0_85, %c0_86, %c0_87] : memref<1x32x32xbf16, #tpu.memory_space<vmem>>, vector<1x32x32xbf16>
    %226 = vector.shape_cast %225 : vector<1x32x32xbf16> to vector<32x32xbf16>
    %cst_88 = arith.constant dense<0.000000e+00> : vector<16x32xf32>
    %227 = tpu.matmul %224, %226, %cst_88 {dimension_numbers = #tpu.dot_dimension_numbers<[1], [0], [0], [1], [0, 0, 1, 1], [], []>} : vector<16x32xbf16>, vector<32x32xbf16>, vector<16x32xf32> -> vector<16x32xf32>
    %c0_89 = arith.constant 0 : index
    %c0_90 = arith.constant 0 : index
    %c0_91 = arith.constant 0 : index
    %228 = vector.load %arg8[%c0_89, %c0_90, %c0_91] : memref<1x1x32xf32, #tpu.memory_space<vmem>>, vector<1x1x32xf32>
    %229 = vector.shape_cast %228 : vector<1x1x32xf32> to vector<1x32xf32>
    %230 = vector.broadcast %229 : vector<1x32xf32> to vector<16x32xf32>
    %231 = arith.addf %227, %230 : vector<16x32xf32>
    %cst_92 = arith.constant 0.353553385 : f32
    %232 = vector.broadcast %cst_92 : f32 to vector<16x32xf32>
    %233 = arith.mulf %231, %232 : vector<16x32xf32>
    %c0_93 = arith.constant 0 : index
    %c0_94 = arith.constant 0 : index
    %c0_95 = arith.constant 0 : index
    %234 = vector.load %arg9[%c0_93, %c0_94, %c0_95] : memref<1x32x64xbf16, #tpu.memory_space<vmem>>, vector<1x32x64xbf16>
    %235 = vector.shape_cast %234 : vector<1x32x64xbf16> to vector<32x64xbf16>
    %cst_96 = arith.constant dense<0.000000e+00> : vector<16x64xf32>
    %236 = tpu.matmul %4, %235, %cst_96 {dimension_numbers = #tpu.dot_dimension_numbers<[1], [0], [0], [1], [0, 0, 1, 1], [], []>} : vector<16x32xbf16>, vector<32x64xbf16>, vector<16x64xf32> -> vector<16x64xf32>
    %c0_97 = arith.constant 0 : index
    %c0_98 = arith.constant 0 : index
    %c0_99 = arith.constant 0 : index
    %237 = vector.load %arg10[%c0_97, %c0_98, %c0_99] : memref<1x1x64xf32, #tpu.memory_space<vmem>>, vector<1x1x64xf32>
    %238 = vector.shape_cast %237 : vector<1x1x64xf32> to vector<1x64xf32>
    %239 = vector.broadcast %238 : vector<1x64xf32> to vector<16x64xf32>
    %240 = arith.addf %236, %239 : vector<16x64xf32>
    %241 = vector.extract_strided_slice %240 {offsets = [0, 0], sizes = [16, 32], strides = [1, 1]} : vector<16x64xf32> to vector<16x32xf32>
    %242 = vector.extract_strided_slice %240 {offsets = [0, 32], sizes = [16, 32], strides = [1, 1]} : vector<16x64xf32> to vector<16x32xf32>
    %cst_100 = arith.constant 0.000000e+00 : f32
    %243 = vector.broadcast %cst_100 : f32 to vector<16x32xf32>
    %244 = vector.extract_strided_slice %233 {offsets = [0, 0], sizes = [16, 8], strides = [1, 1]} : vector<16x32xf32> to vector<16x8xf32>
    %245 = arith.truncf %244 : vector<16x8xf32> to vector<16x8xbf16>
    %246 = vector.extract_strided_slice %241 {offsets = [0, 0], sizes = [16, 8], strides = [1, 1]} : vector<16x32xf32> to vector<16x8xf32>
    %247 = arith.truncf %246 : vector<16x8xf32> to vector<16x8xbf16>
    %248 = vector.extract_strided_slice %242 {offsets = [0, 0], sizes = [16, 8], strides = [1, 1]} : vector<16x32xf32> to vector<16x8xf32>
    %249 = arith.truncf %248 : vector<16x8xf32> to vector<16x8xbf16>
    %cst_101 = arith.constant dense<0.000000e+00> : vector<16x16xf32>
    %250 = tpu.matmul %245, %247, %cst_101 {dimension_numbers = #tpu.dot_dimension_numbers<[1], [1], [0], [0], [0, 0, 1, 0], [], []>} : vector<16x8xbf16>, vector<16x8xbf16>, vector<16x16xf32> -> vector<16x16xf32>
    %cst_102 = arith.constant -1.000000e+30 : f32
    %251 = vector.broadcast %cst_102 : f32 to vector<16x16xf32>
    %252 = arith.select %74, %250, %251 : vector<16x16xi1>, vector<16x16xf32>
    %cst_103 = arith.constant dense<0xFF800000> : vector<16xf32>
    %253 = vector.multi_reduction <maximumf>, %252, %cst_103 [1] : vector<16x16xf32> to vector<16xf32>
    %254 = vector.shape_cast %253 : vector<16xf32> to vector<16x1xf32>
    %255 = vector.broadcast %254 : vector<16x1xf32> to vector<16x16xf32>
    %256 = arith.subf %252, %255 : vector<16x16xf32>
    %257 = math.exp %256 : vector<16x16xf32>
    %cst_104 = arith.constant dense<0.000000e+00> : vector<16xf32>
    %258 = vector.multi_reduction <add>, %257, %cst_104 [1] : vector<16x16xf32> to vector<16xf32>
    %259 = vector.shape_cast %258 : vector<16xf32> to vector<16x1xf32>
    %260 = tpu.reciprocal %259 {approx = true} : vector<16x1xf32> -> vector<16x1xf32>
    %261 = vector.broadcast %260 : vector<16x1xf32> to vector<16x16xf32>
    %262 = arith.mulf %257, %261 : vector<16x16xf32>
    %263 = arith.truncf %262 : vector<16x16xf32> to vector<16x16xbf16>
    %cst_105 = arith.constant dense<0.000000e+00> : vector<16x8xf32>
    %264 = tpu.matmul %263, %249, %cst_105 {dimension_numbers = #tpu.dot_dimension_numbers<[1], [0], [0], [1], [0, 0, 1, 1], [], []>} : vector<16x16xbf16>, vector<16x8xbf16>, vector<16x8xf32> -> vector<16x8xf32>
    %265 = arith.truncf %264 : vector<16x8xf32> to vector<16x8xbf16>
    %c0_106 = arith.constant 0 : index
    %c0_107 = arith.constant 0 : index
    %c0_108 = arith.constant 0 : index
    %c0_109 = arith.constant 0 : index
    %266 = vector.load %arg11[%c0_106, %c0_107, %c0_108, %c0_109] : memref<1x4x8x32xbf16, #tpu.memory_space<vmem>>, vector<1x1x8x32xbf16>
    %267 = vector.shape_cast %266 : vector<1x1x8x32xbf16> to vector<8x32xbf16>
    %cst_110 = arith.constant dense<0.000000e+00> : vector<16x32xf32>
    %268 = tpu.matmul %265, %267, %cst_110 {dimension_numbers = #tpu.dot_dimension_numbers<[1], [0], [0], [1], [0, 0, 1, 1], [], []>} : vector<16x8xbf16>, vector<8x32xbf16>, vector<16x32xf32> -> vector<16x32xf32>
    %269 = arith.addf %243, %268 : vector<16x32xf32>
    %270 = vector.extract_strided_slice %233 {offsets = [0, 8], sizes = [16, 8], strides = [1, 1]} : vector<16x32xf32> to vector<16x8xf32>
    %271 = arith.truncf %270 : vector<16x8xf32> to vector<16x8xbf16>
    %272 = vector.extract_strided_slice %241 {offsets = [0, 8], sizes = [16, 8], strides = [1, 1]} : vector<16x32xf32> to vector<16x8xf32>
    %273 = arith.truncf %272 : vector<16x8xf32> to vector<16x8xbf16>
    %274 = vector.extract_strided_slice %242 {offsets = [0, 8], sizes = [16, 8], strides = [1, 1]} : vector<16x32xf32> to vector<16x8xf32>
    %275 = arith.truncf %274 : vector<16x8xf32> to vector<16x8xbf16>
    %cst_111 = arith.constant dense<0.000000e+00> : vector<16x16xf32>
    %276 = tpu.matmul %271, %273, %cst_111 {dimension_numbers = #tpu.dot_dimension_numbers<[1], [1], [0], [0], [0, 0, 1, 0], [], []>} : vector<16x8xbf16>, vector<16x8xbf16>, vector<16x16xf32> -> vector<16x16xf32>
    %cst_112 = arith.constant -1.000000e+30 : f32
    %277 = vector.broadcast %cst_112 : f32 to vector<16x16xf32>
    %278 = arith.select %74, %276, %277 : vector<16x16xi1>, vector<16x16xf32>
    %cst_113 = arith.constant dense<0xFF800000> : vector<16xf32>
    %279 = vector.multi_reduction <maximumf>, %278, %cst_113 [1] : vector<16x16xf32> to vector<16xf32>
    %280 = vector.shape_cast %279 : vector<16xf32> to vector<16x1xf32>
    %281 = vector.broadcast %280 : vector<16x1xf32> to vector<16x16xf32>
    %282 = arith.subf %278, %281 : vector<16x16xf32>
    %283 = math.exp %282 : vector<16x16xf32>
    %cst_114 = arith.constant dense<0.000000e+00> : vector<16xf32>
    %284 = vector.multi_reduction <add>, %283, %cst_114 [1] : vector<16x16xf32> to vector<16xf32>
    %285 = vector.shape_cast %284 : vector<16xf32> to vector<16x1xf32>
    %286 = tpu.reciprocal %285 {approx = true} : vector<16x1xf32> -> vector<16x1xf32>
    %287 = vector.broadcast %286 : vector<16x1xf32> to vector<16x16xf32>
    %288 = arith.mulf %283, %287 : vector<16x16xf32>
    %289 = arith.truncf %288 : vector<16x16xf32> to vector<16x16xbf16>
    %cst_115 = arith.constant dense<0.000000e+00> : vector<16x8xf32>
    %290 = tpu.matmul %289, %275, %cst_115 {dimension_numbers = #tpu.dot_dimension_numbers<[1], [0], [0], [1], [0, 0, 1, 1], [], []>} : vector<16x16xbf16>, vector<16x8xbf16>, vector<16x8xf32> -> vector<16x8xf32>
    %291 = arith.truncf %290 : vector<16x8xf32> to vector<16x8xbf16>
    %c0_116 = arith.constant 0 : index
    %c1_117 = arith.constant 1 : index
    %c0_118 = arith.constant 0 : index
    %c0_119 = arith.constant 0 : index
    %292 = vector.load %arg11[%c0_116, %c1_117, %c0_118, %c0_119] : memref<1x4x8x32xbf16, #tpu.memory_space<vmem>>, vector<1x1x8x32xbf16>
    %293 = vector.shape_cast %292 : vector<1x1x8x32xbf16> to vector<8x32xbf16>
    %cst_120 = arith.constant dense<0.000000e+00> : vector<16x32xf32>
    %294 = tpu.matmul %291, %293, %cst_120 {dimension_numbers = #tpu.dot_dimension_numbers<[1], [0], [0], [1], [0, 0, 1, 1], [], []>} : vector<16x8xbf16>, vector<8x32xbf16>, vector<16x32xf32> -> vector<16x32xf32>
    %295 = arith.addf %269, %294 : vector<16x32xf32>
    %296 = vector.extract_strided_slice %233 {offsets = [0, 16], sizes = [16, 8], strides = [1, 1]} : vector<16x32xf32> to vector<16x8xf32>
    %297 = arith.truncf %296 : vector<16x8xf32> to vector<16x8xbf16>
    %298 = vector.extract_strided_slice %241 {offsets = [0, 16], sizes = [16, 8], strides = [1, 1]} : vector<16x32xf32> to vector<16x8xf32>
    %299 = arith.truncf %298 : vector<16x8xf32> to vector<16x8xbf16>
    %300 = vector.extract_strided_slice %242 {offsets = [0, 16], sizes = [16, 8], strides = [1, 1]} : vector<16x32xf32> to vector<16x8xf32>
    %301 = arith.truncf %300 : vector<16x8xf32> to vector<16x8xbf16>
    %cst_121 = arith.constant dense<0.000000e+00> : vector<16x16xf32>
    %302 = tpu.matmul %297, %299, %cst_121 {dimension_numbers = #tpu.dot_dimension_numbers<[1], [1], [0], [0], [0, 0, 1, 0], [], []>} : vector<16x8xbf16>, vector<16x8xbf16>, vector<16x16xf32> -> vector<16x16xf32>
    %cst_122 = arith.constant -1.000000e+30 : f32
    %303 = vector.broadcast %cst_122 : f32 to vector<16x16xf32>
    %304 = arith.select %74, %302, %303 : vector<16x16xi1>, vector<16x16xf32>
    %cst_123 = arith.constant dense<0xFF800000> : vector<16xf32>
    %305 = vector.multi_reduction <maximumf>, %304, %cst_123 [1] : vector<16x16xf32> to vector<16xf32>
    %306 = vector.shape_cast %305 : vector<16xf32> to vector<16x1xf32>
    %307 = vector.broadcast %306 : vector<16x1xf32> to vector<16x16xf32>
    %308 = arith.subf %304, %307 : vector<16x16xf32>
    %309 = math.exp %308 : vector<16x16xf32>
    %cst_124 = arith.constant dense<0.000000e+00> : vector<16xf32>
    %310 = vector.multi_reduction <add>, %309, %cst_124 [1] : vector<16x16xf32> to vector<16xf32>
    %311 = vector.shape_cast %310 : vector<16xf32> to vector<16x1xf32>
    %312 = tpu.reciprocal %311 {approx = true} : vector<16x1xf32> -> vector<16x1xf32>
    %313 = vector.broadcast %312 : vector<16x1xf32> to vector<16x16xf32>
    %314 = arith.mulf %309, %313 : vector<16x16xf32>
    %315 = arith.truncf %314 : vector<16x16xf32> to vector<16x16xbf16>
    %cst_125 = arith.constant dense<0.000000e+00> : vector<16x8xf32>
    %316 = tpu.matmul %315, %301, %cst_125 {dimension_numbers = #tpu.dot_dimension_numbers<[1], [0], [0], [1], [0, 0, 1, 1], [], []>} : vector<16x16xbf16>, vector<16x8xbf16>, vector<16x8xf32> -> vector<16x8xf32>
    %317 = arith.truncf %316 : vector<16x8xf32> to vector<16x8xbf16>
    %c0_126 = arith.constant 0 : index
    %c2_127 = arith.constant 2 : index
    %c0_128 = arith.constant 0 : index
    %c0_129 = arith.constant 0 : index
    %318 = vector.load %arg11[%c0_126, %c2_127, %c0_128, %c0_129] : memref<1x4x8x32xbf16, #tpu.memory_space<vmem>>, vector<1x1x8x32xbf16>
    %319 = vector.shape_cast %318 : vector<1x1x8x32xbf16> to vector<8x32xbf16>
    %cst_130 = arith.constant dense<0.000000e+00> : vector<16x32xf32>
    %320 = tpu.matmul %317, %319, %cst_130 {dimension_numbers = #tpu.dot_dimension_numbers<[1], [0], [0], [1], [0, 0, 1, 1], [], []>} : vector<16x8xbf16>, vector<8x32xbf16>, vector<16x32xf32> -> vector<16x32xf32>
    %321 = arith.addf %295, %320 : vector<16x32xf32>
    %322 = vector.extract_strided_slice %233 {offsets = [0, 24], sizes = [16, 8], strides = [1, 1]} : vector<16x32xf32> to vector<16x8xf32>
    %323 = arith.truncf %322 : vector<16x8xf32> to vector<16x8xbf16>
    %324 = vector.extract_strided_slice %241 {offsets = [0, 24], sizes = [16, 8], strides = [1, 1]} : vector<16x32xf32> to vector<16x8xf32>
    %325 = arith.truncf %324 : vector<16x8xf32> to vector<16x8xbf16>
    %326 = vector.extract_strided_slice %242 {offsets = [0, 24], sizes = [16, 8], strides = [1, 1]} : vector<16x32xf32> to vector<16x8xf32>
    %327 = arith.truncf %326 : vector<16x8xf32> to vector<16x8xbf16>
    %cst_131 = arith.constant dense<0.000000e+00> : vector<16x16xf32>
    %328 = tpu.matmul %323, %325, %cst_131 {dimension_numbers = #tpu.dot_dimension_numbers<[1], [1], [0], [0], [0, 0, 1, 0], [], []>} : vector<16x8xbf16>, vector<16x8xbf16>, vector<16x16xf32> -> vector<16x16xf32>
    %cst_132 = arith.constant -1.000000e+30 : f32
    %329 = vector.broadcast %cst_132 : f32 to vector<16x16xf32>
    %330 = arith.select %74, %328, %329 : vector<16x16xi1>, vector<16x16xf32>
    %cst_133 = arith.constant dense<0xFF800000> : vector<16xf32>
    %331 = vector.multi_reduction <maximumf>, %330, %cst_133 [1] : vector<16x16xf32> to vector<16xf32>
    %332 = vector.shape_cast %331 : vector<16xf32> to vector<16x1xf32>
    %333 = vector.broadcast %332 : vector<16x1xf32> to vector<16x16xf32>
    %334 = arith.subf %330, %333 : vector<16x16xf32>
    %335 = math.exp %334 : vector<16x16xf32>
    %cst_134 = arith.constant dense<0.000000e+00> : vector<16xf32>
    %336 = vector.multi_reduction <add>, %335, %cst_134 [1] : vector<16x16xf32> to vector<16xf32>
    %337 = vector.shape_cast %336 : vector<16xf32> to vector<16x1xf32>
    %338 = tpu.reciprocal %337 {approx = true} : vector<16x1xf32> -> vector<16x1xf32>
    %339 = vector.broadcast %338 : vector<16x1xf32> to vector<16x16xf32>
    %340 = arith.mulf %335, %339 : vector<16x16xf32>
    %341 = arith.truncf %340 : vector<16x16xf32> to vector<16x16xbf16>
    %cst_135 = arith.constant dense<0.000000e+00> : vector<16x8xf32>
    %342 = tpu.matmul %341, %327, %cst_135 {dimension_numbers = #tpu.dot_dimension_numbers<[1], [0], [0], [1], [0, 0, 1, 1], [], []>} : vector<16x16xbf16>, vector<16x8xbf16>, vector<16x8xf32> -> vector<16x8xf32>
    %343 = arith.truncf %342 : vector<16x8xf32> to vector<16x8xbf16>
    %c0_136 = arith.constant 0 : index
    %c3_137 = arith.constant 3 : index
    %c0_138 = arith.constant 0 : index
    %c0_139 = arith.constant 0 : index
    %344 = vector.load %arg11[%c0_136, %c3_137, %c0_138, %c0_139] : memref<1x4x8x32xbf16, #tpu.memory_space<vmem>>, vector<1x1x8x32xbf16>
    %345 = vector.shape_cast %344 : vector<1x1x8x32xbf16> to vector<8x32xbf16>
    %cst_140 = arith.constant dense<0.000000e+00> : vector<16x32xf32>
    %346 = tpu.matmul %343, %345, %cst_140 {dimension_numbers = #tpu.dot_dimension_numbers<[1], [0], [0], [1], [0, 0, 1, 1], [], []>} : vector<16x8xbf16>, vector<8x32xbf16>, vector<16x32xf32> -> vector<16x32xf32>
    %347 = arith.addf %321, %346 : vector<16x32xf32>
    %c0_141 = arith.constant 0 : index
    %c0_142 = arith.constant 0 : index
    %c0_143 = arith.constant 0 : index
    %348 = vector.load %arg12[%c0_141, %c0_142, %c0_143] : memref<1x1x32xf32, #tpu.memory_space<vmem>>, vector<1x1x32xf32>
    %349 = vector.shape_cast %348 : vector<1x1x32xf32> to vector<1x32xf32>
    %350 = vector.broadcast %349 : vector<1x32xf32> to vector<16x32xf32>
    %351 = arith.addf %347, %350 : vector<16x32xf32>
    %352 = arith.addf %223, %351 : vector<16x32xf32>
    %cst_144 = arith.constant dense<0.000000e+00> : vector<16xf32>
    %353 = vector.multi_reduction <add>, %352, %cst_144 [1] : vector<16x32xf32> to vector<16xf32>
    %354 = vector.shape_cast %353 : vector<16xf32> to vector<16x1xf32>
    %cst_145 = arith.constant 3.200000e+01 : f32
    %355 = vector.broadcast %cst_145 : f32 to vector<16x1xf32>
    %356 = arith.divf %354, %355 : vector<16x1xf32>
    %357 = vector.broadcast %356 : vector<16x1xf32> to vector<16x32xf32>
    %358 = arith.subf %352, %357 : vector<16x32xf32>
    %359 = arith.mulf %358, %358 : vector<16x32xf32>
    %cst_146 = arith.constant dense<0.000000e+00> : vector<16xf32>
    %360 = vector.multi_reduction <add>, %359, %cst_146 [1] : vector<16x32xf32> to vector<16xf32>
    %361 = vector.shape_cast %360 : vector<16xf32> to vector<16x1xf32>
    %cst_147 = arith.constant 3.200000e+01 : f32
    %362 = vector.broadcast %cst_147 : f32 to vector<16x1xf32>
    %363 = arith.divf %361, %362 : vector<16x1xf32>
    %364 = vector.broadcast %356 : vector<16x1xf32> to vector<16x32xf32>
    %365 = arith.subf %352, %364 : vector<16x32xf32>
    %cst_148 = arith.constant 9.99999974E-6 : f32
    %366 = vector.broadcast %cst_148 : f32 to vector<16x1xf32>
    %367 = arith.addf %363, %366 : vector<16x1xf32>
    %368 = math.rsqrt %367 : vector<16x1xf32>
    %369 = vector.broadcast %368 : vector<16x1xf32> to vector<16x32xf32>
    %370 = arith.mulf %365, %369 : vector<16x32xf32>
    %c0_149 = arith.constant 0 : index
    %c0_150 = arith.constant 0 : index
    %c0_151 = arith.constant 0 : index
    %371 = vector.load %arg19[%c0_149, %c0_150, %c0_151] : memref<1x1x32xf32, #tpu.memory_space<vmem>>, vector<1x1x32xf32>
    %372 = vector.shape_cast %371 : vector<1x1x32xf32> to vector<1x32xf32>
    %373 = vector.broadcast %372 : vector<1x32xf32> to vector<16x32xf32>
    %374 = arith.mulf %370, %373 : vector<16x32xf32>
    %c0_152 = arith.constant 0 : index
    %c0_153 = arith.constant 0 : index
    %c0_154 = arith.constant 0 : index
    %375 = vector.load %arg20[%c0_152, %c0_153, %c0_154] : memref<1x1x32xf32, #tpu.memory_space<vmem>>, vector<1x1x32xf32>
    %376 = vector.shape_cast %375 : vector<1x1x32xf32> to vector<1x32xf32>
    %377 = vector.broadcast %376 : vector<1x32xf32> to vector<16x32xf32>
    %378 = arith.addf %374, %377 : vector<16x32xf32>
    %379 = arith.truncf %378 : vector<16x32xf32> to vector<16x32xbf16>
    %c0_155 = arith.constant 0 : index
    %c0_156 = arith.constant 0 : index
    %c0_157 = arith.constant 0 : index
    %380 = vector.load %arg13[%c0_155, %c0_156, %c0_157] : memref<1x32x64xbf16, #tpu.memory_space<vmem>>, vector<1x32x64xbf16>
    %381 = vector.shape_cast %380 : vector<1x32x64xbf16> to vector<32x64xbf16>
    %cst_158 = arith.constant dense<0.000000e+00> : vector<16x64xf32>
    %382 = tpu.matmul %379, %381, %cst_158 {dimension_numbers = #tpu.dot_dimension_numbers<[1], [0], [0], [1], [0, 0, 1, 1], [], []>} : vector<16x32xbf16>, vector<32x64xbf16>, vector<16x64xf32> -> vector<16x64xf32>
    %c0_159 = arith.constant 0 : index
    %c0_160 = arith.constant 0 : index
    %c0_161 = arith.constant 0 : index
    %383 = vector.load %arg14[%c0_159, %c0_160, %c0_161] : memref<1x1x64xf32, #tpu.memory_space<vmem>>, vector<1x1x64xf32>
    %384 = vector.shape_cast %383 : vector<1x1x64xf32> to vector<1x64xf32>
    %385 = vector.broadcast %384 : vector<1x64xf32> to vector<16x64xf32>
    %386 = arith.addf %382, %385 : vector<16x64xf32>
    %cst_162 = arith.constant 0.000000e+00 : f32
    %387 = vector.broadcast %cst_162 : f32 to vector<16x64xf32>
    %388 = arith.maximumf %386, %387 : vector<16x64xf32>
    %389 = arith.truncf %388 : vector<16x64xf32> to vector<16x64xbf16>
    %c0_163 = arith.constant 0 : index
    %c0_164 = arith.constant 0 : index
    %c0_165 = arith.constant 0 : index
    %390 = vector.load %arg15[%c0_163, %c0_164, %c0_165] : memref<1x64x32xbf16, #tpu.memory_space<vmem>>, vector<1x64x32xbf16>
    %391 = vector.shape_cast %390 : vector<1x64x32xbf16> to vector<64x32xbf16>
    %cst_166 = arith.constant dense<0.000000e+00> : vector<16x32xf32>
    %392 = tpu.matmul %389, %391, %cst_166 {dimension_numbers = #tpu.dot_dimension_numbers<[1], [0], [0], [1], [0, 0, 1, 1], [], []>} : vector<16x64xbf16>, vector<64x32xbf16>, vector<16x32xf32> -> vector<16x32xf32>
    %c0_167 = arith.constant 0 : index
    %c0_168 = arith.constant 0 : index
    %c0_169 = arith.constant 0 : index
    %393 = vector.load %arg16[%c0_167, %c0_168, %c0_169] : memref<1x1x32xf32, #tpu.memory_space<vmem>>, vector<1x1x32xf32>
    %394 = vector.shape_cast %393 : vector<1x1x32xf32> to vector<1x32xf32>
    %395 = vector.broadcast %394 : vector<1x32xf32> to vector<16x32xf32>
    %396 = arith.addf %392, %395 : vector<16x32xf32>
    %397 = arith.addf %378, %396 : vector<16x32xf32>
    %cst_170 = arith.constant dense<0.000000e+00> : vector<16xf32>
    %398 = vector.multi_reduction <add>, %397, %cst_170 [1] : vector<16x32xf32> to vector<16xf32>
    %399 = vector.shape_cast %398 : vector<16xf32> to vector<16x1xf32>
    %cst_171 = arith.constant 3.200000e+01 : f32
    %400 = vector.broadcast %cst_171 : f32 to vector<16x1xf32>
    %401 = arith.divf %399, %400 : vector<16x1xf32>
    %402 = vector.broadcast %401 : vector<16x1xf32> to vector<16x32xf32>
    %403 = arith.subf %397, %402 : vector<16x32xf32>
    %404 = arith.mulf %403, %403 : vector<16x32xf32>
    %cst_172 = arith.constant dense<0.000000e+00> : vector<16xf32>
    %405 = vector.multi_reduction <add>, %404, %cst_172 [1] : vector<16x32xf32> to vector<16xf32>
    %406 = vector.shape_cast %405 : vector<16xf32> to vector<16x1xf32>
    %cst_173 = arith.constant 3.200000e+01 : f32
    %407 = vector.broadcast %cst_173 : f32 to vector<16x1xf32>
    %408 = arith.divf %406, %407 : vector<16x1xf32>
    %409 = vector.broadcast %401 : vector<16x1xf32> to vector<16x32xf32>
    %410 = arith.subf %397, %409 : vector<16x32xf32>
    %cst_174 = arith.constant 9.99999974E-6 : f32
    %411 = vector.broadcast %cst_174 : f32 to vector<16x1xf32>
    %412 = arith.addf %408, %411 : vector<16x1xf32>
    %413 = math.rsqrt %412 : vector<16x1xf32>
    %414 = vector.broadcast %413 : vector<16x1xf32> to vector<16x32xf32>
    %415 = arith.mulf %410, %414 : vector<16x32xf32>
    %c0_175 = arith.constant 0 : index
    %c0_176 = arith.constant 0 : index
    %c0_177 = arith.constant 0 : index
    %416 = vector.load %arg21[%c0_175, %c0_176, %c0_177] : memref<1x1x32xf32, #tpu.memory_space<vmem>>, vector<1x1x32xf32>
    %417 = vector.shape_cast %416 : vector<1x1x32xf32> to vector<1x32xf32>
    %418 = vector.broadcast %417 : vector<1x32xf32> to vector<16x32xf32>
    %419 = arith.mulf %415, %418 : vector<16x32xf32>
    %c0_178 = arith.constant 0 : index
    %c0_179 = arith.constant 0 : index
    %c0_180 = arith.constant 0 : index
    %420 = vector.load %arg22[%c0_178, %c0_179, %c0_180] : memref<1x1x32xf32, #tpu.memory_space<vmem>>, vector<1x1x32xf32>
    %421 = vector.shape_cast %420 : vector<1x1x32xf32> to vector<1x32xf32>
    %422 = vector.broadcast %421 : vector<1x32xf32> to vector<16x32xf32>
    %423 = arith.addf %419, %422 : vector<16x32xf32>
    %c0_181 = arith.constant 0 : index
    %c0_182 = arith.constant 0 : index
    %424 = vector.load %arg24[%c0_181, %c0_182] : memref<16x32xf32, #tpu.memory_space<vmem>>, vector<16x32xf32>
    tpu.vector_store %arg24[%c0_181, %c0_182], %423 {strides = array<i32>} : memref<16x32xf32, #tpu.memory_space<vmem>>, vector<16x32xf32>,
    %c1_i32_183 = arith.constant 1 : i32
    %425 = arith.cmpi eq, %arg0, %c1_i32_183 : i32
    %426 = arith.extui %425 : i1 to i32
    %c0_i32_184 = arith.constant 0 : i32
    %427 = arith.cmpi ne, %426, %c0_i32_184 : i32
    scf.if %427 {
      %c0_185 = arith.constant 0 : index
      %c0_186 = arith.constant 0 : index
      %428 = vector.load %arg1[%c0_185, %c0_186] : memref<16x32xf32, #tpu.memory_space<vmem>>, vector<16x32xf32>
      %cst_187 = arith.constant 1.000000e+00 : f32
      %429 = vector.broadcast %cst_187 : f32 to vector<16x32xf32>
      %430 = arith.mulf %429, %423 : vector<16x32xf32>
      %431 = arith.addf %428, %430 : vector<16x32xf32>
      %cst_188 = arith.constant 0.000000e+00 : f32
      %432 = vector.broadcast %cst_188 : f32 to vector<16x32xf32>
      %433 = arith.maximumf %431, %432 : vector<16x32xf32>
      %c0_189 = arith.constant 0 : index
      %c0_190 = arith.constant 0 : index
      %434 = vector.load %arg23[%c0_189, %c0_190] : memref<16x32xf32, #tpu.memory_space<vmem>>, vector<16x32xf32>
      tpu.vector_store %arg23[%c0_189, %c0_190], %433 {strides = array<i32>} : memref<16x32xf32, #tpu.memory_space<vmem>>, vector<16x32xf32>,
    } else {
    }
    return
  }
  func.func @transform_0(%arg0: i32) -> (i32, i32) {
    %c0_i32 = arith.constant 0 : i32
    %c0_i32_0 = arith.constant 0 : i32
    %c0_i32_1 = arith.constant 0 : i32
    return %c0_i32, %c0_i32_0 : i32, i32
  }
  func.func @transform_1(%arg0: i32) -> (i32, i32) {
    %c0_i32 = arith.constant 0 : i32
    %c0_i32_0 = arith.constant 0 : i32
    %c0_i32_1 = arith.constant 0 : i32
    return %c0_i32, %c0_i32_0 : i32, i32
  }
  func.func @transform_2(%arg0: i32) -> (i32, i32, i32) {
    %c0_i32 = arith.constant 0 : i32
    %c0_i32_0 = arith.constant 0 : i32
    %c0_i32_1 = arith.constant 0 : i32
    return %arg0, %c0_i32, %c0_i32_0 : i32, i32, i32
  }
  func.func @transform_3(%arg0: i32) -> (i32, i32, i32) {
    %c0_i32 = arith.constant 0 : i32
    %c0_i32_0 = arith.constant 0 : i32
    %c0_i32_1 = arith.constant 0 : i32
    return %arg0, %c0_i32, %c0_i32_0 : i32, i32, i32
  }
  func.func @transform_4(%arg0: i32) -> (i32, i32, i32, i32) {
    %c0_i32 = arith.constant 0 : i32
    %c0_i32_0 = arith.constant 0 : i32
    %c0_i32_1 = arith.constant 0 : i32
    %c0_i32_2 = arith.constant 0 : i32
    return %arg0, %c0_i32, %c0_i32_0, %c0_i32_1 : i32, i32, i32, i32
  }
  func.func @transform_5(%arg0: i32) -> (i32, i32, i32) {
    %c0_i32 = arith.constant 0 : i32
    %c0_i32_0 = arith.constant 0 : i32
    %c0_i32_1 = arith.constant 0 : i32
    return %arg0, %c0_i32, %c0_i32_0 : i32, i32, i32
  }
  func.func @transform_6(%arg0: i32) -> (i32, i32, i32) {
    %c0_i32 = arith.constant 0 : i32
    %c0_i32_0 = arith.constant 0 : i32
    %c0_i32_1 = arith.constant 0 : i32
    return %arg0, %c0_i32, %c0_i32_0 : i32, i32, i32
  }
  func.func @transform_7(%arg0: i32) -> (i32, i32, i32) {
    %c0_i32 = arith.constant 0 : i32
    %c0_i32_0 = arith.constant 0 : i32
    %c0_i32_1 = arith.constant 0 : i32
    return %arg0, %c0_i32, %c0_i32_0 : i32, i32, i32
  }
  func.func @transform_8(%arg0: i32) -> (i32, i32, i32) {
    %c0_i32 = arith.constant 0 : i32
    %c0_i32_0 = arith.constant 0 : i32
    %c0_i32_1 = arith.constant 0 : i32
    return %arg0, %c0_i32, %c0_i32_0 : i32, i32, i32
  }
  func.func @transform_9(%arg0: i32) -> (i32, i32, i32) {
    %c0_i32 = arith.constant 0 : i32
    %c0_i32_0 = arith.constant 0 : i32
    %c0_i32_1 = arith.constant 0 : i32
    return %arg0, %c0_i32, %c0_i32_0 : i32, i32, i32
  }
  func.func @transform_10(%arg0: i32) -> (i32, i32, i32, i32) {
    %c0_i32 = arith.constant 0 : i32
    %c0_i32_0 = arith.constant 0 : i32
    %c0_i32_1 = arith.constant 0 : i32
    %c0_i32_2 = arith.constant 0 : i32
    return %arg0, %c0_i32, %c0_i32_0, %c0_i32_1 : i32, i32, i32, i32
  }
  func.func @transform_11(%arg0: i32) -> (i32, i32, i32) {
    %c0_i32 = arith.constant 0 : i32
    %c0_i32_0 = arith.constant 0 : i32
    %c0_i32_1 = arith.constant 0 : i32
    return %arg0, %c0_i32, %c0_i32_0 : i32, i32, i32
  }
  func.func @transform_12(%arg0: i32) -> (i32, i32, i32) {
    %c0_i32 = arith.constant 0 : i32
    %c0_i32_0 = arith.constant 0 : i32
    %c0_i32_1 = arith.constant 0 : i32
    return %arg0, %c0_i32, %c0_i32_0 : i32, i32, i32
  }
  func.func @transform_13(%arg0: i32) -> (i32, i32, i32) {
    %c0_i32 = arith.constant 0 : i32
    %c0_i32_0 = arith.constant 0 : i32
    %c0_i32_1 = arith.constant 0 : i32
    return %arg0, %c0_i32, %c0_i32_0 : i32, i32, i32
  }
  func.func @transform_14(%arg0: i32) -> (i32, i32, i32) {
    %c0_i32 = arith.constant 0 : i32
    %c0_i32_0 = arith.constant 0 : i32
    %c0_i32_1 = arith.constant 0 : i32
    return %arg0, %c0_i32, %c0_i32_0 : i32, i32, i32
  }
  func.func @transform_15(%arg0: i32) -> (i32, i32, i32) {
    %c0_i32 = arith.constant 0 : i32
    %c0_i32_0 = arith.constant 0 : i32
    %c0_i32_1 = arith.constant 0 : i32
    return %arg0, %c0_i32, %c0_i32_0 : i32, i32, i32
  }
  func.func @transform_16(%arg0: i32) -> (i32, i32, i32) {
    %c0_i32 = arith.constant 0 : i32
    %c0_i32_0 = arith.constant 0 : i32
    %c0_i32_1 = arith.constant 0 : i32
    return %arg0, %c0_i32, %c0_i32_0 : i32, i32, i32
  }
  func.func @transform_17(%arg0: i32) -> (i32, i32, i32) {
    %c0_i32 = arith.constant 0 : i32
    %c0_i32_0 = arith.constant 0 : i32
    %c0_i32_1 = arith.constant 0 : i32
    return %arg0, %c0_i32, %c0_i32_0 : i32, i32, i32
  }
  func.func @transform_18(%arg0: i32) -> (i32, i32, i32) {
    %c0_i32 = arith.constant 0 : i32
    %c0_i32_0 = arith.constant 0 : i32
    %c0_i32_1 = arith.constant 0 : i32
    return %arg0, %c0_i32, %c0_i32_0 : i32, i32, i32
  }
  func.func @transform_19(%arg0: i32) -> (i32, i32, i32) {
    %c0_i32 = arith.constant 0 : i32
    %c0_i32_0 = arith.constant 0 : i32
    %c0_i32_1 = arith.constant 0 : i32
    return %arg0, %c0_i32, %c0_i32_0 : i32, i32, i32
  }
  func.func @transform_20(%arg0: i32) -> (i32, i32, i32) {
    %c0_i32 = arith.constant 0 : i32
    %c0_i32_0 = arith.constant 0 : i32
    %c0_i32_1 = arith.constant 0 : i32
    return %arg0, %c0_i32, %c0_i32_0 : i32, i32, i32
  }
  func.func @transform_21(%arg0: i32) -> (i32, i32, i32) {
    %c0_i32 = arith.constant 0 : i32
    %c0_i32_0 = arith.constant 0 : i32
    %c0_i32_1 = arith.constant 0 : i32
    return %arg0, %c0_i32, %c0_i32_0 : i32, i32, i32
  }
  func.func @transform_22(%arg0: i32) -> (i32, i32) {
    %c0_i32 = arith.constant 0 : i32
    %c0_i32_0 = arith.constant 0 : i32
    %c0_i32_1 = arith.constant 0 : i32
    return %c0_i32, %c0_i32_0 : i32, i32
  }
}

</mosaic_0001>

<bundles_post_ra>
// kernel: odeg_forward.1
= control target key start
LH: loop header
LB: loop body
LE: loop exit
PB: predicated region body
PF: predicated region fallthrough
CT: control target
= control target key end

     0   :  { %s5266_s0 = inlined_call_operand.hbm [shape: f32[16,32], index: 0, kind: input, shape index: {}]   ;;  %s5267_s1 = inlined_call_operand.vmem [shape: bf16[16,32], index: 1, kind: input, shape index: {}]   ;;  %s5268_s2 = inlined_call_operand.vmem [shape: bf16[2,32,96], index: 2, kind: input, shape index: {}]   ;;  %s5269_s3 = inlined_call_operand.vmem [shape: f32[2,1,96], index: 3, kind: input, shape index: {}]   ;;  %s5270_s4 = inlined_call_operand.vmem [shape: bf16[2,4,8,32], index: 4, kind: input, shape index: {}]   ;;  %s5271_s5 = inlined_call_operand.vmem [shape: f32[2,1,32], index: 5, kind: input, shape index: {}]   ;;  %s5272_s6 = inlined_call_operand.vmem [shape: bf16[2,32,32], index: 6, kind: input, shape index: {}]   ;;  %s5273_s7 = inlined_call_operand.hbm [shape: f32[2,1,32], index: 7, kind: input, shape index: {}]   ;;  %s5274_s8 = inlined_call_operand.vmem [shape: bf16[2,32,64], index: 8, kind: input, shape index: {}]   ;;  %s5275_s9 = inlined_call_operand.hbm [shape: f32[2,1,64], index: 9, kind: input, shape index: {}]   ;;  %s5276_s10 = inlined_call_operand.hbm [shape: bf16[2,4,8,32], index: 10, kind: input, shape index: {}]   ;;  %s5277_s11 = inlined_call_operand.hbm [shape: f32[2,1,32], index: 11, kind: input, shape index: {}]   ;;  %s5278_s12 = inlined_call_operand.hbm [shape: bf16[2,32,64], index: 12, kind: input, shape index: {}]   ;;  %s5279_s13 = inlined_call_operand.hbm [shape: f32[2,1,64], index: 13, kind: input, shape index: {}]   ;;  %s5280_s14 = inlined_call_operand.vmem [shape: bf16[2,64,32], index: 14, kind: input, shape index: {}]   ;;  %s5281_s15 = inlined_call_operand.hbm [shape: f32[2,1,32], index: 15, kind: input, shape index: {}]   ;;  %s5282_s16 = inlined_call_operand.vmem [shape: f32[2,1,32], index: 16, kind: input, shape index: {}]   ;;  %s5283_s17 = inlined_call_operand.vmem [shape: f32[2,1,32], index: 17, kind: input, shape index: {}]   ;;  %s5284_s18 = inlined_call_operand.vmem [shape: f32[2,1,32], index: 18, kind: input, shape index: {}]   ;;  %s5285_s19 = inlined_call_operand.vmem [shape: f32[2,1,32], index: 19, kind: input, shape index: {}]   ;;  %s5286_s20 = inlined_call_operand.vmem [shape: f32[2,1,32], index: 20, kind: input, shape index: {}]   ;;  %s5287_s21 = inlined_call_operand.vmem [shape: f32[2,1,32], index: 21, kind: input, shape index: {}]   ;;  %s5288_s22 = inlined_call_operand.hbm [shape: f32[16,32], index: 22, kind: output, shape index: {}]  }
   0x1   :  { %5307 = sst [smem:[#allocation29_spill]] %s5266_s0 }
   0x2   :  { %5308 = sst [smem:[#allocation30_spill]] %s5267_s1 }
   0x3   :  { %5309 = sst [smem:[#allocation31_spill]] %s5268_s2 }
   0x4   :  { %5310 = sst [smem:[#allocation32_spill]] %s5269_s3 }
   0x5   :  { %5311 = sst [smem:[#allocation33_spill]] %s5270_s4 }
   0x6   :  { %5312 = sst [smem:[#allocation34_spill]] %s5271_s5 }
   0x7   :  { %5313 = sst [smem:[#allocation35_spill]] %s5272_s6 }
   0x8   :  { %5314 = sst [smem:[#allocation36_spill]] %s5273_s7 }
   0x9   :  { %5315 = sst [smem:[#allocation37_spill]] %s5274_s8 }
   0xa   :  { %5316 = sst [smem:[#allocation38_spill]] %s5275_s9 }
   0xb   :  { %5317 = sst [smem:[#allocation39_spill]] %s5276_s10 }
   0xc   :  { %5318 = sst [smem:[#allocation40_spill]] %s5277_s11 }
   0xd   :  { %5319 = sst [smem:[#allocation41_spill]] %s5278_s12 }
   0xe   :  { %5320 = sst [smem:[#allocation42_spill]] %s5279_s13 }
   0xf   :  { %5321 = sst [smem:[#allocation43_spill]] %s5280_s14 }
  0x10   :  { %5322 = sst [smem:[#allocation44_spill]] %s5281_s15 }
  0x11   :  { %5323 = sst [smem:[#allocation45_spill]] %s5283_s17 }
  0x12   :  { %5324 = sst [smem:[#allocation46_spill]] %s5284_s18 }
  0x13   :  { %5325 = sst [smem:[#allocation47_spill]] %s5285_s19 }
  0x14   :  { %5326 = sst [smem:[#allocation48_spill]] %s5286_s20 }
  0x15   :  { %5327 = sst [smem:[#allocation49_spill]] %s5287_s21 }
  0x16   :  { %5328 = sst [smem:[#allocation50_spill]] %s5288_s22 }
  0x17   :  { %27 = vsyncpa [#allocation4], 0 }
  0x18   :  { %28 = vsyncpa [#allocation7], 0 }
  0x19   :  { %30 = vsyncpa [#allocation7 + $0x1], 0 }
  0x1a   :  { %31 = vsyncpa [#allocation10], 0 }
  0x1b   :  { %33 = vsyncpa [#allocation10 + $0x1], 0 }
  0x1c   :  { %34 = vsyncpa [#allocation13], 0 }
  0x1d   :  { %36 = vsyncpa [#allocation13 + $0x1], 0 }
  0x1e   :  { %37 = vsyncpa [#allocation16], 0 }
  0x1f   :  { %39 = vsyncpa [#allocation16 + $0x1], 0 }
  0x20   :  { %40 = vsyncpa [#allocation5], 0  ;;  %s4440_s3 = smov 0   ;;  %s4442_s28 = smov 0  }
  0x21   :  { %s4444_s29 = smov 0   ;;  %s4446_s30 = smov 0  }
  0x22 LB: > { %5329 = sst [smem:[#allocation24_spill]] %s4287_s28  ;;  %s4461_s4 = sadd.s32 1, %s4295_s30   ;;  %s4295_s30 = sphi %s4446_s30, %s5395_s30   ;;  %s4291_s29 = sphi %s4444_s29, %s5398_s29   ;;  %s4287_s28 = sphi %s4442_s28, %s5397_s28   ;;  %s4283_s3 = sphi %s4440_s3, %s5396_s3  }
  0x23   : > { %5330 = sst [smem:[#allocation25_spill]] %s4291_s29  ;;  %s225_s0 = sadd.s32 1, %s4291_s29 }
  0x24   : > { %5331 = sst [smem:[#allocation26_spill]] %s4461_s4  ;;  %s222_s23 = ssub.s32 %s4295_s30, %s4461_s4 }
  0x25   : > { %p232_p0 = scmp.ne.s32.totalorder %s4291_s29, %s4287_s28  ;;  %p223_p1 = scmp.eq.s32.totalorder %s222_s23, 0 }
  0x26   : > { %p233_p2 = scmp.eq.s32.totalorder %s4295_s30, 0  ;;  %p3831_p3 = scmp.lt.s32.totalorder %s4295_s30, 2 }
  0x27   : > { %s4471_s1 = scalar_select %p223_p1, %s4291_s29, %s225_s0  }
  0x28   : > { %p234_p4 = por %p233_p2, %p232_p0  ;;  %s4474_s5 = sand.u32 1, %s4295_s30  }
  0x29   : > { %5332 = sst [smem:[#allocation27_spill]] %s4471_s1  ;;  %s4477_s24 = sand.u32 1, %s4291_s29  }
  0x2a   : > { %s4480_s6 = sshll.u32 %s4295_s30, 4  ;;  %s5333_s7 = sld [smem:[#allocation36_spill]] }
  0x2b   : > { %s702_s27 = scalar_lea.vmem [#allocation6], %s4477_s24  ;;  %p4491_p5 = pnand %p3831_p3, %p234_p4 }
  0x2c   : > { %s709_s0 = sshll.u32 %s702_s27, 4  ;;  %s5294_s29 = scalar_lea.sflag [#allocation7], %s4474_s5  ;;  %s4489_s0 = int_to_ptr.vmem [resolvable:$true] %s709_s0 }
  0x2d   : > { %s5334_s23 = scalar_select %p4491_p5, 1, 0 }
  0x2e   : > { %p4501_p7 = pneg %p4491_p5 }
  0x30   : > { %s4486_s2 = scalar_lea.hbm %s5333_s7, %s4480_s6  ;;  %s3982_s22 = scalar_lea.hbm %s5333_s7, 32 }
  0x31   : > { %s3977_s4 = scalar_lea.hbm %s4486_s2, 16  ;;  %p3983_p10 = scmp.lt.u32.totalorder %s4486_s2, %s5333_s7 }
  0x32   : > { %p3978_p6 = scmp.ne.s32.totalorder %s4486_s2, %s3977_s4  ;;  %p3984_p11 = scmp.lt.u32.totalorder %s3982_s22, %s3977_s4 }
  0x33   : > { %s5335_s25 = scalar_select %p4501_p7, 1, 0 }
  0x34   : > { %p3980_p8 = pnand %p4501_p7, %p3978_p6  ;;  %p3985_p12 = por %p3984_p11, %p3983_p10 }
  0x35   : > { %p3986_p13 = scmp.lt.u32.totalorder %s3977_s4, %s4486_s2 }
  0x36   : > { %p3981_p9 = pneg %p3980_p8 }
  0x37   : > { %p3987_p0 = por %p3986_p13, %p3985_p12 }
  0x39   : > { %p3988_p1 = pnand %p3987_p0, %p3981_p9 }
  0x3b   : > { %3991 = shalt.err (!%p3988_p1)
}
  0x3c   : > { %s3992_s1 = scalar_lea.vmem %s4489_s0, 16  ;;  %s4297_s26 = smov [#allocation6]  }
  0x3d   : > { %p3993_p2 = scmp.ne.s32.totalorder %s4489_s0, %s3992_s1  ;;  %s3997_s27 = sshll.u32 %s4297_s26, 4  ;;  %s3998_s27 = int_to_ptr.vmem [resolvable:$false] %s3997_s27 }
  0x3e   : > { %s3999_s20 = scalar_lea.vmem %s3998_s27, 32  ;;  %p4000_p6 = scmp.lt.s32.totalorder %s4489_s0, %s3998_s27 }
  0x3f   : > { %p3995_p3 = pnand %p3993_p2, %p4501_p7  ;;  %p4001_p8 = scmp.lt.s32.totalorder %s3999_s20, %s3992_s1 }
  0x41   : > { %p3996_p4 = pneg %p3995_p3  ;;  %p4002_p10 = por %p4001_p8, %p4000_p6 }
  0x43   : > { %p4003_p11 = pnand %p4002_p10, %p3996_p4 }
  0x45   : > { %4006 = shalt.err (!%p4003_p11)
}
  0x46   : > { %3811 = dma.hbm_to_vmem [thread:$0]  (!%p4491_p5), %s4486_s2, 16, %s4489_s0, %s5294_s29  }
  0x47   : > { %s3522_s21 = sshll.u32 %s4295_s30, 8  ;;  %s5336_s10 = sld [smem:[#allocation39_spill]] }
  0x48   : > { %s5337_s26 = sshll.u32 %s4477_s24, 4  ;;  %s5296_s7 = scalar_lea.sflag [#allocation10], %s4474_s5 }
  0x49   : > { %s745_s27 = scalar_lea.vmem [#allocation9], %s5337_s26 }
  0x4a   : > { %s752_s20 = sshll.u32 %s745_s27, 4  ;;  %s4536_s20 = int_to_ptr.vmem [resolvable:$true] %s752_s20 }
  0x4d   : > { %s4532_s1 = scalar_lea.hbm %s5336_s10, %s3522_s21  ;;  %s4012_s22 = scalar_lea.hbm %s5336_s10, 512 }
  0x4e   : > { %s4007_s19 = scalar_lea.hbm %s4532_s1, 256  ;;  %p4013_p0 = scmp.lt.u32.totalorder %s4532_s1, %s5336_s10 }
  0x4f   : > { %p4008_p9 = scmp.ne.s32.totalorder %s4532_s1, %s4007_s19  ;;  %p4014_p1 = scmp.lt.u32.totalorder %s4012_s22, %s4007_s19 }
  0x50   : > { %p4016_p3 = scmp.lt.u32.totalorder %s4007_s19, %s4532_s1 }
  0x51   : > { %p4010_p12 = pnand %p4008_p9, %p4501_p7  ;;  %p4015_p2 = por %p4014_p1, %p4013_p0 }
  0x53   : > { %p4011_p13 = pneg %p4010_p12  ;;  %p4017_p4 = por %p4016_p3, %p4015_p2 }
  0x55   : > { %p4018_p6 = pnand %p4017_p4, %p4011_p13 }
  0x57   : > { %4021 = shalt.err (!%p4018_p6)
}
  0x58   : > { %s4022_s26 = scalar_lea.vmem %s4536_s20, 256  ;;  %s4298_s27 = smov [#allocation9]  }
  0x59   : > { %p4023_p8 = scmp.ne.s32.totalorder %s4536_s20, %s4022_s26  ;;  %s4027_s2 = sshll.u32 %s4298_s27, 4  ;;  %s4028_s2 = int_to_ptr.vmem [resolvable:$false] %s4027_s2 }
  0x5a   : > { %s4029_s29 = scalar_lea.vmem %s4028_s2, 512  ;;  %p4030_p9 = scmp.lt.s32.totalorder %s4536_s20, %s4028_s2 }
  0x5b   : > { %p4025_p10 = pnand %p4023_p8, %p4501_p7  ;;  %p4031_p12 = scmp.lt.s32.totalorder %s4029_s29, %s4022_s26 }
  0x5d   : > { %p4026_p11 = pneg %p4025_p10  ;;  %p4032_p0 = por %p4031_p12, %p4030_p9 }
  0x5f   : > { %p4033_p1 = pnand %p4032_p0, %p4026_p11 }
  0x61   : > { %4036 = shalt.err (!%p4033_p1)
}
  0x62   : > { %s4299_s19 = smov 64   ;;  %s4300_s0 = smov 4  }
  0x63   : > { %3817 = dma.hbm_to_vmem [thread:$0]  (!%p4491_p5), %s4532_s1, 256, %s4536_s20, %s5296_s7, %s4299_s19, %s4299_s19, %s4300_s0  }
  0x64   : > { %s5338_s12 = sld [smem:[#allocation41_spill]]  ;;  %s5339_s27 = sshll.u32 %s4477_s24, 4 }
  0x65   : > { %s783_s2 = scalar_lea.vmem [#allocation12], %s5339_s27  ;;  %s5295_s10 = scalar_lea.sflag [#allocation13], %s4474_s5 }
  0x66   : > { %s790_s29 = sshll.u32 %s783_s2, 4  ;;  %s4574_s29 = int_to_ptr.vmem [resolvable:$true] %s790_s29 }
  0x6a   : > { %s4570_s26 = scalar_lea.hbm %s5338_s12, %s3522_s21  ;;  %s4042_s21 = scalar_lea.hbm %s5338_s12, 512 }
  0x6b   : > { %s4037_s18 = scalar_lea.hbm %s4570_s26, 256  ;;  %p4043_p4 = scmp.lt.u32.totalorder %s4570_s26, %s5338_s12 }
  0x6c   : > { %p4038_p13 = scmp.ne.s32.totalorder %s4570_s26, %s4037_s18  ;;  %p4044_p6 = scmp.lt.u32.totalorder %s4042_s21, %s4037_s18 }
  0x6d   : > { %p4046_p10 = scmp.lt.u32.totalorder %s4037_s18, %s4570_s26 }
  0x6e   : > { %p4040_p2 = pnand %p4038_p13, %p4501_p7  ;;  %p4045_p8 = por %p4044_p6, %p4043_p4 }
  0x70   : > { %p4041_p3 = pneg %p4040_p2  ;;  %p4047_p11 = por %p4046_p10, %p4045_p8 }
  0x72   : > { %p4048_p9 = pnand %p4047_p11, %p4041_p3 }
  0x74   : > { %4051 = shalt.err (!%p4048_p9)
}
  0x75   : > { %s4052_s27 = scalar_lea.vmem %s4574_s29, 256  ;;  %s4301_s2 = smov [#allocation12]  }
  0x76   : > { %p4053_p12 = scmp.ne.s32.totalorder %s4574_s29, %s4052_s27  ;;  %s4057_s1 = sshll.u32 %s4301_s2, 4  ;;  %s4058_s1 = int_to_ptr.vmem [resolvable:$false] %s4057_s1 }
  0x77   : > { %s4059_s20 = scalar_lea.vmem %s4058_s1, 512  ;;  %p4060_p13 = scmp.lt.s32.totalorder %s4574_s29, %s4058_s1 }
  0x78   : > { %p4055_p0 = pnand %p4053_p12, %p4501_p7  ;;  %p4061_p2 = scmp.lt.s32.totalorder %s4059_s20, %s4052_s27 }
  0x7a   : > { %p4056_p1 = pneg %p4055_p0  ;;  %p4062_p4 = por %p4061_p2, %p4060_p13 }
  0x7c   : > { %p4063_p6 = pnand %p4062_p4, %p4056_p1 }
  0x7e   : > { %4066 = shalt.err (!%p4063_p6)
}
  0x7f   : > { %3823 = dma.hbm_to_vmem [thread:$0]  (!%p4491_p5), %s4570_s26, 256, %s4574_s29, %s5295_s10, %s4299_s19, %s4299_s19, %s4300_s0  }
  0x80   : > { %s4604_s18 = sadd.s32 4294967295, %s4295_s30   ;;  %p238_p3 = scmp.ne.s32.totalorder %s4287_s28, %s4283_s3 }
  0x81   : > { %p5297_p8 = scmp.eq.s32.totalorder %s4604_s18, 0  ;;  %p3427_p10 = scmp.ge.s32.totalorder %s4295_s30, 1 }
  0x82   : > { %p634_p11 = scmp.lt.s32.totalorder %s4295_s30, 3  ;;  %s4302_s19 = smov [#allocation3]  }
  0x83   : > { %p4613_p9 = por %p5297_p8, %p238_p3  ;;  %s646_s0 = sshll.u32 %s4302_s19, 4  ;;  %s647_s0 = int_to_ptr.vmem [resolvable:$true] %s646_s0 }
  0x84   : > { %p4618_p0 = pnand %p3427_p10, %p634_p11  ;;  %s5343_s9 = sld [smem:[#allocation38_spill]] }
  0x85   : > { %s5340_s21 = scalar_select %p4613_p9, 1, 0 }
  0x86   : > { %s5341_s22 = scalar_select %p4618_p0, 1, 0 }
  0x87   : > { %p3804_p1 = pneg %p4618_p0  ;;  %s727_s4 = scalar_lea.vmem [#allocation8], %s4477_s24 }
  0x88   : > { %s734_s27 = sshll.u32 %s727_s4, 4  ;;  %s5344_s20 = sld [smem:[#allocation29_spill]]  ;;  %s4637_s27 = int_to_ptr.vmem [resolvable:$true] %s734_s27 }
  0x89   : > { %p4626_p13 = pnand %p3804_p1, %p5297_p8 }
  0x8a   : > { %s4634_s29 = scalar_lea.hbm %s5343_s9, %s4480_s6 }
  0x8b   : > { %p4069_p4 = pneg %p4626_p13 }
  0x8e   : > { %s4067_s19 = scalar_lea.hbm %s5344_s20, 256 }
  0x8f   : > { %p4068_p2 = scmp.ne.s32.totalorder %s5344_s20, %s4067_s19  ;;  %p4074_p10 = scmp.lt.u32.totalorder %s4067_s19, %s5344_s20 }
  0x91   : > { %p4070_p6 = pnand %p4069_p4, %p4068_p2 }
  0x93   : > { %p4071_p3 = pneg %p4070_p6 }
  0x95   : > { %p4076_p11 = pnand %p4074_p10, %p4071_p3 }
  0x97   : > { %4079 = shalt.err (!%p4076_p11)
}
  0x98   : > { %s4080_s4 = scalar_lea.vmem %s647_s0, 256  ;;  %p4088_p9 = scmp.lt.s32.totalorder %s647_s0, %s647_s0 }
  0x99   : > { %p4081_p1 = scmp.ne.s32.totalorder %s647_s0, %s4080_s4  ;;  %p4089_p0 = scmp.lt.s32.totalorder %s4080_s4, %s4080_s4 }
  0x9b   : > { %p4083_p12 = pnand %p4081_p1, %p4069_p4  ;;  %p4090_p5 = por %p4089_p0, %p4088_p9 }
  0x9d   : > { %p4084_p8 = pneg %p4083_p12 }
  0x9f   : > { %p4091_p7 = pnand %p4090_p5, %p4084_p8 }
  0xa1   : > { %4094 = shalt.err (!%p4091_p7)
}
  0xa2   : > { %s4303_s7 = smov 128   ;;  %s4304_s10 = smov 8  }
  0xa3   : > { %3807 = dma.hbm_to_vmem [thread:$0]  (!%p4626_p13), %s5344_s20, 256, %s647_s0, [#allocation4], %s4303_s7, %s4303_s7, %s4304_s10  }
  0xa4   : > { %s4095_s19 = scalar_lea.hbm %s4634_s29, 16  ;;  %p5345_p2 = scmp.ne.s32.totalorder %s5335_s25, 0 }
  0xa5   : > { %p4096_p12 = scmp.ne.s32.totalorder %s4634_s29, %s4095_s19  ;;  %s4100_s4 = scalar_lea.hbm %s5343_s9, 32 }
  0xa6   : > { %p4101_p5 = scmp.lt.u32.totalorder %s4634_s29, %s5343_s9  ;;  %p4102_p7 = scmp.lt.u32.totalorder %s4100_s4, %s4095_s19 }
  0xa7   : > { %p4098_p4 = pnand %p4096_p12, %p5345_p2  ;;  %p4104_p0 = scmp.lt.u32.totalorder %s4095_s19, %s4634_s29 }
  0xa8   : > { %p4103_p8 = por %p4102_p7, %p4101_p5 }
  0xa9   : > { %p4099_p9 = pneg %p4098_p4 }
  0xaa   : > { %p4105_p6 = por %p4104_p0, %p4103_p8 }
  0xac   : > { %p4106_p3 = pnand %p4105_p6, %p4099_p9 }
  0xae   : > { %4109 = shalt.err (!%p4106_p3)
}
  0xaf   : > { %s4110_s0 = scalar_lea.vmem %s4637_s27, 16  ;;  %s4305_s3 = smov [#allocation8]  }
  0xb0   : > { %p4111_p13 = scmp.ne.s32.totalorder %s4637_s27, %s4110_s0  ;;  %s4115_s7 = sshll.u32 %s4305_s3, 4  ;;  %s4116_s7 = int_to_ptr.vmem [resolvable:$false] %s4115_s7 }
  0xb1   : > { %s4117_s12 = scalar_lea.vmem %s4116_s7, 32  ;;  %p4118_p1 = scmp.lt.s32.totalorder %s4637_s27, %s4116_s7 }
  0xb2   : > { %p4113_p10 = pnand %p4111_p13, %p5345_p2  ;;  %p4119_p12 = scmp.lt.s32.totalorder %s4117_s12, %s4110_s0 }
  0xb4   : > { %p4114_p11 = pneg %p4113_p10  ;;  %p4120_p4 = por %p4119_p12, %p4118_p1 }
  0xb6   : > { %p4121_p5 = pnand %p4120_p4, %p4114_p11 }
  0xb8   : > { %4124 = shalt.err (!%p4121_p5)
}
  0xb9   : > { %p5346_p9 = scmp.ne.s32.totalorder %s5334_s23, 0  ;;  %s5347_s17 = scalar_lea.sflag [#allocation7], %s4474_s5 }
  0xba   : > { %s5348_s11 = sld [smem:[#allocation40_spill]]  ;;  %s765_s19 = scalar_lea.vmem [#allocation11], %s4477_s24 }
  0xbb   : > { %3814 = dma.hbm_to_vmem [thread:$0]  (!%p5346_p9), %s4634_s29, 16, %s4637_s27, %s5347_s17  }
  0xbc   : > { %s772_s30 = sshll.u32 %s765_s19, 4  ;;  %s773_s30 = int_to_ptr.vmem [resolvable:$true] %s772_s30 }
  0xc0   : > { %s4682_s1 = scalar_lea.hbm %s5348_s11, %s4480_s6  ;;  %s4130_s29 = scalar_lea.hbm %s5348_s11, 32 }
  0xc1   : > { %s4125_s26 = scalar_lea.hbm %s4682_s1, 16  ;;  %p4131_p6 = scmp.lt.u32.totalorder %s4682_s1, %s5348_s11 }
  0xc2   : > { %p4126_p7 = scmp.ne.s32.totalorder %s4682_s1, %s4125_s26  ;;  %p4132_p3 = scmp.lt.u32.totalorder %s4130_s29, %s4125_s26 }
  0xc3   : > { %p4134_p10 = scmp.lt.u32.totalorder %s4125_s26, %s4682_s1 }
  0xc4   : > { %p4128_p8 = pnand %p4126_p7, %p5345_p2  ;;  %p4133_p13 = por %p4132_p3, %p4131_p6 }
  0xc6   : > { %p4129_p0 = pneg %p4128_p8  ;;  %p4135_p11 = por %p4134_p10, %p4133_p13 }
  0xc8   : > { %p4136_p1 = pnand %p4135_p11, %p4129_p0 }
  0xca   : > { %4139 = shalt.err (!%p4136_p1)
}
  0xcb   : > { %s4140_s7 = scalar_lea.vmem %s773_s30, 16  ;;  %s4306_s12 = smov [#allocation11]  }
  0xcc   : > { %p4141_p12 = scmp.ne.s32.totalorder %s773_s30, %s4140_s7  ;;  %s4145_s17 = sshll.u32 %s4306_s12, 4  ;;  %s4146_s17 = int_to_ptr.vmem [resolvable:$false] %s4145_s17 }
  0xcd   : > { %s4147_s10 = scalar_lea.vmem %s4146_s17, 32  ;;  %p4148_p7 = scmp.lt.s32.totalorder %s773_s30, %s4146_s17 }
  0xce   : > { %p4143_p4 = pnand %p4141_p12, %p5345_p2  ;;  %p4149_p8 = scmp.lt.s32.totalorder %s4147_s10, %s4140_s7 }
  0xd0   : > { %p4144_p5 = pneg %p4143_p4  ;;  %p4150_p9 = por %p4149_p8, %p4148_p7 }
  0xd2   : > { %p4151_p3 = pnand %p4150_p9, %p4144_p5 }
  0xd4   : > { %4154 = shalt.err (!%p4151_p3)
}
  0xd5   : > { %p5349_p6 = scmp.ne.s32.totalorder %s5334_s23, 0  ;;  %s5350_s2 = scalar_lea.sflag [#allocation10], %s4474_s5 }
  0xd6   : > { %s5351_s13 = sld [smem:[#allocation42_spill]]  ;;  %s803_s0 = scalar_lea.vmem [#allocation14], %s4477_s24 }
  0xd7   : > { %3820 = dma.hbm_to_vmem [thread:$0]  (!%p5349_p6), %s4682_s1, 16, %s773_s30, %s5350_s2  }
  0xd8   : > { %s810_s29 = sshll.u32 %s803_s0, 4  ;;  %s811_s29 = int_to_ptr.vmem [resolvable:$true] %s810_s29 }
  0xdc   : > { %s4708_s4 = scalar_lea.hbm %s5351_s13, %s4480_s6  ;;  %s4160_s1 = scalar_lea.hbm %s5351_s13, 32 }
  0xdd   : > { %s4155_s27 = scalar_lea.hbm %s4708_s4, 16  ;;  %p4161_p10 = scmp.lt.u32.totalorder %s4708_s4, %s5351_s13 }
  0xde   : > { %p4156_p9 = scmp.ne.s32.totalorder %s4708_s4, %s4155_s27  ;;  %p4162_p11 = scmp.lt.u32.totalorder %s4160_s1, %s4155_s27 }
  0xdf   : > { %p4164_p12 = scmp.lt.u32.totalorder %s4155_s27, %s4708_s4 }
  0xe0   : > { %p4158_p0 = pnand %p4156_p9, %p5345_p2  ;;  %p4163_p1 = por %p4162_p11, %p4161_p10 }
  0xe2   : > { %p4159_p13 = pneg %p4158_p0  ;;  %p4165_p4 = por %p4164_p12, %p4163_p1 }
  0xe4   : > { %p4166_p5 = pnand %p4165_p4, %p4159_p13 }
  0xe6   : > { %4169 = shalt.err (!%p4166_p5)
}
  0xe7   : > { %s4170_s17 = scalar_lea.vmem %s811_s29, 16  ;;  %s4307_s10 = smov [#allocation14]  }
  0xe8   : > { %p4171_p7 = scmp.ne.s32.totalorder %s811_s29, %s4170_s17  ;;  %s4175_s2 = sshll.u32 %s4307_s10, 4  ;;  %s4176_s2 = int_to_ptr.vmem [resolvable:$false] %s4175_s2 }
  0xe9   : > { %s4177_s19 = scalar_lea.vmem %s4176_s2, 32  ;;  %p4178_p9 = scmp.lt.s32.totalorder %s811_s29, %s4176_s2 }
  0xea   : > { %p4173_p8 = pnand %p4171_p7, %p5345_p2  ;;  %p4179_p0 = scmp.lt.s32.totalorder %s4177_s19, %s4170_s17 }
  0xec   : > { %p4174_p3 = pneg %p4173_p8  ;;  %p4180_p6 = por %p4179_p0, %p4178_p9 }
  0xee   : > { %p4181_p10 = pnand %p4180_p6, %p4174_p3 }
  0xf0   : > { %4184 = shalt.err (!%p4181_p10)
}
  0xf1   : > { %p5352_p11 = scmp.ne.s32.totalorder %s5334_s23, 0  ;;  %s5353_s26 = scalar_lea.sflag [#allocation13], %s4474_s5 }
  0xf2   : > { %s5354_s15 = sld [smem:[#allocation44_spill]]  ;;  %s828_s7 = scalar_lea.vmem [#allocation15], %s4477_s24 }
  0xf3   : > { %3826 = dma.hbm_to_vmem [thread:$0]  (!%p5352_p11), %s4708_s4, 16, %s811_s29, %s5353_s26  }
  0xf4   : > { %s835_s1 = sshll.u32 %s828_s7, 4  ;;  %s826_s30 = scalar_lea.sflag [#allocation16], %s4477_s24  ;;  %s836_s1 = int_to_ptr.vmem [resolvable:$true] %s835_s1 }
  0xf8   : > { %s4734_s3 = scalar_lea.hbm %s5354_s15, %s4480_s6  ;;  %s4190_s29 = scalar_lea.hbm %s5354_s15, 32 }
  0xf9   : > { %s4185_s5 = scalar_lea.hbm %s4734_s3, 16  ;;  %p4191_p12 = scmp.lt.u32.totalorder %s4734_s3, %s5354_s15 }
  0xfa   : > { %p4186_p6 = scmp.ne.s32.totalorder %s4734_s3, %s4185_s5  ;;  %p4192_p4 = scmp.lt.u32.totalorder %s4190_s29, %s4185_s5 }
  0xfb   : > { %p4194_p7 = scmp.lt.u32.totalorder %s4185_s5, %s4734_s3 }
  0xfc   : > { %p4188_p13 = pnand %p4186_p6, %p5345_p2  ;;  %p4193_p5 = por %p4192_p4, %p4191_p12 }
  0xfe   : > { %p4189_p1 = pneg %p4188_p13  ;;  %p4195_p8 = por %p4194_p7, %p4193_p5 }
 0x100   : > { %p4196_p3 = pnand %p4195_p8, %p4189_p1 }
 0x102   : > { %4199 = shalt.err (!%p4196_p3)
}
 0x103   : > { %s4200_s24 = scalar_lea.vmem %s836_s1, 16  ;;  %s4308_s10 = smov [#allocation15]  }
 0x104   : > { %p4201_p9 = scmp.ne.s32.totalorder %s836_s1, %s4200_s24  ;;  %s4205_s2 = sshll.u32 %s4308_s10, 4  ;;  %s4206_s2 = int_to_ptr.vmem [resolvable:$false] %s4205_s2 }
 0x105   : > { %s4207_s19 = scalar_lea.vmem %s4206_s2, 32  ;;  %p4208_p6 = scmp.lt.s32.totalorder %s836_s1, %s4206_s2 }
 0x106   : > { %p4203_p0 = pnand %p4201_p9, %p5345_p2  ;;  %p4209_p13 = scmp.lt.s32.totalorder %s4207_s19, %s4200_s24 }
 0x108   : > { %p4204_p10 = pneg %p4203_p0  ;;  %p4210_p11 = por %p4209_p13, %p4208_p6 }
 0x10a   : > { %p4211_p4 = pnand %p4210_p11, %p4204_p10 }
 0x10c   : > { %4214 = shalt.err (!%p4211_p4)
}
 0x10d   : > { %p5355_p12 = scmp.ne.s32.totalorder %s5334_s23, 0  ;;  %p5356_p1 = scmp.ne.s32.totalorder %s5341_s22, 0 }
 0x10f   : > { %3829 = dma.hbm_to_vmem [thread:$0]  (!%p5355_p12), %s4734_s3, 16, %s836_s1, %s826_s30  }
 0x110   : > { %880 = sbr.rel (%p5356_p1) target bundleno = 6957 (0x1b2d), region = 108 }
 0x117   : > { %p5357_p5 = scmp.eq.s32.totalorder %s4604_s18, 0 }
 0x119   : > { %4258 = dma.done.wait (%p5357_p5), [#allocation4], 256   ;;  %p5358_p2 = pmov %p5357_p5 }
 0x11a   : > { %s886_s25 = sand.u32 1, %s4604_s18   ;;  %s4763_s26 = sand.u32 1, %s4287_s28  }
 0x11b   : > { %4260 = vsyncadd (%p5358_p2), [#allocation4], 4294967040  ;;  %s887_s0 = scalar_lea.sflag [#allocation7], %s886_s25  ;;  %p5359_p11 = scmp.ne.s32.totalorder %s5340_s21, 0 }
 0x11d   : > { %4262 = dma.done.wait (%p5359_p11), %s887_s0, 32  }
 0x11e   : > { %4264 = vsyncadd (%p5359_p11), %s887_s0, 4294967264  ;;  %s3443_s22 = sshll.u32 %s4763_s26, 4  ;;  %s903_s3 = scalar_lea.sflag [#allocation10], %s886_s25 }
 0x11f   : > { %s4772_s7 = scalar_lea.vmem [#allocation9], %s3443_s22 }
 0x120   : > { %4266 = dma.done.wait (%p5359_p11), %s903_s3, 272  }
 0x121   : > { %4268 = vsyncadd (%p5359_p11), %s903_s3, 4294967024  ;;  %s920_s30 = scalar_lea.sflag [#allocation13], %s886_s25  ;;  %s4779_s5 = scalar_lea.vmem [#allocation12], %s3443_s22 }
 0x122   : > { %4270 = dma.done.wait (%p5359_p11), %s920_s30, 272  }
 0x123   : > { %4272 = vsyncadd (%p5359_p11), %s920_s30, 4294967024  ;;  %s937_s4 = scalar_lea.sflag [#allocation16], %s4763_s26 }
 0x124   : > { %4274 = dma.done.wait (%p5359_p11), %s937_s4, 16  }
 0x125   : > { %4276 = vsyncadd (%p5359_p11), %s937_s4, 4294967280  ;;  %p1069_p7 = scmp.lt.s32.totalorder %s4604_s18, 1  ;;  %s5361_s0 = sld [smem:[#allocation31_spill]] }
 0x126   : > { %s5362_s4 = sld [smem:[#allocation33_spill]]  ;;  %s5364_s13 = sld [smem:[#allocation35_spill]] }
 0x127   : > { %s4794_s17 = scalar_select %p1069_p7, %s4604_s18, 1 }
 0x128   : > { %s5365_s8 = sld [smem:[#allocation37_spill]]  ;;  %s5366_s14 = sld [smem:[#allocation43_spill]] }
 0x129   : > { %s3524_s6 = sshll.u32 %s4794_s17, 4  ;;  %s3528_s19 = sshll.u32 %s4794_s17, 5 }
 0x12a   : > { %s1102_s23 = scalar_lea.vmem %s5282_s16, %s4794_s17  ;;  %s5368_s9 = sld [smem:[#allocation45_spill]] }
 0x12b   : > { %s1073_s22 = scalar_lea.vmem %s5361_s0, %s3524_s6  ;;  %s5369_s2 = sld [smem:[#allocation46_spill]] }
 0x12c   : > { %s4807_s29 = scalar_lea.vmem %s5362_s4, %s3524_s6  ;;  %s4816_s15 = scalar_lea.vmem %s5364_s13, %s3524_s6 }
 0x12d   : > { %s5372_s30 = sld [smem:[#allocation49_spill]]  ;;  %p5373_p8 = scmp.ne.s32.totalorder %s4604_s18, 0 }
 0x12e   : > { %s4821_s21 = scalar_lea.vmem %s5365_s8, %s3524_s6  ;;  %s4827_s3 = scalar_lea.vmem %s5366_s14, %s3528_s19  ;;  %v1123_v0 = vld [vmem:[#allocation3] sm:$0xff] (!%p5373_p8)  ;;  %vm1125_vm0 = vcmask (!%p5373_p8), 261120   ;;  %v1124_v1 = vld [vmem:[#allocation3 + $0x8] sm:$0xff] (!%p5373_p8) }
 0x12f   : > { %5367 = sst [smem:[#allocation28_spill]] %s4827_s3  ;;  %s5371_s19 = sld [smem:[#allocation48_spill]]  ;;  %1126 = vst.msk [vmem:[#allocation2] sm:$0xff] (!%p5373_p8), %vm1125_vm0, %v1123_v0  ;;  %1127 = vst.msk [vmem:[#allocation2 + $0x8] sm:$0xff] (!%p5373_p8), %vm1125_vm0, %v1124_v1 }
 0x130   : > { %s1105_s11 = scalar_lea.vmem %s5368_s9, %s4794_s17  ;;  %s5370_s8 = sld [smem:[#allocation47_spill]] }
 0x131   : > { %s1108_s24 = scalar_lea.vmem %s5369_s2, %s4794_s17  ;;  %1122 = sbr.rel (%p5373_p8) target bundleno = 312 (0x138), region = 144 }
 0x133   : > { %s1117_s4 = scalar_lea.vmem %s5372_s30, %s4794_s17 }
 0x135   : > { %s1114_s0 = scalar_lea.vmem %s5371_s19, %s4794_s17 }
 0x136   : > { %s1111_s20 = scalar_lea.vmem %s5370_s8, %s4794_s17 }
 0x138 PF: > { %v3888_v2 = vld [vmem:[%s1073_s22] sm:$0xff]   ;;  %v4309_v3 = vmov 0.0   ;;  %v3889_v4 = vld [vmem:[%s1073_s22 + $0x8] sm:$0xff]   ;;  %vm4310_vm1 = vmmov 0   ;;  %vm1199_vm2 = vcmask 261120   ;;  %s5374_s28 = sld [smem:[#allocation32_spill]]  ;;  %v1132_v24 = vlaneseq }
 0x139   : > { %3594 = vmatprep.subr.bf16.mxu1 %v4309_v3  ;;  %3608 = vmatprep.subr.bf16.mxu0 %v4309_v3  ;;  %v4859_v5 = vld [vmem:[#allocation2] sm:$0xff]  ;;  %v4861_v6 = vld [vmem:[#allocation2 + $0x8] sm:$0xff]  ;;  %s4311_s2 = smov 96   ;;  %s4312_s22 = smov 120   ;;  %vm1251_vm3 = vcmask 64512   ;;  %vm1301_vm5 = vcmask 130048  }
 0x13a   : > { %3595 = vmatpush3.bf16.msra.mxu1 %v3888_v2  ;;  %3598 = vmatprep.mubr.msk.bf16.mxu1 %vm4310_vm1, %v4309_v3  ;;  %v1175_v7 = vpack.c.bf16 %v4861_v6, %v4859_v5  ;;  %s4313_s3 = smov 88   ;;  %v1133_v25 = vshrl.u32 %v1132_v24, 7  ;;  %v1160_v26 = vand.u32 127, %v1132_v24  ;;  %s4314_s1 = smov 56   ;;  %vm1504_vm7 = vcmask 1043456  }
 0x13b   : > { %3596 = vmatprep.subr.bf16.mxu1 %v4309_v3  ;;  %3610 = vmatprep.mubr.msk.bf16.mxu0 %vm4310_vm1, %v4309_v3  ;;  %s4315_s12 = smov 64   ;;  %s4316_s9 = smov 80   ;;  %vm3004_vm8 = vcmask 523264  }
 0x13c   : > { %v1134_v27 = vadd.s32 8, %v1133_v25  ;;  %v1139_v28 = vand.u32 1, %v1133_v25  ;;  %v1165_v29 = vand.u32 1, %v1160_v26  ;;  %s4317_s13 = smov 112   ;;  %v1373_v26 = vld [vmem:[%s4807_s29] sm:$0xf] }
 0x13d   : > { %s4318_s6 = smov 72   ;;  %s4319_s10 = smov 48  }
 0x13e   : > { %3597 = vmatpush3.bf16.msra.mxu1 %v3889_v4  ;;  %s5375_s27 = scalar_lea.vmem %s5374_s28, %s4794_s17  ;;  %v1146_v30 = vand.u32 1, %v1134_v27  ;;  %vm4898_vm4 = vcmp.eq.s32.totalorder %v1139_v28, %v1165_v29  ;;  %v1553_v27 = vsel %vm1504_vm7, %v1373_v26, 0  ;;  %v3464_v28 = vld [vmem:[%s4807_s29 + $0x4] sm:$0xf]  ;;  %s4320_s25 = smov 104  }
 0x13f   : > { %3602 = vmatprep.subr.bf16.mxu1 %v4309_v3  ;;  %v3456_v8 = vld [vmem:[%s5375_s27] ss:$0 sm:$0xff]  ;;  %s4321_s19 = smov 40   ;;  %s5380_s8 = sld [smem:[#allocation34_spill]] }
 0x140   : > { %vm4902_vm6 = vcmp.eq.s32.totalorder %v1146_v30, %v1165_v29  ;;  %v1506_v29 = vsel %vm1504_vm7, %v3464_v28, 0  ;;  %p3517_p3 = scmp.ne.s32.totalorder %s4604_s18, 1 }
 0x141   : > { %3599 = vmatmul.mubr.msk.bf16.vlgmr.msra.gmra.mrb[0].mxu1 %vm1199_vm2, %v1175_v7 }
 0x142   : > { %3604 = vmatprep.mubr.msk.bf16.mxu1 %vm4310_vm1, %v4309_v3 }
 0x145   : > { %s5381_s14 = scalar_lea.vmem %s5380_s8, %s4794_s17 }
 0x214   : > { %v1237_v9 = vpop.f32.mrb[0].mxu1 }
 0x215   : > { %v1238_v10 = vadd.f32 %v3456_v8, %v1237_v9  ;;  %v3600_v11 = vpop.f32.mrb[1].mxu1 }
 0x216   : > { %v1240_v12 = vpop.f32.mrb[2].mxu1 }
 0x217   : > { %v1241_v13 = vadd.f32 %v3456_v8, %v1240_v12  ;;  %v3601_v14 = vpop.f32.mrb[3].mxu1  ;;  %v1244_v15 = vmul.f32 0.35355338, %v1238_v10 }
 0x219   : > { %v1245_v16 = vmul.f32 0.35355338, %v1241_v13  ;;  %v4877_v17 = vpack.c.bf16 %v1241_v13, %v1238_v10 }
 0x21b   : > { %v4879_v18 = vpack.c.bf16 %v1245_v16, %v1244_v15  ;;  %1249 = vrot.lane.b32.xlu0 %v4877_v17, %s4311_s2 }
 0x21d   : > { %1375 = vrot.lane.b32.xlu1 %v4879_v18, %s4312_s22 }
 0x21f   : > { %1377 = vrot.lane.b32.xlu0 %v4877_v17, %s4313_s3 }
 0x28d   : > { %v1250_v19 = vpop.permute.xlu0 %1249 }
 0x28e   : > { %v1256_v20 = vsel %vm1251_vm3, %v1250_v19, 0 }
 0x28f   : > { %3603 = vmatpush3.bf16.xpose.msra.mxu1 %v1256_v20  ;;  %v1376_v23 = vpop.permute.xlu1 %1375 }
 0x290   : > { %3614 = vmatprep.subr.bf16.mxu1 %v4309_v3 }
 0x291   : > { %v1378_v21 = vpop.permute.xlu0 %1377 }
 0x292   : > { %v1383_v22 = vsel %vm1251_vm3, %v1378_v21, 0 }
 0x296   : > { %3605 = vmatmul.mubr.msk.bf16.vlgmr.msra.gmra.mrb[4].mxu1 %vm1251_vm3, %v4879_v18 }
 0x297   : > { %3615 = vmatpush3.bf16.xpose.msra.mxu1 %v1383_v22  ;;  %3616 = vmatprep.mubr.msk.bf16.mxu1 %vm4310_vm1, %v4309_v3 }
 0x298   : > { %3626 = vmatprep.subr.bf16.mxu1 %v4309_v3 }
 0x29e   : > { %3617 = vmatmul.mubr.msk.bf16.vlgmr.msra.gmra.mrb[8].mxu1 %vm1251_vm3, %v1376_v23 }
 0x29f   : > { %3628 = vmatprep.mubr.msk.bf16.mxu1 %vm4310_vm1, %v4309_v3  ;;  %3627 = vmatpush3.bf16.msra.mxu1 %v1506_v29 }
 0x2a0   : > { %3638 = vmatprep.subr.bf16.mxu1 %v4309_v3 }
 0x369   : > { %v1292_v32 = vpop.f32.mrb[4].mxu1 }
 0x36a   : > { %v1299_v34 = vsel %vm4898_vm4, %v1292_v32, -1e+30  ;;  %v3606_v35 = vpop.f32.mrb[5].mxu1 }
 0x36b   : > { %v1295_v36 = vpop.f32.mrb[6].mxu1  ;;  %v1302_v37 = vsel %vm1301_vm5, %v1299_v34, -inf }
 0x36c   : > { %v1300_v38 = vsel %vm4902_vm6, %v1295_v36, -1e+30  ;;  %1303 = vmax.xlane.f32.xlu1 %v1302_v37  ;;  %v3607_v39 = vpop.f32.mrb[7].mxu1 }
 0x36d   : > { %v1305_v40 = vsel %vm1301_vm5, %v1300_v38, -inf }
 0x36e   : > { %1306 = vmax.xlane.f32.xlu0 %v1305_v40 }
 0x371   : > { %v1419_v41 = vpop.f32.mrb[8].mxu1 }
 0x372   : > { %v1426_v42 = vsel %vm4898_vm4, %v1419_v41, -1e+30  ;;  %v3618_v43 = vpop.f32.mrb[9].mxu1 }
 0x373   : > { %v1422_v44 = vpop.f32.mrb[10].mxu1  ;;  %v1428_v45 = vsel %vm1301_vm5, %v1426_v42, -inf }
 0x374   : > { %v1427_v46 = vsel %vm4902_vm6, %v1422_v44, -1e+30  ;;  %1429 = vmax.xlane.f32.xlu0 %v1428_v45  ;;  %v3619_v47 = vpop.f32.mrb[11].mxu1 }
 0x375   : > { %v1431_v48 = vsel %vm1301_vm5, %v1427_v46, -inf }
 0x376   : > { %1432 = vmax.xlane.f32.xlu1 %v1431_v48 }
 0x3f9   : > { %v1304_v49 = vpop.xlane.xlu1 %1303 }
 0x3fa   : > { %v1308_v50 = vsub.f32 %v1299_v34, %v1304_v49 }
 0x3fb   : > { %v1307_v51 = vpop.xlane.xlu0 %1306 }
 0x3fc   : > { %v1310_v52 = vmul.f32 1.442695, %v1308_v50  ;;  %v1309_v53 = vsub.f32 %v1300_v38, %v1307_v51 }
 0x3fe   : > { %3901 = vpow2.f32 %v1310_v52  ;;  %v1312_v54 = vmul.f32 1.442695, %v1309_v53 }
 0x400   : > { %3903 = vpow2.f32 %v1312_v54 }
 0x401   : > { %v1430_v55 = vpop.xlane.xlu0 %1429 }
 0x402   : > { %v1434_v56 = vsub.f32 %v1426_v42, %v1430_v55 }
 0x403   : > { %v1433_v57 = vpop.xlane.xlu1 %1432 }
 0x404   : > { %v1436_v58 = vmul.f32 1.442695, %v1434_v56  ;;  %v1435_v59 = vsub.f32 %v1427_v46, %v1433_v57 }
 0x406   : > { %3905 = vpow2.f32 %v1436_v58  ;;  %v1438_v60 = vmul.f32 1.442695, %v1435_v59 }
 0x408   : > { %v3902_v61 = vpop.eup %3901  ;;  %3907 = vpow2.f32 %v1438_v60 }
 0x409   : > { %v1314_v62 = vsel %vm1301_vm5, %v3902_v61, 0.0 }
 0x40a   : > { %v3904_v63 = vpop.eup %3903  ;;  %1315 = vadd.xlane.f32.xlu0 %v1314_v62 }
 0x40b   : > { %v1317_v0 = vsel %vm1301_vm5, %v3904_v63, 0.0 }
 0x40c   : > { %1318 = vadd.xlane.f32.xlu1 %v1317_v0 }
 0x410   : > { %v3906_v1 = vpop.eup %3905 }
 0x411   : > { %v1440_v2 = vsel %vm1301_vm5, %v3906_v1, 0.0 }
 0x412   : > { %v3908_v4 = vpop.eup %3907  ;;  %1441 = vadd.xlane.f32.xlu0 %v1440_v2 }
 0x413   : > { %v1443_v7 = vsel %vm1301_vm5, %v3908_v4, 0.0 }
 0x414   : > { %1444 = vadd.xlane.f32.xlu1 %v1443_v7 }
 0x425   : > { %1451 = vrot.lane.b32.xlu1 %v4877_v17, %s4314_s1  ;;  %s5382_s1 = sld [smem:[#allocation30_spill]] }
 0x428   : > { %1325 = vrot.lane.b32.xlu0 %v4877_v17, %s4315_s12 }
 0x429   : > { %1598 = vrot.lane.b32.xlu1 %v4877_v17, %s4316_s9 }
 0x42c   : > { %1596 = vrot.lane.b32.xlu0 %v4879_v18, %s4317_s13 }
 0x497   : > { %v1316_v8 = vpop.xlane.xlu0 %1315 }
 0x498   : > { %3909 = vrcp.f32 %v1316_v8 }
 0x499   : > { %v1319_v9 = vpop.xlane.xlu1 %1318 }
 0x49a   : > { %3911 = vrcp.f32 %v1319_v9 }
 0x49f   : > { %v1442_v10 = vpop.xlane.xlu0 %1441 }
 0x4a0   : > { %3913 = vrcp.f32 %v1442_v10 }
 0x4a1   : > { %v1445_v11 = vpop.xlane.xlu1 %1444 }
 0x4a2   : > { %v3910_v12 = vpop.eup %3909  ;;  %3915 = vrcp.f32 %v1445_v11 }
 0x4a3   : > { %v1326_v13 = vpop.permute.xlu0 %1325  ;;  %v1322_v15 = vmul.f32 %v3910_v12, %v3902_v61 }
 0x4a4   : > { %v3912_v14 = vpop.eup %3911  ;;  %3609 = vmatpush3.bf16.msra.mxu0 %v1326_v13 }
 0x4a5   : > { %3620 = vmatprep.subr.bf16.mxu0 %v4309_v3  ;;  %v1323_v16 = vmul.f32 %v3912_v14, %v3904_v63  ;;  %v1452_v20 = vpop.permute.xlu1 %1451 }
 0x4a7   : > { %v1324_v19 = vpack.c.bf16 %v1323_v16, %v1322_v15  ;;  %v1597_v44 = vpop.permute.xlu0 %1596 }
 0x4a9   : > { %3611 = vmatmul.mubr.msk.bf16.vlgmr.msra.gmra.mrb[0].mxu0 %vm1301_vm5, %v1324_v19  ;;  %v1599_v39 = vpop.permute.xlu1 %1598 }
 0x4aa   : > { %v3914_v21 = vpop.eup %3913  ;;  %3621 = vmatpush3.bf16.msra.mxu0 %v1452_v20  ;;  %3622 = vmatprep.mubr.msk.bf16.mxu0 %vm4310_vm1, %v4309_v3  ;;  %v1604_v43 = vsel %vm1251_vm3, %v1599_v39, 0 }
 0x4ab   : > { %3632 = vmatprep.subr.bf16.mxu0 %v4309_v3  ;;  %v1448_v23 = vmul.f32 %v3914_v21, %v3906_v1 }
 0x4ac   : > { %v3916_v22 = vpop.eup %3915 }
 0x4ad   : > { %v1449_v24 = vmul.f32 %v3916_v22, %v3908_v4 }
 0x4af   : > { %v1450_v25 = vpack.c.bf16 %v1449_v24, %v1448_v23  ;;  %v3469_v24 = vld [vmem:[%s4807_s29 + $0x8] sm:$0xf] }
 0x4b1   : > { %3623 = vmatmul.mubr.msk.bf16.vlgmr.msra.gmra.mrb[4].mxu0 %vm1301_vm5, %v1450_v25  ;;  %v1726_v25 = vsel %vm1504_vm7, %v3469_v24, 0 }
 0x4b2   : > { %3634 = vmatprep.mubr.msk.bf16.mxu0 %vm4310_vm1, %v4309_v3  ;;  %3633 = vmatpush3.bf16.msra.mxu0 %v1553_v27 }
 0x4b3   : > { %3644 = vmatprep.subr.bf16.mxu0 %v4309_v3 }
 0x57c   : > { %v1365_v30 = vpop.f32.mrb[0].mxu0 }
 0x57d   : > { %v3612_v32 = vpop.f32.mrb[1].mxu0 }
 0x57e   : > { %v1368_v34 = vpop.f32.mrb[2].mxu0 }
 0x57f   : > { %v1372_v35 = vpack.c.bf16 %v1368_v34, %v1365_v30  ;;  %v3613_v36 = vpop.f32.mrb[3].mxu0 }
 0x581   : > { %3635 = vmatmul.mubr.msk.bf16.vlgmr.msra.gmra.mrb[8].mxu0 %vm1251_vm3, %v1372_v35 }
 0x582   : > { %3646 = vmatprep.mubr.msk.bf16.mxu0 %vm4310_vm1, %v4309_v3 }
 0x584   : > { %v1491_v37 = vpop.f32.mrb[4].mxu0 }
 0x585   : > { %v3624_v38 = vpop.f32.mrb[5].mxu0 }
 0x586   : > { %v1494_v40 = vpop.f32.mrb[6].mxu0 }
 0x587   : > { %v1498_v41 = vpack.c.bf16 %v1494_v40, %v1491_v37  ;;  %v3625_v42 = vpop.f32.mrb[7].mxu0 }
 0x589   : > { %3629 = vmatmul.mubr.msk.bf16.vlgmr.msra.gmra.mrb[12].mxu1 %vm1251_vm3, %v1498_v41 }
 0x58a   : > { %3639 = vmatpush3.bf16.xpose.msra.mxu1 %v1604_v43  ;;  %3640 = vmatprep.mubr.msk.bf16.mxu1 %vm4310_vm1, %v4309_v3 }
 0x58b   : > { %3650 = vmatprep.subr.bf16.mxu1 %v4309_v3 }
 0x591   : > { %3641 = vmatmul.mubr.msk.bf16.vlgmr.msra.gmra.mrb[16].mxu1 %vm1251_vm3, %v1597_v44 }
 0x592   : > { %3652 = vmatprep.mubr.msk.bf16.mxu1 %vm4310_vm1, %v4309_v3  ;;  %3651 = vmatpush3.bf16.msra.mxu1 %v1726_v25 }
 0x593   : > { %3662 = vmatprep.subr.bf16.mxu1 %v4309_v3 }
 0x654   : > { %v1589_v45 = vpop.f32.mrb[8].mxu0 }
 0x655   : > { %v3636_v46 = vpop.f32.mrb[9].mxu0 }
 0x656   : > { %v1592_v47 = vpop.f32.mrb[10].mxu0 }
 0x657   : > { %v3637_v48 = vpop.f32.mrb[11].mxu0 }
 0x65c   : > { %v1542_v49 = vpop.f32.mrb[12].mxu1 }
 0x65d   : > { %v4953_v50 = vadd.f32 %v1589_v45, %v1542_v49  ;;  %v3630_v51 = vpop.f32.mrb[13].mxu1 }
 0x65e   : > { %v1545_v52 = vpop.f32.mrb[14].mxu1 }
 0x65f   : > { %v4955_v53 = vadd.f32 %v1592_v47, %v1545_v52  ;;  %v3631_v54 = vpop.f32.mrb[15].mxu1  ;;  %v3473_v52 = vld [vmem:[%s4807_s29 + $0xc] sm:$0xf] }
 0x660   : > { %v1901_v54 = vsel %vm1504_vm7, %v3473_v52, 0 }
 0x664   : > { %v1640_v55 = vpop.f32.mrb[16].mxu1 }
 0x665   : > { %v1647_v56 = vsel %vm4898_vm4, %v1640_v55, -1e+30  ;;  %v3642_v57 = vpop.f32.mrb[17].mxu1 }
 0x666   : > { %v1643_v58 = vpop.f32.mrb[18].mxu1  ;;  %v1649_v59 = vsel %vm1301_vm5, %v1647_v56, -inf }
 0x667   : > { %v1648_v60 = vsel %vm4902_vm6, %v1643_v58, -1e+30  ;;  %1650 = vmax.xlane.f32.xlu1 %v1649_v59  ;;  %v3643_v61 = vpop.f32.mrb[19].mxu1 }
 0x668   : > { %v1652_v62 = vsel %vm1301_vm5, %v1648_v60, -inf }
 0x669   : > { %1653 = vmax.xlane.f32.xlu0 %v1652_v62 }
 0x6f4   : > { %v1651_v63 = vpop.xlane.xlu1 %1650 }
 0x6f5   : > { %v1655_v0 = vsub.f32 %v1647_v56, %v1651_v63 }
 0x6f6   : > { %v1654_v1 = vpop.xlane.xlu0 %1653 }
 0x6f7   : > { %v1657_v2 = vmul.f32 1.442695, %v1655_v0  ;;  %v1656_v4 = vsub.f32 %v1648_v60, %v1654_v1 }
 0x6f9   : > { %3917 = vpow2.f32 %v1657_v2  ;;  %v1659_v7 = vmul.f32 1.442695, %v1656_v4 }
 0x6fb   : > { %3919 = vpow2.f32 %v1659_v7 }
 0x703   : > { %v3918_v8 = vpop.eup %3917 }
 0x704   : > { %v1661_v9 = vsel %vm1301_vm5, %v3918_v8, 0.0 }
 0x705   : > { %v3920_v10 = vpop.eup %3919  ;;  %1662 = vadd.xlane.f32.xlu0 %v1661_v9 }
 0x706   : > { %v1664_v11 = vsel %vm1301_vm5, %v3920_v10, 0.0 }
 0x707   : > { %1665 = vadd.xlane.f32.xlu1 %v1664_v11  ;;  %v3475_v11 = vld [vmem:[%s5381_s14] ss:$0 sm:$0xff] }
 0x718   : > { %1773 = vrot.lane.b32.xlu1 %v4877_v17, %s4318_s6 }
 0x71b   : > { %1672 = vrot.lane.b32.xlu0 %v4877_v17, %s4319_s10 }
 0x71c   : > { %1771 = vrot.lane.b32.xlu1 %v4879_v18, %s4320_s25 }
 0x792   : > { %v1663_v12 = vpop.xlane.xlu0 %1662 }
 0x793   : > { %3921 = vrcp.f32 %v1663_v12 }
 0x794   : > { %v1666_v13 = vpop.xlane.xlu1 %1665 }
 0x795   : > { %3923 = vrcp.f32 %v1666_v13 }
 0x796   : > { %v1673_v14 = vpop.permute.xlu0 %1672 }
 0x797   : > { %3645 = vmatpush3.bf16.msra.mxu0 %v1673_v14 }
 0x798   : > { %3656 = vmatprep.subr.bf16.mxu0 %v4309_v3  ;;  %v1774_v21 = vpop.permute.xlu1 %1773 }
 0x799   : > { %v1779_v23 = vsel %vm1251_vm3, %v1774_v21, 0 }
 0x79c   : > { %v1772_v18 = vpop.permute.xlu1 %1771 }
 0x79d   : > { %v3922_v15 = vpop.eup %3921 }
 0x79e   : > { %v1669_v19 = vmul.f32 %v3922_v15, %v3918_v8 }
 0x79f   : > { %v3924_v16 = vpop.eup %3923 }
 0x7a0   : > { %v1670_v20 = vmul.f32 %v3924_v16, %v3920_v10 }
 0x7a2   : > { %v1671_v22 = vpack.c.bf16 %v1670_v20, %v1669_v19 }
 0x7a4   : > { %3647 = vmatmul.mubr.msk.bf16.vlgmr.msra.gmra.mrb[12].mxu0 %vm1301_vm5, %v1671_v22 }
 0x7a5   : > { %3657 = vmatpush3.bf16.xpose.msra.mxu0 %v1779_v23  ;;  %3658 = vmatprep.mubr.msk.bf16.mxu0 %vm4310_vm1, %v4309_v3 }
 0x7a6   : > { %3668 = vmatprep.subr.bf16.mxu0 %v4309_v3 }
 0x7ac   : > { %3659 = vmatmul.mubr.msk.bf16.vlgmr.msra.gmra.mrb[16].mxu0 %vm1251_vm3, %v1772_v18 }
 0x7ad   : > { %3670 = vmatprep.mubr.msk.bf16.mxu0 %vm4310_vm1, %v4309_v3  ;;  %3669 = vmatpush3.bf16.msra.mxu0 %v1901_v54 }
 0x7ae   : > { %3682 = vmatprep.subr.bf16.mxu0 %v4309_v3 }
 0x877   : > { %v1712_v26 = vpop.f32.mrb[12].mxu0 }
 0x878   : > { %v3648_v27 = vpop.f32.mrb[13].mxu0 }
 0x879   : > { %v1715_v28 = vpop.f32.mrb[14].mxu0 }
 0x87a   : > { %v1719_v29 = vpack.c.bf16 %v1715_v28, %v1712_v26  ;;  %v3649_v30 = vpop.f32.mrb[15].mxu0 }
 0x87c   : > { %3653 = vmatmul.mubr.msk.bf16.vlgmr.msra.gmra.mrb[20].mxu1 %vm1251_vm3, %v1719_v29 }
 0x87d   : > { %3664 = vmatprep.mubr.msk.bf16.mxu1 %vm4310_vm1, %v4309_v3 }
 0x87f   : > { %v1815_v32 = vpop.f32.mrb[16].mxu0 }
 0x880   : > { %v1822_v34 = vsel %vm4898_vm4, %v1815_v32, -1e+30  ;;  %v3660_v35 = vpop.f32.mrb[17].mxu0 }
 0x881   : > { %v1818_v36 = vpop.f32.mrb[18].mxu0  ;;  %v1824_v37 = vsel %vm1301_vm5, %v1822_v34, -inf  ;;  %v3891_v35 = vld [vmem:[%s4821_s21 + $0x8] sm:$0xff]  }
 0x882   : > { %v1823_v38 = vsel %vm4902_vm6, %v1818_v36, -1e+30  ;;  %1825 = vmax.xlane.f32.xlu0 %v1824_v37  ;;  %v3661_v39 = vpop.f32.mrb[19].mxu0  ;;  %v3892_v36 = vld [vmem:[%s5382_s1] sm:$0xff]  }
 0x883   : > { %v1827_v40 = vsel %vm1301_vm5, %v1823_v38, -inf  ;;  %v3893_v37 = vld [vmem:[%s4816_s15] sm:$0xff]  }
 0x884   : > { %1828 = vmax.xlane.f32.xlu1 %v1827_v40 }
 0x895   : > { %1847 = vrot.lane.b32.xlu1 %v4877_v17, %s4321_s19 }
 0x90f   : > { %v1826_v41 = vpop.xlane.xlu0 %1825 }
 0x910   : > { %v1830_v42 = vsub.f32 %v1822_v34, %v1826_v41  ;;  %v3890_v34 = vld [vmem:[%s4821_s21] sm:$0xff]  }
 0x911   : > { %v1829_v43 = vpop.xlane.xlu1 %1828 }
 0x912   : > { %v1832_v44 = vmul.f32 1.442695, %v1830_v42  ;;  %v1831_v45 = vsub.f32 %v1823_v38, %v1829_v43  ;;  %v3894_v38 = vld [vmem:[%s4816_s15 + $0x8] sm:$0xff]  }
 0x914   : > { %3925 = vpow2.f32 %v1832_v44  ;;  %v1834_v46 = vmul.f32 1.442695, %v1831_v45 }
 0x915   : > { %v1848_v47 = vpop.permute.xlu1 %1847 }
 0x916   : > { %3927 = vpow2.f32 %v1834_v46  ;;  %3663 = vmatpush3.bf16.msra.mxu1 %v1848_v47  ;;  %v3476_v47 = vld [vmem:[%s1102_s23] ss:$0 sm:$0xff]  ;;  %s5384_s23 = scalar_lea.vmem [#allocation8], %s4763_s26 }
 0x917   : > { %3674 = vmatprep.subr.bf16.mxu1 %v4309_v3 }
 0x91e   : > { %v3926_v48 = vpop.eup %3925 }
 0x91f   : > { %v1836_v49 = vsel %vm1301_vm5, %v3926_v48, 0.0 }
 0x920   : > { %v3928_v51 = vpop.eup %3927  ;;  %1837 = vadd.xlane.f32.xlu0 %v1836_v49 }
 0x921   : > { %v1839_v17 = vsel %vm1301_vm5, %v3928_v51, 0.0 }
 0x924   : > { %1840 = vadd.xlane.f32.xlu0 %v1839_v17  ;;  %v3477_v17 = vld [vmem:[%s1105_s11] ss:$0 sm:$0xff]  ;;  %s5385_s11 = scalar_lea.vmem [#allocation6], %s4763_s26 }
 0x94f   : > { %v1762_v55 = vpop.f32.mrb[20].mxu1 }
 0x950   : > { %v1769_v56 = vadd.f32 %v1762_v55, %v4953_v50  ;;  %v3654_v57 = vpop.f32.mrb[21].mxu1 }
 0x951   : > { %v1765_v58 = vpop.f32.mrb[22].mxu1  ;;  %v3482_v57 = vld [vmem:[%s5384_s23] ss:$0 sm:$0xff] }
 0x952   : > { %v1770_v59 = vadd.f32 %v1765_v58, %v4955_v53  ;;  %v3655_v60 = vpop.f32.mrb[23].mxu1 }
 0x9ad   : > { %v1838_v61 = vpop.xlane.xlu0 %1837 }
 0x9ae   : > { %3929 = vrcp.f32 %v1838_v61 }
 0x9b1   : > { %v1841_v62 = vpop.xlane.xlu0 %1840 }
 0x9b2   : > { %3931 = vrcp.f32 %v1841_v62 }
 0x9b8   : > { %v3930_v63 = vpop.eup %3929 }
 0x9b9   : > { %v1844_v1 = vmul.f32 %v3930_v63, %v3926_v48 }
 0x9bc   : > { %v3932_v0 = vpop.eup %3931 }
 0x9bd   : > { %v1845_v2 = vmul.f32 %v3932_v0, %v3928_v51 }
 0x9bf   : > { %v1846_v4 = vpack.c.bf16 %v1845_v2, %v1844_v1  ;;  %v3478_v2 = vld [vmem:[%s5385_s11] ss:$0 sm:$0xff] }
 0x9c1   : > { %3665 = vmatmul.mubr.msk.bf16.vlgmr.msra.gmra.mrb[24].mxu1 %vm1301_vm5, %v1846_v4 }
 0x9c2   : > { %3678 = vmatprep.mubr.msk.bf16.mxu1 %vm4310_vm1, %v4309_v3  ;;  %3675 = vmatpush3.bf16.msra.mxu1 %v3893_v37 }
 0x9c3   : > { %3676 = vmatprep.subr.bf16.mxu1 %v4309_v3 }
 0x9c6   : > { %3677 = vmatpush3.bf16.msra.mxu1 %v3894_v38 }
 0x9c7   : > { %3690 = vmatprep.subr.bf16.mxu1 %v4309_v3 }
 0xa94   : > { %v1887_v50 = vpop.f32.mrb[24].mxu1 }
 0xa95   : > { %v3666_v7 = vpop.f32.mrb[25].mxu1 }
 0xa96   : > { %v1890_v8 = vpop.f32.mrb[26].mxu1 }
 0xa97   : > { %v1894_v53 = vpack.c.bf16 %v1890_v8, %v1887_v50  ;;  %v3667_v9 = vpop.f32.mrb[27].mxu1 }
 0xa99   : > { %3671 = vmatmul.mubr.msk.bf16.vlgmr.msra.gmra.mrb[20].mxu0 %vm1251_vm3, %v1894_v53 }
 0xa9a   : > { %3686 = vmatprep.mubr.msk.bf16.mxu0 %vm4310_vm1, %v4309_v3  ;;  %3683 = vmatpush3.bf16.msra.mxu0 %v3890_v34 }
 0xa9b   : > { %3684 = vmatprep.subr.bf16.mxu0 %v4309_v3 }
 0xa9e   : > { %3685 = vmatpush3.bf16.msra.mxu0 %v3891_v35 }
 0xa9f   : > { %3696 = vmatprep.subr.bf16.mxu0 %v4309_v3 }
 0xaa1   : > { %3687 = vmatmul.mubr.msk.bf16.vlgmr.msra.gmra.mrb[24].mxu0 %vm1199_vm2, %v3892_v36 }
 0xaa2   : > { %3698 = vmatprep.mubr.msk.bf16.mxu0 %vm4310_vm1, %v4309_v3 }
 0xb6c   : > { %v1937_v10 = vpop.f32.mrb[20].mxu0 }
 0xb6d   : > { %v1944_v12 = vadd.f32 %v1937_v10, %v1769_v56  ;;  %v3672_v13 = vpop.f32.mrb[21].mxu0 }
 0xb6e   : > { %v1940_v14 = vpop.f32.mrb[22].mxu0 }
 0xb6f   : > { %v1953_v15 = vadd.f32 %v3475_v11, %v1944_v12  ;;  %v1945_v16 = vadd.f32 %v1940_v14, %v1770_v59  ;;  %v3673_v19 = vpop.f32.mrb[23].mxu0 }
 0xb71   : > { %v1954_v20 = vadd.f32 %v3475_v11, %v1945_v16  ;;  %v1955_v21 = vadd.f32 %v1953_v15, %v4859_v5 }
 0xb73   : > { %v1957_v22 = vsel %vm1199_vm2, %v1955_v21, 0.0  ;;  %v1956_v23 = vadd.f32 %v1954_v20, %v4861_v6 }
 0xb74   : > { %1958 = vadd.xlane.f32.xlu0 %v1957_v22  ;;  %v2137_v58 = vpop.f32.mrb[24].mxu0 }
 0xb75   : > { %v1960_v18 = vsel %vm1199_vm2, %v1956_v23, 0.0  ;;  %v2138_v59 = vadd.f32 %v3482_v57, %v2137_v58  ;;  %v3688_v60 = vpop.f32.mrb[25].mxu0 }
 0xb76   : > { %v2140_v61 = vpop.f32.mrb[26].mxu0 }
 0xb77   : > { %v2141_v62 = vadd.f32 %v3482_v57, %v2140_v61  ;;  %v3689_v63 = vpop.f32.mrb[27].mxu0 }
 0xb78   : > { %1961 = vadd.xlane.f32.xlu0 %v1960_v18 }
 0xb79   : > { %v5052_v0 = vpack.c.bf16 %v2141_v62, %v2138_v59 }
 0xb7b   : > { %2271 = vrot.lane.b32.xlu1 %v5052_v0, %s4312_s22  ;;  %v2150_v1 = vsel %vm1251_vm3, %v5052_v0, 0 }
 0xbed   : > { %v2272_v10 = vpop.permute.xlu1 %2271 }
 0xbee   : > { %v2277_v14 = vsel %vm1251_vm3, %v2272_v10, 0  ;;  %v2267_v10 = vld [vmem:[%s4772_s7] sm:$0xf] }
 0xc01   : > { %v1959_v24 = vpop.xlane.xlu0 %1958 }
 0xc02   : > { %v1964_v25 = vmul.f32 0.03125, %v1959_v24 }
 0xc04   : > { %v1966_v26 = vsub.f32 %v1955_v21, %v1964_v25 }
 0xc05   : > { %v1962_v27 = vpop.xlane.xlu0 %1961 }
 0xc06   : > { %v1965_v28 = vmul.f32 0.03125, %v1962_v27  ;;  %v1968_v29 = vmul.f32 %v1966_v26, %v1966_v26 }
 0xc08   : > { %v1967_v30 = vsub.f32 %v1956_v23, %v1965_v28  ;;  %v1970_v5 = vsel %vm1199_vm2, %v1968_v29, 0.0 }
 0xc09   : > { %1971 = vadd.xlane.f32.xlu0 %v1970_v5 }
 0xc0a   : > { %v1969_v32 = vmul.f32 %v1967_v30, %v1967_v30 }
 0xc0c   : > { %v1973_v6 = vsel %vm1199_vm2, %v1969_v32, 0.0 }
 0xc0d   : > { %1974 = vadd.xlane.f32.xlu0 %v1973_v6 }
 0xc96   : > { %v1972_v39 = vpop.xlane.xlu0 %1971 }
 0xc97   : > { %v1976_v40 = vmul.f32 0.03125, %v1972_v39 }
 0xc99   : > { %v1978_v41 = vadd.f32 1e-05, %v1976_v40 }
 0xc9a   : > { %v1975_v42 = vpop.xlane.xlu0 %1974 }
 0xc9b   : > { %3933 = vrsqrt.f32 %v1978_v41  ;;  %v1977_v43 = vmul.f32 0.03125, %v1975_v42 }
 0xc9d   : > { %v1979_v44 = vadd.f32 1e-05, %v1977_v43 }
 0xc9f   : > { %3935 = vrsqrt.f32 %v1979_v44 }
 0xca5   : > { %v3934_v45 = vpop.eup %3933 }
 0xca6   : > { %v1982_v46 = vmul.f32 %v3934_v45, %v1966_v26 }
 0xca8   : > { %v1991_v49 = vmul.f32 %v3476_v47, %v1982_v46 }
 0xca9   : > { %v3936_v48 = vpop.eup %3935 }
 0xcaa   : > { %v1983_v51 = vmul.f32 %v3936_v48, %v1967_v30  ;;  %v5041_v54 = vadd.f32 %v3477_v17, %v1991_v49 }
 0xcac   : > { %v1992_v52 = vmul.f32 %v3476_v47, %v1983_v51 }
 0xcae   : > { %v5043_v55 = vadd.f32 %v3477_v17, %v1992_v52 }
 0xcb0   : > { %v2002_v56 = vpack.c.bf16 %v5043_v55, %v5041_v54 }
 0xcb2   : > { %3679 = vmatmul.mubr.msk.bf16.vlgmr.msra.gmra.mrb[28].mxu1 %vm1199_vm2, %v2002_v56 }
 0xcb3   : > { %3692 = vmatprep.mubr.msk.bf16.mxu1 %vm4310_vm1, %v4309_v3  ;;  %3691 = vmatpush3.bf16.xpose.msra.mxu1 %v2150_v1 }
 0xcb4   : > { %3702 = vmatprep.subr.bf16.mxu1 %v4309_v3 }
 0xd85   : > { %v2063_v4 = vpop.f32.mrb[28].mxu1 }
 0xd86   : > { %v2064_v50 = vadd.f32 %v3478_v2, %v2063_v4  ;;  %v3680_v7 = vpop.f32.mrb[29].mxu1 }
 0xd87   : > { %v2066_v8 = vpop.f32.mrb[30].mxu1 }
 0xd88   : > { %v2067_v53 = vadd.f32 %v3478_v2, %v2066_v8  ;;  %v3681_v9 = vpop.f32.mrb[31].mxu1  ;;  %v2070_v11 = vmul.f32 0.35355338, %v2064_v50 }
 0xd8a   : > { %v2071_v12 = vmul.f32 0.35355338, %v2067_v53 }
 0xd8c   : > { %v5061_v13 = vpack.c.bf16 %v2071_v12, %v2070_v11  ;;  %v2446_v11 = vsel %vm1504_vm7, %v2267_v10, 0  ;;  %v3491_v12 = vld [vmem:[%s4772_s7 + $0x4] sm:$0xf] }
 0xd8e   : > { %2269 = vrot.lane.b32.xlu0 %v5061_v13, %s4312_s22  ;;  %3693 = vmatmul.mubr.msk.bf16.vlgmr.msra.gmra.mrb[32].mxu1 %vm1251_vm3, %v5061_v13 }
 0xd8f   : > { %3703 = vmatpush3.bf16.xpose.msra.mxu1 %v2277_v14  ;;  %3704 = vmatprep.mubr.msk.bf16.mxu1 %vm4310_vm1, %v4309_v3  ;;  %v2399_v14 = vsel %vm1504_vm7, %v3491_v12, 0 }
 0xd90   : > { %3714 = vmatprep.subr.bf16.mxu1 %v4309_v3 }
 0xe00   : > { %v2270_v15 = vpop.permute.xlu0 %2269 }
 0xe01   : > { %3705 = vmatmul.mubr.msk.bf16.vlgmr.msra.gmra.mrb[36].mxu1 %vm1251_vm3, %v2270_v15 }
 0xe02   : > { %3716 = vmatprep.mubr.msk.bf16.mxu1 %vm4310_vm1, %v4309_v3  ;;  %3715 = vmatpush3.bf16.msra.mxu1 %v2399_v14 }
 0xe03   : > { %3726 = vmatprep.subr.bf16.mxu1 %v4309_v3 }
 0xe61   : > { %v2186_v16 = vpop.f32.mrb[32].mxu1 }
 0xe62   : > { %v2193_v19 = vsel %vm4898_vm4, %v2186_v16, -1e+30  ;;  %v3694_v20 = vpop.f32.mrb[33].mxu1 }
 0xe63   : > { %v2189_v21 = vpop.f32.mrb[34].mxu1  ;;  %v2195_v22 = vsel %vm1301_vm5, %v2193_v19, -inf }
 0xe64   : > { %v2194_v23 = vsel %vm4902_vm6, %v2189_v21, -1e+30  ;;  %2196 = vmax.xlane.f32.xlu1 %v2195_v22  ;;  %v3695_v18 = vpop.f32.mrb[35].mxu1 }
 0xe65   : > { %v2198_v24 = vsel %vm1301_vm5, %v2194_v23, -inf }
 0xe66   : > { %2199 = vmax.xlane.f32.xlu0 %v2198_v24 }
 0xed4   : > { %v2313_v25 = vpop.f32.mrb[36].mxu1 }
 0xed5   : > { %v2320_v26 = vsel %vm4898_vm4, %v2313_v25, -1e+30  ;;  %v3706_v27 = vpop.f32.mrb[37].mxu1 }
 0xed6   : > { %v2316_v28 = vpop.f32.mrb[38].mxu1  ;;  %v2322_v29 = vsel %vm1301_vm5, %v2320_v26, -inf }
 0xed7   : > { %v2321_v30 = vsel %vm4902_vm6, %v2316_v28, -1e+30  ;;  %2323 = vmax.xlane.f32.xlu1 %v2322_v29  ;;  %v3707_v5 = vpop.f32.mrb[39].mxu1 }
 0xed8   : > { %v2325_v32 = vsel %vm1301_vm5, %v2321_v30, -inf }
 0xedb   : > { %2326 = vmax.xlane.f32.xlu1 %v2325_v32 }
 0xef1   : > { %v2197_v6 = vpop.xlane.xlu1 %2196 }
 0xef2   : > { %v2201_v34 = vsub.f32 %v2193_v19, %v2197_v6 }
 0xef3   : > { %v2200_v35 = vpop.xlane.xlu0 %2199 }
 0xef4   : > { %v2203_v36 = vmul.f32 1.442695, %v2201_v34  ;;  %v2202_v37 = vsub.f32 %v2194_v23, %v2200_v35 }
 0xef6   : > { %3937 = vpow2.f32 %v2203_v36  ;;  %v2205_v38 = vmul.f32 1.442695, %v2202_v37 }
 0xef8   : > { %3939 = vpow2.f32 %v2205_v38 }
 0xf00   : > { %v3938_v39 = vpop.eup %3937 }
 0xf01   : > { %v2207_v40 = vsel %vm1301_vm5, %v3938_v39, 0.0 }
 0xf02   : > { %v3940_v41 = vpop.eup %3939  ;;  %2208 = vadd.xlane.f32.xlu1 %v2207_v40 }
 0xf03   : > { %v2210_v42 = vsel %vm1301_vm5, %v3940_v41, 0.0 }
 0xf06   : > { %2211 = vadd.xlane.f32.xlu1 %v2210_v42 }
 0xf64   : > { %v2324_v43 = vpop.xlane.xlu1 %2323 }
 0xf65   : > { %v2328_v44 = vsub.f32 %v2320_v26, %v2324_v43 }
 0xf67   : > { %v2330_v45 = vmul.f32 1.442695, %v2328_v44 }
 0xf68   : > { %v2327_v46 = vpop.xlane.xlu1 %2326 }
 0xf69   : > { %3941 = vpow2.f32 %v2330_v45  ;;  %v2329_v47 = vsub.f32 %v2321_v30, %v2327_v46 }
 0xf6b   : > { %v2332_v48 = vmul.f32 1.442695, %v2329_v47 }
 0xf6d   : > { %3943 = vpow2.f32 %v2332_v48 }
 0xf73   : > { %v3942_v49 = vpop.eup %3941 }
 0xf74   : > { %v2334_v51 = vsel %vm1301_vm5, %v3942_v49, 0.0 }
 0xf75   : > { %2335 = vadd.xlane.f32.xlu0 %v2334_v51 }
 0xf77   : > { %v3944_v17 = vpop.eup %3943 }
 0xf78   : > { %v2337_v52 = vsel %vm1301_vm5, %v3944_v17, 0.0 }
 0xf79   : > { %2338 = vadd.xlane.f32.xlu1 %v2337_v52 }
 0xf8a   : > { %2345 = vrot.lane.b32.xlu1 %v5052_v0, %s4313_s3 }
 0xf8b   : > { %2219 = vrot.lane.b32.xlu0 %v5052_v0, %s4311_s2  ;;  %s5387_s2 = sld [smem:[#allocation28_spill]] }
 0xf8e   : > { %2491 = vrot.lane.b32.xlu1 %v5052_v0, %s4317_s13 }
 0xf8f   : > { %2489 = vrot.lane.b32.xlu0 %v5061_v13, %s4317_s13  ;;  %v2209_v56 = vpop.xlane.xlu1 %2208 }
 0xf93   : > { %v2212_v57 = vpop.xlane.xlu1 %2211 }
 0xf94   : > { %3945 = vrcp.f32 %v2212_v57 }
 0xf95   : > { %3947 = vrcp.f32 %v2209_v56 }
 0xf9e   : > { %v3946_v58 = vpop.eup %3945 }
 0xf9f   : > { %v3948_v60 = vpop.eup %3947  ;;  %v2216_v61 = vmul.f32 %v3946_v58, %v3940_v41 }
 0xfa0   : > { %v2215_v62 = vmul.f32 %v3948_v60, %v3938_v39 }
 0xfa2   : > { %v2217_v2 = vpack.c.bf16 %v2216_v61, %v2215_v62 }
0x1002   : > { %v2336_v59 = vpop.xlane.xlu0 %2335 }
0x1003   : > { %3949 = vrcp.f32 %v2336_v59 }
0x1006   : > { %v2220_v63 = vpop.permute.xlu0 %2219  ;;  %v2339_v1 = vpop.xlane.xlu1 %2338 }
0x1007   : > { %3951 = vrcp.f32 %v2339_v1  ;;  %3697 = vmatpush3.bf16.msra.mxu0 %v2220_v63 }
0x1008   : > { %3708 = vmatprep.subr.bf16.mxu0 %v4309_v3 }
0x100a   : > { %3699 = vmatmul.mubr.msk.bf16.vlgmr.msra.gmra.mrb[28].mxu0 %vm1301_vm5, %v2217_v2  ;;  %v2346_v4 = vpop.permute.xlu1 %2345  ;;  %v2490_v28 = vpop.permute.xlu0 %2489 }
0x100b   : > { %3709 = vmatpush3.bf16.msra.mxu0 %v2346_v4  ;;  %3710 = vmatprep.mubr.msk.bf16.mxu0 %vm4310_vm1, %v4309_v3 }
0x100c   : > { %3720 = vmatprep.subr.bf16.mxu0 %v4309_v3 }
0x100d   : > { %v3950_v50 = vpop.eup %3949 }
0x100e   : > { %v2342_v8 = vmul.f32 %v3950_v50, %v3942_v49  ;;  %v2492_v18 = vpop.permute.xlu1 %2491 }
0x100f   : > { %v2497_v27 = vsel %vm1251_vm3, %v2492_v18, 0 }
0x1011   : > { %v3952_v7 = vpop.eup %3951 }
0x1012   : > { %v2343_v53 = vmul.f32 %v3952_v7, %v3944_v17 }
0x1014   : > { %v2344_v9 = vpack.c.bf16 %v2343_v53, %v2342_v8  ;;  %v3496_v53 = vld [vmem:[%s4772_s7 + $0x8] sm:$0xf] }
0x1016   : > { %3711 = vmatmul.mubr.msk.bf16.vlgmr.msra.gmra.mrb[32].mxu0 %vm1301_vm5, %v2344_v9  ;;  %v2619_v9 = vsel %vm1504_vm7, %v3496_v53, 0 }
0x1017   : > { %3722 = vmatprep.mubr.msk.bf16.mxu0 %vm4310_vm1, %v4309_v3  ;;  %3721 = vmatpush3.bf16.msra.mxu0 %v2446_v11 }
0x1018   : > { %3732 = vmatprep.subr.bf16.mxu0 %v4309_v3 }
0x10dd   : > { %v2259_v15 = vpop.f32.mrb[28].mxu0 }
0x10de   : > { %v3700_v16 = vpop.f32.mrb[29].mxu0 }
0x10df   : > { %v2262_v19 = vpop.f32.mrb[30].mxu0 }
0x10e0   : > { %v2266_v20 = vpack.c.bf16 %v2262_v19, %v2259_v15  ;;  %v3701_v21 = vpop.f32.mrb[31].mxu0 }
0x10e2   : > { %3723 = vmatmul.mubr.msk.bf16.vlgmr.msra.gmra.mrb[36].mxu0 %vm1251_vm3, %v2266_v20 }
0x10e3   : > { %3734 = vmatprep.mubr.msk.bf16.mxu0 %vm4310_vm1, %v4309_v3 }
0x10e9   : > { %v2385_v22 = vpop.f32.mrb[32].mxu0 }
0x10ea   : > { %v3712_v23 = vpop.f32.mrb[33].mxu0 }
0x10eb   : > { %v2388_v24 = vpop.f32.mrb[34].mxu0 }
0x10ec   : > { %v2392_v25 = vpack.c.bf16 %v2388_v24, %v2385_v22  ;;  %v3713_v26 = vpop.f32.mrb[35].mxu0 }
0x10ee   : > { %3717 = vmatmul.mubr.msk.bf16.vlgmr.msra.gmra.mrb[40].mxu1 %vm1251_vm3, %v2392_v25 }
0x10ef   : > { %3727 = vmatpush3.bf16.xpose.msra.mxu1 %v2497_v27  ;;  %3728 = vmatprep.mubr.msk.bf16.mxu1 %vm4310_vm1, %v4309_v3 }
0x10f0   : > { %3738 = vmatprep.subr.bf16.mxu1 %v4309_v3 }
0x10f6   : > { %3729 = vmatmul.mubr.msk.bf16.vlgmr.msra.gmra.mrb[44].mxu1 %vm1251_vm3, %v2490_v28 }
0x10f7   : > { %3740 = vmatprep.mubr.msk.bf16.mxu1 %vm4310_vm1, %v4309_v3  ;;  %3739 = vmatpush3.bf16.msra.mxu1 %v2619_v9 }
0x10f8   : > { %3750 = vmatprep.subr.bf16.mxu1 %v4309_v3 }
0x11b5   : > { %v2482_v29 = vpop.f32.mrb[36].mxu0 }
0x11b6   : > { %v3724_v30 = vpop.f32.mrb[37].mxu0 }
0x11b7   : > { %v2485_v5 = vpop.f32.mrb[38].mxu0 }
0x11b8   : > { %v3725_v32 = vpop.f32.mrb[39].mxu0 }
0x11c1   : > { %v2435_v6 = vpop.f32.mrb[40].mxu1 }
0x11c2   : > { %v5123_v34 = vadd.f32 %v2482_v29, %v2435_v6  ;;  %v3718_v35 = vpop.f32.mrb[41].mxu1  ;;  %v3500_v6 = vld [vmem:[%s4772_s7 + $0xc] sm:$0xf]  ;;  %s5386_s7 = scalar_lea.vmem [#allocation11], %s4763_s26 }
0x11c3   : > { %v2438_v36 = vpop.f32.mrb[42].mxu1  ;;  %v2794_v35 = vsel %vm1504_vm7, %v3500_v6, 0 }
0x11c4   : > { %v5125_v37 = vadd.f32 %v2485_v5, %v2438_v36  ;;  %v3719_v38 = vpop.f32.mrb[43].mxu1 }
0x11c9   : > { %v2533_v39 = vpop.f32.mrb[44].mxu1 }
0x11ca   : > { %v2540_v40 = vsel %vm4898_vm4, %v2533_v39, -1e+30  ;;  %v3730_v41 = vpop.f32.mrb[45].mxu1 }
0x11cb   : > { %v2536_v42 = vpop.f32.mrb[46].mxu1  ;;  %v2542_v43 = vsel %vm1301_vm5, %v2540_v40, -inf }
0x11cc   : > { %v2541_v44 = vsel %vm4902_vm6, %v2536_v42, -1e+30  ;;  %2543 = vmax.xlane.f32.xlu1 %v2542_v43  ;;  %v3731_v45 = vpop.f32.mrb[47].mxu1 }
0x11cd   : > { %v2545_v46 = vsel %vm1301_vm5, %v2541_v44, -inf }
0x11ce   : > { %2546 = vmax.xlane.f32.xlu0 %v2545_v46 }
0x1259   : > { %v2544_v47 = vpop.xlane.xlu1 %2543 }
0x125a   : > { %v2548_v48 = vsub.f32 %v2540_v40, %v2544_v47 }
0x125b   : > { %v2547_v49 = vpop.xlane.xlu0 %2546 }
0x125c   : > { %v2550_v51 = vmul.f32 1.442695, %v2548_v48  ;;  %v2549_v17 = vsub.f32 %v2541_v44, %v2547_v49 }
0x125e   : > { %3953 = vpow2.f32 %v2550_v51  ;;  %v2552_v52 = vmul.f32 1.442695, %v2549_v17 }
0x1260   : > { %3955 = vpow2.f32 %v2552_v52 }
0x1268   : > { %v3954_v56 = vpop.eup %3953 }
0x1269   : > { %v2554_v57 = vsel %vm1301_vm5, %v3954_v56, 0.0 }
0x126a   : > { %v3956_v58 = vpop.eup %3955  ;;  %2555 = vadd.xlane.f32.xlu0 %v2554_v57  ;;  %v3502_v57 = vld [vmem:[%s5386_s7] ss:$0 sm:$0xff] }
0x126b   : > { %v2557_v59 = vsel %vm1301_vm5, %v3956_v58, 0.0 }
0x126c   : > { %2558 = vadd.xlane.f32.xlu1 %v2557_v59 }
0x127d   : > { %2666 = vrot.lane.b32.xlu1 %v5052_v0, %s4320_s25 }
0x1280   : > { %2565 = vrot.lane.b32.xlu0 %v5052_v0, %s4316_s9 }
0x1281   : > { %2664 = vrot.lane.b32.xlu1 %v5061_v13, %s4320_s25 }
0x12f7   : > { %v2556_v60 = vpop.xlane.xlu0 %2555 }
0x12f8   : > { %3957 = vrcp.f32 %v2556_v60 }
0x12f9   : > { %v2559_v61 = vpop.xlane.xlu1 %2558 }
0x12fa   : > { %3959 = vrcp.f32 %v2559_v61 }
0x12fb   : > { %v2566_v62 = vpop.permute.xlu0 %2565 }
0x12fc   : > { %3733 = vmatpush3.bf16.msra.mxu0 %v2566_v62 }
0x12fd   : > { %3744 = vmatprep.subr.bf16.mxu0 %v4309_v3  ;;  %v2667_v50 = vpop.permute.xlu1 %2666 }
0x12fe   : > { %v2672_v8 = vsel %vm1251_vm3, %v2667_v50, 0 }
0x1301   : > { %v2665_v13 = vpop.permute.xlu1 %2664 }
0x1302   : > { %v3958_v63 = vpop.eup %3957 }
0x1303   : > { %v2562_v2 = vmul.f32 %v3958_v63, %v3954_v56 }
0x1304   : > { %v3960_v1 = vpop.eup %3959 }
0x1305   : > { %v2563_v4 = vmul.f32 %v3960_v1, %v3956_v58 }
0x1307   : > { %v2564_v7 = vpack.c.bf16 %v2563_v4, %v2562_v2 }
0x1309   : > { %3735 = vmatmul.mubr.msk.bf16.vlgmr.msra.gmra.mrb[40].mxu0 %vm1301_vm5, %v2564_v7 }
0x130a   : > { %3745 = vmatpush3.bf16.xpose.msra.mxu0 %v2672_v8  ;;  %3746 = vmatprep.mubr.msk.bf16.mxu0 %vm4310_vm1, %v4309_v3 }
0x130b   : > { %3756 = vmatprep.subr.bf16.mxu0 %v4309_v3 }
0x1311   : > { %3747 = vmatmul.mubr.msk.bf16.vlgmr.msra.gmra.mrb[44].mxu0 %vm1251_vm3, %v2665_v13 }
0x1312   : > { %3758 = vmatprep.mubr.msk.bf16.mxu0 %vm4310_vm1, %v4309_v3  ;;  %3757 = vmatpush3.bf16.msra.mxu0 %v2794_v35  ;;  %v3899_v35 = vld [vmem:[%s5387_s2 + $0x10] sm:$0xff]  }
0x1313   : > { %3770 = vmatprep.subr.bf16.mxu0 %v4309_v3 }
0x13dc   : > { %v2605_v10 = vpop.f32.mrb[40].mxu0 }
0x13dd   : > { %v3736_v11 = vpop.f32.mrb[41].mxu0 }
0x13de   : > { %v2608_v12 = vpop.f32.mrb[42].mxu0 }
0x13df   : > { %v2612_v14 = vpack.c.bf16 %v2608_v12, %v2605_v10  ;;  %v3737_v15 = vpop.f32.mrb[43].mxu0 }
0x13e0   : > { %v3895_v15 = vld [vmem:[%s4779_s5] sm:$0xff]  }
0x13e1   : > { %3741 = vmatmul.mubr.msk.bf16.vlgmr.msra.gmra.mrb[48].mxu1 %vm1251_vm3, %v2612_v14 }
0x13e2   : > { %3752 = vmatprep.mubr.msk.bf16.mxu1 %vm4310_vm1, %v4309_v3 }
0x13e4   : > { %v2708_v16 = vpop.f32.mrb[44].mxu0 }
0x13e5   : > { %v2715_v19 = vsel %vm4898_vm4, %v2708_v16, -1e+30  ;;  %v3748_v20 = vpop.f32.mrb[45].mxu0  ;;  %v3896_v16 = vld [vmem:[%s4779_s5 + $0x8] sm:$0xff]  }
0x13e6   : > { %v2711_v21 = vpop.f32.mrb[46].mxu0  ;;  %v2717_v22 = vsel %vm1301_vm5, %v2715_v19, -inf  ;;  %v3898_v20 = vld [vmem:[%s5387_s2 + $0x8] sm:$0xff]  }
0x13e7   : > { %v2716_v23 = vsel %vm4902_vm6, %v2711_v21, -1e+30  ;;  %2718 = vmax.xlane.f32.xlu0 %v2717_v22  ;;  %v3749_v18 = vpop.f32.mrb[47].mxu0 }
0x13e8   : > { %v2720_v24 = vsel %vm1301_vm5, %v2716_v23, -inf }
0x13e9   : > { %2721 = vmax.xlane.f32.xlu1 %v2720_v24 }
0x13fa   : > { %2740 = vrot.lane.b32.xlu1 %v5052_v0, %s4318_s6 }
0x1474   : > { %v2719_v25 = vpop.xlane.xlu0 %2718 }
0x1475   : > { %v2723_v26 = vsub.f32 %v2715_v19, %v2719_v25  ;;  %v3897_v19 = vld [vmem:[%s5387_s2] sm:$0xff]  }
0x1476   : > { %v2722_v31 = vpop.xlane.xlu1 %2721 }
0x1477   : > { %v2725_v27 = vmul.f32 1.442695, %v2723_v26  ;;  %v2724_v28 = vsub.f32 %v2716_v23, %v2722_v31 }
0x1479   : > { %3961 = vpow2.f32 %v2725_v27  ;;  %v2727_v29 = vmul.f32 1.442695, %v2724_v28  ;;  %v3503_v27 = vld [vmem:[%s1108_s24] ss:$0 sm:$0xff]  ;;  %s5390_s24 = scalar_lea.vmem [#allocation14], %s4763_s26 }
0x147a   : > { %v2741_v30 = vpop.permute.xlu1 %2740 }
0x147b   : > { %3963 = vpow2.f32 %v2727_v29  ;;  %3751 = vmatpush3.bf16.msra.mxu1 %v2741_v30 }
0x147c   : > { %3762 = vmatprep.subr.bf16.mxu1 %v4309_v3 }
0x1483   : > { %v3962_v33 = vpop.eup %3961 }
0x1484   : > { %v2729_v5 = vsel %vm1301_vm5, %v3962_v33, 0.0 }
0x1485   : > { %v3964_v32 = vpop.eup %3963  ;;  %2730 = vadd.xlane.f32.xlu0 %v2729_v5 }
0x1486   : > { %v2732_v0 = vsel %vm1301_vm5, %v3964_v32, 0.0 }
0x1489   : > { %2733 = vadd.xlane.f32.xlu0 %v2732_v0 }
0x14b4   : > { %v2655_v36 = vpop.f32.mrb[48].mxu1 }
0x14b5   : > { %v2662_v38 = vadd.f32 %v2655_v36, %v5123_v34  ;;  %v3742_v39 = vpop.f32.mrb[49].mxu1  ;;  %v3900_v36 = vld [vmem:[%s5387_s2 + $0x18] sm:$0xff]  }
0x14b6   : > { %v2658_v40 = vpop.f32.mrb[50].mxu1 }
0x14b7   : > { %v2663_v41 = vadd.f32 %v2658_v40, %v5125_v37  ;;  %v3743_v42 = vpop.f32.mrb[51].mxu1 }
0x1512   : > { %v2731_v43 = vpop.xlane.xlu0 %2730 }
0x1513   : > { %3965 = vrcp.f32 %v2731_v43 }
0x1516   : > { %v2734_v44 = vpop.xlane.xlu0 %2733 }
0x1517   : > { %3967 = vrcp.f32 %v2734_v44 }
0x151d   : > { %v3966_v45 = vpop.eup %3965 }
0x151e   : > { %v2737_v47 = vmul.f32 %v3966_v45, %v3962_v33  ;;  %v3504_v33 = vld [vmem:[%s1111_s20] ss:$0 sm:$0xff]  ;;  %s5391_s20 = scalar_lea.vmem [#allocation15], %s4763_s26 }
0x1521   : > { %v3968_v46 = vpop.eup %3967 }
0x1522   : > { %v2738_v48 = vmul.f32 %v3968_v46, %v3964_v32 }
0x1524   : > { %v2739_v49 = vpack.c.bf16 %v2738_v48, %v2737_v47  ;;  %v3509_v48 = vld [vmem:[%s5391_s20] ss:$0 sm:$0xff] }
0x1526   : > { %3753 = vmatmul.mubr.msk.bf16.vlgmr.msra.gmra.mrb[52].mxu1 %vm1301_vm5, %v2739_v49 }
0x1527   : > { %3766 = vmatprep.mubr.msk.bf16.mxu1 %vm4310_vm1, %v4309_v3  ;;  %3763 = vmatpush3.bf16.msra.mxu1 %v3895_v15 }
0x1528   : > { %3764 = vmatprep.subr.bf16.mxu1 %v4309_v3 }
0x152b   : > { %3765 = vmatpush3.bf16.msra.mxu1 %v3896_v16 }
0x15f9   : > { %v2780_v34 = vpop.f32.mrb[52].mxu1 }
0x15fa   : > { %v3754_v51 = vpop.f32.mrb[53].mxu1 }
0x15fb   : > { %v2783_v17 = vpop.f32.mrb[54].mxu1 }
0x15fc   : > { %v2787_v37 = vpack.c.bf16 %v2783_v17, %v2780_v34  ;;  %v3755_v52 = vpop.f32.mrb[55].mxu1 }
0x15fe   : > { %3759 = vmatmul.mubr.msk.bf16.vlgmr.msra.gmra.mrb[48].mxu0 %vm1251_vm3, %v2787_v37 }
0x15ff   : > { %3778 = vmatprep.mubr.msk.bf16.mxu0 %vm4310_vm1, %v4309_v3  ;;  %3771 = vmatpush3.bf16.msra.mxu0 %v3897_v19 }
0x1600   : > { %3772 = vmatprep.subr.bf16.mxu0 %v4309_v3 }
0x1603   : > { %3773 = vmatpush3.bf16.msra.mxu0 %v3898_v20 }
0x1604   : > { %3774 = vmatprep.subr.bf16.mxu0 %v4309_v3 }
0x1607   : > { %3775 = vmatpush3.bf16.msra.mxu0 %v3899_v35 }
0x1608   : > { %3776 = vmatprep.subr.bf16.mxu0 %v4309_v3 }
0x160b   : > { %3777 = vmatpush3.bf16.msra.mxu0 %v3900_v36 }
0x16d1   : > { %v2830_v56 = vpop.f32.mrb[48].mxu0 }
0x16d2   : > { %v2837_v58 = vadd.f32 %v2830_v56, %v2662_v38  ;;  %v3760_v59 = vpop.f32.mrb[49].mxu0  ;;  %v3505_v38 = vld [vmem:[%s5390_s24] ss:$0 sm:$0xff] }
0x16d3   : > { %v2833_v60 = vpop.f32.mrb[50].mxu0 }
0x16d4   : > { %v2846_v61 = vadd.f32 %v3502_v57, %v2837_v58  ;;  %v2838_v62 = vadd.f32 %v2833_v60, %v2663_v41  ;;  %v3761_v63 = vpop.f32.mrb[51].mxu0 }
0x16d6   : > { %v2847_v1 = vadd.f32 %v3502_v57, %v2838_v62  ;;  %v2848_v2 = vadd.f32 %v2846_v61, %v5041_v54 }
0x16d8   : > { %v2850_v4 = vsel %vm1199_vm2, %v2848_v2, 0.0  ;;  %v2849_v50 = vadd.f32 %v2847_v1, %v5043_v55 }
0x16d9   : > { %2851 = vadd.xlane.f32.xlu0 %v2850_v4 }
0x16da   : > { %v2853_v7 = vsel %vm1199_vm2, %v2849_v50, 0.0 }
0x16dd   : > { %2854 = vadd.xlane.f32.xlu0 %v2853_v7 }
0x1766   : > { %v2852_v8 = vpop.xlane.xlu0 %2851 }
0x1767   : > { %v2856_v13 = vmul.f32 0.03125, %v2852_v8 }
0x1769   : > { %v2858_v53 = vsub.f32 %v2848_v2, %v2856_v13 }
0x176a   : > { %v2855_v9 = vpop.xlane.xlu0 %2854 }
0x176b   : > { %v2857_v10 = vmul.f32 0.03125, %v2855_v9  ;;  %v2860_v11 = vmul.f32 %v2858_v53, %v2858_v53 }
0x176d   : > { %v2859_v12 = vsub.f32 %v2849_v50, %v2857_v10  ;;  %v2862_v54 = vsel %vm1199_vm2, %v2860_v11, 0.0 }
0x176e   : > { %2863 = vadd.xlane.f32.xlu0 %v2862_v54  ;;  %v3515_v54 = vld [vmem:[%s1114_s0] ss:$0 sm:$0xff] }
0x176f   : > { %v2861_v14 = vmul.f32 %v2859_v12, %v2859_v12 }
0x1771   : > { %v2865_v55 = vsel %vm1199_vm2, %v2861_v14, 0.0 }
0x1772   : > { %2866 = vadd.xlane.f32.xlu0 %v2865_v55  ;;  %v3516_v55 = vld [vmem:[%s1117_s4] ss:$0 sm:$0xff] }
0x17fb   : > { %v2864_v21 = vpop.xlane.xlu0 %2863 }
0x17fc   : > { %v2868_v22 = vmul.f32 0.03125, %v2864_v21 }
0x17fe   : > { %v2870_v23 = vadd.f32 1e-05, %v2868_v22 }
0x17ff   : > { %v2867_v18 = vpop.xlane.xlu0 %2866 }
0x1800   : > { %3969 = vrsqrt.f32 %v2870_v23  ;;  %v2869_v24 = vmul.f32 0.03125, %v2867_v18  ;;  %v3101_v23 = vld [vmem:[#allocation3] sm:$0xff] (!%p3517_p3)  ;;  %v3102_v18 = vld [vmem:[#allocation3 + $0x8] sm:$0xff] (!%p3517_p3) }
0x1802   : > { %v2871_v25 = vadd.f32 1e-05, %v2869_v24 }
0x1804   : > { %3971 = vrsqrt.f32 %v2871_v25 }
0x180a   : > { %v3970_v26 = vpop.eup %3969 }
0x180b   : > { %v2874_v31 = vmul.f32 %v3970_v26, %v2858_v53 }
0x180d   : > { %v2883_v29 = vmul.f32 %v3503_v27, %v2874_v31 }
0x180e   : > { %v3972_v28 = vpop.eup %3971 }
0x180f   : > { %v2875_v30 = vmul.f32 %v3972_v28, %v2859_v12  ;;  %v2892_v32 = vadd.f32 %v3504_v33, %v2883_v29 }
0x1811   : > { %v2884_v5 = vmul.f32 %v3503_v27, %v2875_v30 }
0x1813   : > { %v2893_v0 = vadd.f32 %v3504_v33, %v2884_v5 }
0x1815   : > { %v2894_v6 = vpack.c.bf16 %v2893_v0, %v2892_v32 }
0x1817   : > { %3767 = vmatmul.mubr.msk.bf16.vlgmr.msra.gmra.mrb[56].mxu1 %vm1199_vm2, %v2894_v6 }
0x18ea   : > { %v2955_v39 = vpop.f32.mrb[56].mxu1 }
0x18eb   : > { %v2956_v40 = vadd.f32 %v3505_v38, %v2955_v39  ;;  %v3768_v41 = vpop.f32.mrb[57].mxu1 }
0x18ec   : > { %v2958_v42 = vpop.f32.mrb[58].mxu1 }
0x18ed   : > { %v2959_v43 = vadd.f32 %v3505_v38, %v2958_v42  ;;  %v3769_v44 = vpop.f32.mrb[59].mxu1  ;;  %v2962_v45 = vmax.f32 %v2956_v40, 0.0 }
0x18ef   : > { %v2963_v46 = vmax.f32 %v2959_v43, 0.0 }
0x18f1   : > { %v2964_v47 = vpack.c.bf16 %v2963_v46, %v2962_v45 }
0x18f3   : > { %3779 = vmatmul.mubr.msk.bf16.vlgmr.msra.gmra.mrb[52].mxu0 %vm3004_vm8, %v2964_v47 }
0x19c6   : > { %v3042_v49 = vpop.f32.mrb[52].mxu0 }
0x19c7   : > { %v3043_v34 = vadd.f32 %v3509_v48, %v3042_v49  ;;  %v3780_v3 = vpop.f32.mrb[53].mxu0 }
0x19c8   : > { %v3045_v51 = vpop.f32.mrb[54].mxu0 }
0x19c9   : > { %v3046_v17 = vadd.f32 %v3509_v48, %v3045_v51  ;;  %v3781_v37 = vpop.f32.mrb[55].mxu0  ;;  %v3049_v52 = vadd.f32 %v3043_v34, %v2892_v32 }
0x19cb   : > { %v3051_v56 = vsel %vm1199_vm2, %v3049_v52, 0.0  ;;  %v3050_v57 = vadd.f32 %v3046_v17, %v2893_v0 }
0x19cc   : > { %3052 = vadd.xlane.f32.xlu1 %v3051_v56 }
0x19cd   : > { %v3054_v58 = vsel %vm1199_vm2, %v3050_v57, 0.0 }
0x19ce   : > { %3055 = vadd.xlane.f32.xlu0 %v3054_v58 }
0x1a59   : > { %v3053_v59 = vpop.xlane.xlu1 %3052 }
0x1a5a   : > { %v3057_v60 = vmul.f32 0.03125, %v3053_v59 }
0x1a5b   : > { %v3056_v61 = vpop.xlane.xlu0 %3055 }
0x1a5c   : > { %v3059_v62 = vsub.f32 %v3049_v52, %v3057_v60  ;;  %v3058_v63 = vmul.f32 0.03125, %v3056_v61 }
0x1a5e   : > { %v3060_v1 = vsub.f32 %v3050_v57, %v3058_v63  ;;  %v3061_v2 = vmul.f32 %v3059_v62, %v3059_v62 }
0x1a60   : > { %v3063_v4 = vsel %vm1199_vm2, %v3061_v2, 0.0  ;;  %v3062_v50 = vmul.f32 %v3060_v1, %v3060_v1 }
0x1a61   : > { %3064 = vadd.xlane.f32.xlu0 %v3063_v4 }
0x1a62   : > { %v3066_v7 = vsel %vm1199_vm2, %v3062_v50, 0.0 }
0x1a65   : > { %3067 = vadd.xlane.f32.xlu0 %v3066_v7 }
0x1aee   : > { %v3065_v8 = vpop.xlane.xlu0 %3064 }
0x1aef   : > { %v3069_v13 = vmul.f32 0.03125, %v3065_v8 }
0x1af1   : > { %v3071_v53 = vadd.f32 1e-05, %v3069_v13 }
0x1af2   : > { %v3068_v9 = vpop.xlane.xlu0 %3067 }
0x1af3   : > { %3973 = vrsqrt.f32 %v3071_v53  ;;  %v3070_v10 = vmul.f32 0.03125, %v3068_v9 }
0x1af5   : > { %v3072_v11 = vadd.f32 1e-05, %v3070_v10 }
0x1af7   : > { %3975 = vrsqrt.f32 %v3072_v11 }
0x1afd   : > { %v3974_v12 = vpop.eup %3973 }
0x1afe   : > { %v3075_v14 = vmul.f32 %v3974_v12, %v3059_v62 }
0x1b00   : > { %v3084_v15 = vmul.f32 %v3515_v54, %v3075_v14 }
0x1b01   : > { %v3976_v16 = vpop.eup %3975 }
0x1b02   : > { %v3093_v19 = vadd.f32 %v3516_v55, %v3084_v15  ;;  %v3076_v20 = vmul.f32 %v3976_v16, %v3060_v1  ;;  %3100 = sbr.rel (%p3517_p3) target bundleno = 6925 (0x1b0d), region = 148 }
0x1b04   : > { %3095 = vst.msk [vmem:[#allocation2] sm:$0xff] %vm1199_vm2, %v3093_v19  ;;  %v3085_v21 = vmul.f32 %v3515_v54, %v3076_v20  ;;  %v3103_v24 = vadd.f32 (!%p3517_p3), %v3101_v23, %v3093_v19 }
0x1b06   : > { %v3094_v22 = vadd.f32 %v3516_v55, %v3085_v21  ;;  %v3105_v26 = vmax.f32 (!%p3517_p3), %v3103_v24, 0.0 }
0x1b08   : > { %3096 = vst.msk [vmem:[#allocation2 + $0x8] sm:$0xff] %vm1199_vm2, %v3094_v22  ;;  %v3104_v25 = vadd.f32 (!%p3517_p3), %v3102_v18, %v3094_v22  ;;  %3107 = vst.msk [vmem:[#allocation17] sm:$0xff] (!%p3517_p3), %vm1199_vm2, %v3105_v26 }
0x1b0a   : > { %v3106_v31 = vmax.f32 %v3104_v25, 0.0 }
0x1b0c   : > { %3108 = vst.msk [vmem:[#allocation17 + $0x8] sm:$0xff] %vm1199_vm2, %v3106_v31 }
0x1b0d PF: > { %p3833_p9 = scmp.eq.s32.totalorder %s4604_s18, 1  ;;  %s4322_s17 = smov [#allocation17]  }
0x1b0e   : > { %s3115_s0 = sshll.u32 %s4322_s17, 4  ;;  %s3116_s0 = int_to_ptr.vmem [resolvable:$true] %s3115_s0 }
0x1b0f   : > { %s4215_s4 = scalar_lea.vmem %s3116_s0, 256  ;;  %p4222_p13 = scmp.lt.s32.totalorder %s3116_s0, %s3116_s0 }
0x1b10   : > { %p4216_p0 = scmp.ne.s32.totalorder %s3116_s0, %s4215_s4  ;;  %p4223_p4 = scmp.lt.s32.totalorder %s4215_s4, %s4215_s4 }
0x1b12   : > { %p4217_p10 = pnand %p4216_p0, %p3833_p9  ;;  %p4224_p12 = por %p4223_p4, %p4222_p13 }
0x1b14   : > { %p4218_p6 = pneg %p4217_p10 }
0x1b16   : > { %p4225_p1 = pnand %p4224_p12, %p4218_p6 }
0x1b18   : > { %4228 = shalt.err (!%p4225_p1)
}
0x1b19   : > { %s5394_s1 = sld [smem:[#allocation50_spill]] }
0x1b1f   : > { %s4229_s21 = scalar_lea.hbm %s5394_s1, 256 }
0x1b20   : > { %p4230_p5 = scmp.ne.s32.totalorder %s5394_s1, %s4229_s21  ;;  %p4235_p7 = scmp.lt.u32.totalorder %s4229_s21, %s5394_s1 }
0x1b22   : > { %p4231_p2 = pnand %p4230_p5, %p3833_p9 }
0x1b24   : > { %p4232_p11 = pneg %p4231_p2 }
0x1b26   : > { %p4237_p8 = pnand %p4235_p7, %p4232_p11 }
0x1b28   : > { %4240 = shalt.err (!%p4237_p8)
}
0x1b29   : > { %s4323_s23 = smov 128   ;;  %s4324_s11 = smov 8  }
0x1b2a   : > { %3801 = dma.vmem_to_hbm [thread:$0]  (%p3833_p9), %s3116_s0, 256, %s5394_s1, [#allocation5], %s4323_s23, %s4323_s23, %s4324_s11  }
0x1b2b   : > { %4278 = dma.done.wait (%p3833_p9), [#allocation5], 256  }
0x1b2c   : > { %4280 = vsyncadd (%p3833_p9), [#allocation5], 4294967040 }
0x1b2d PF: > { %s5395_s30 = sld [smem:[#allocation26_spill]]  ;;  %s5396_s3 = sld [smem:[#allocation24_spill]] }
0x1b2e   : > { %s5397_s28 = sld [smem:[#allocation25_spill]]  ;;  %s5398_s29 = sld [smem:[#allocation27_spill]] }
0x1b33   : > { %p43_p3 = scmp.ge.s32.totalorder %s5395_s30, 4  }
0x1b35   :  { %45 = sbr.rel (!%p43_p3) target bundleno = 34 (0x22), region = 275 }
0x1b3c   :  { %3131 = vsyncpa [#allocation4], 1 }
0x1b3d   :  { %3133 = vsyncpa [#allocation4 + $0x1], 1 }
0x1b3e   :  { %3134 = vsyncpa [#allocation7], 1 }
0x1b3f   :  { %3136 = vsyncpa [#allocation7 + $0x1], 1 }
0x1b40   :  { %3137 = vsyncpa [#allocation10], 1 }
0x1b41   :  { %3139 = vsyncpa [#allocation10 + $0x1], 1 }
0x1b42   :  { %3140 = vsyncpa [#allocation13], 1 }
0x1b43   :  { %3142 = vsyncpa [#allocation13 + $0x1], 1 }
0x1b44   :  { %3143 = vsyncpa [#allocation16], 1 }
0x1b45   :  { %3145 = vsyncpa [#allocation16 + $0x1], 1 }
0x1b46   :  { %3146 = vsyncpa [#allocation5], 1 }
0x1b47   :  { %3148 = vsyncpa [#allocation5 + $0x1], 1 }

</bundles_post_ra>
